<compile_context>
chip_gen: v6e
topology: v6e:2x2x1
jax: 0.10.0
libtpu: 0.0.40
codegen_flags: <defaults>
</compile_context>

<pallas_src>
import functools

import jax
import jax.numpy as jnp
from jax.experimental import pallas as pl
from jax.experimental.pallas import tpu as pltpu

_BN_EPS = 1e-5
_COMPUTE_DTYPE = jnp.bfloat16          # MXU-native inputs; accum/epilogue in f32


# ------------------------- generation-aware budgets ---------------------------


def _vmem_capacity_bytes():
    try:
        cap = getattr(pltpu.get_tpu_info(), "vmem_capacity_bytes", None)
        if cap:
            return int(cap)
    except Exception:
        pass
    return 64 * 1024 * 1024            # conservative (v7x-sized) fallback


_VMEM_CAP = _vmem_capacity_bytes()
_VMEM_LIMIT = min(_VMEM_CAP // 2, 96 * 1024 * 1024)   # 32 MiB on v7x, 64 MiB on v5e/v6e
_SMALL_VMEM = _VMEM_CAP <= 96 * 1024 * 1024           # v7x (64 MiB / TC)
_TM_CAP = 512 if _SMALL_VMEM else 1024                # bigger tiles on 128 MiB parts
_TN_CAP = 512
_TK_CAP = 512


# ------------------------------- small utils ---------------------------------


def _round_up(x, m):
    return (x + m - 1) // m * m


def _pad2(a, rows, cols):
    r, c = a.shape
    return jnp.pad(a, ((0, rows - r), (0, cols - c)))


def _fold_bn(gamma, beta, mean, var):
    scale = gamma / jnp.sqrt(var + _BN_EPS)
    bias = beta - mean * scale
    return scale, bias


def _pick_channel_tile(total, cap):
    """Largest multiple of 128 that divides `total` (itself a multiple of 128)."""
    t = min(cap, total)
    t -= t % 128
    t = max(t, 128)
    while total % t:
        t -= 128
    return t


def _cost(flops, bytes_accessed):
    return pl.CostEstimate(flops=int(flops), transcendentals=0,
                           bytes_accessed=int(bytes_accessed))


def _nbytes(a):
    return a.size * a.dtype.itemsize


# --------------------------- tiled matmul kernel ------------------------------
# y = maybe_relu(x @ w + bias [+ res]); BN scale pre-folded into w columns.


def _matmul_kernel(*refs, relu, has_res):
    if has_res:
        x_ref, w_ref, b_ref, res_ref, o_ref, acc_ref = refs
    else:
        x_ref, w_ref, b_ref, o_ref, acc_ref = refs
        res_ref = None

    @pl.when(pl.program_id(2) == 0)
    def _():
        acc_ref[...] = jnp.zeros_like(acc_ref)

    acc_ref[...] += jnp.dot(x_ref[...], w_ref[...],
                            preferred_element_type=jnp.float32)

    @pl.when(pl.program_id(2) == pl.num_programs(2) - 1)
    def _():
        y = acc_ref[...] + b_ref[...]
        if res_ref is not None:
            y = y + res_ref[...].astype(jnp.float32)
        if relu:
            y = jnp.maximum(y, 0.0)
        o_ref[...] = y.astype(o_ref.dtype)


def matmul_bias_act(x, w, bias, *, relu, res=None, keep_padded_cols=False,
                    tm_cap=None, tn_cap=None, tk_cap=None):
    """Tiled (M, N, K) Pallas matmul with fused bias / residual / ReLU epilogue.

    x: (M, K), w: (K, N), bias: (N,) float32, res: optional (M, *).
    bf16 MXU inputs, f32 VMEM accumulator.  K is left un-padded (full-K block)
    when it fits a single tile, so narrow layers don't pay a padding HBM copy.
    """
    tm_cap = tm_cap or _TM_CAP
    tn_cap = tn_cap or _TN_CAP
    tk_cap = tk_cap or _TK_CAP

    m, k = x.shape
    k2, n = w.shape
    assert k == k2

    x = x.astype(_COMPUTE_DTYPE)
    w = w.astype(_COMPUTE_DTYPE)

    tm = min(tm_cap, _round_up(m, 8))
    tn = min(tn_cap, _round_up(n, 128))
    if k <= tk_cap:
        tk, kp = k, k                       # full-K block: no pad copy, no K grid
    else:
        tk = tk_cap
        kp = _round_up(k, tk)
    mp, np_ = _round_up(m, tm), _round_up(n, tn)

    xp = x if (mp == m and kp == k) else _pad2(x, mp, kp)
    wp = w if (kp == k and np_ == n) else _pad2(w, kp, np_)
    bp = _pad2(bias.reshape(1, -1).astype(jnp.float32), 1, np_)

    in_specs = [
        pl.BlockSpec((tm, tk), lambda i, j, l: (i, l)),
        pl.BlockSpec((tk, tn), lambda i, j, l: (l, j)),
        pl.BlockSpec((1, tn), lambda i, j, l: (0, j)),
    ]
    args = [xp, wp, bp]
    if res is not None:
        assert res.shape[0] == m
        res = res.astype(_COMPUTE_DTYPE)
        if res.shape[1] > np_:
            res = res[:, :np_]              # extra cols are zero padding
        if res.shape != (mp, np_):
            res = _pad2(res, mp, np_)
        args.append(res)
        in_specs.append(pl.BlockSpec((tm, tn), lambda i, j, l: (i, j)))

    cost = _cost(2 * mp * np_ * kp,
                 sum(_nbytes(a) for a in args) + mp * np_ * 2)

    kernel = functools.partial(_matmul_kernel, relu=relu, has_res=res is not None)
    out = pl.pallas_call(
        kernel,
        out_shape=jax.ShapeDtypeStruct((mp, np_), _COMPUTE_DTYPE),
        grid_spec=pltpu.PrefetchScalarGridSpec(
            num_scalar_prefetch=0,
            grid=(mp // tm, np_ // tn, kp // tk),
            in_specs=in_specs,
            out_specs=pl.BlockSpec((tm, tn), lambda i, j, l: (i, j)),
            scratch_shapes=[pltpu.VMEM((tm, tn), jnp.float32)],
        ),
        compiler_params=pltpu.CompilerParams(
            dimension_semantics=("parallel", "parallel", "arbitrary"),
            vmem_limit_bytes=_VMEM_LIMIT),
        cost_estimate=cost,
    )(*args)

    out = out[:m]
    return out if keep_padded_cols else out[:, :n]


# --------------------- 3x3 conv + BN + ReLU (in-kernel taps) ------------------


def _conv3x3_kernel(x_ref, w_ref, b_ref, o_ref, acc_ref, *, stride, ho, wo):
    @pl.when(pl.program_id(2) == 0)
    def _():
        acc_ref[...] = jnp.zeros_like(acc_ref)

    ctk = x_ref.shape[-1]
    for dy in range(3):                      # 9 taps: unrolled reduction
        for dx in range(3):
            if stride == 1:
                win = x_ref[:, pl.ds(dy, ho), pl.ds(dx, wo), :]
            else:                            # strided window straight from the ref
                win = x_ref[:, pl.ds(dy, ho, stride=stride),
                            pl.ds(dx, wo, stride=stride), :]
            acc_ref[...] += jnp.dot(win.reshape(ho * wo, ctk), w_ref[dy, dx],
                                    preferred_element_type=jnp.float32)

    @pl.when(pl.program_id(2) == pl.num_programs(2) - 1)
    def _():
        y = jnp.maximum(acc_ref[...] + b_ref[...], 0.0)
        o_ref[0] = y.reshape(ho, wo, -1).astype(o_ref.dtype)


def conv3x3_bn_relu(x_nhwc, w_hwio, bias, *, stride, tn_cap=None, tk_cap=None):
    """3x3 conv (pad=1, given stride) + folded BN + ReLU, no im2col in HBM.

    x_nhwc: (N, H, W, Cpad) channel-padded bf16 activations (Cpad % 128 == 0).
    w_hwio: (3, 3, Cin, Cout) with BN scale already folded into Cout columns.
    Returns ((N, Ho, Wo, CoutPad), ho, wo) with lane-dense padded channels.
    """
    tn_cap = tn_cap or _TN_CAP
    tk_cap = tk_cap or _TK_CAP

    n, h, w, cp = x_nhwc.shape
    kh, kw, cin_w, cout = w_hwio.shape
    assert (kh, kw) == (3, 3) and cin_w <= cp and cp % 128 == 0
    ho = (h - 1) // stride + 1
    wo = (w - 1) // stride + 1

    tn = min(tn_cap, _round_up(cout, 128))
    nop = _round_up(cout, tn)
    ctk = _pick_channel_tile(cp, tk_cap)     # input-channel reduction tile

    wp = jnp.pad(w_hwio.astype(x_nhwc.dtype),
                 ((0, 0), (0, 0), (0, cp - cin_w), (0, nop - cout)))
    bp = jnp.pad(bias.astype(jnp.float32).reshape(1, -1),
                 ((0, 0), (0, nop - cout)))
    xp = jnp.pad(x_nhwc, ((0, 0), (1, 1), (1, 1), (0, 0)))  # zero spatial halo

    cost = _cost(2 * 9 * n * ho * wo * cp * nop,
                 _nbytes(xp) + _nbytes(wp) + _nbytes(bp) + n * ho * wo * nop * 2)

    out = pl.pallas_call(
        functools.partial(_conv3x3_kernel, stride=stride, ho=ho, wo=wo),
        out_shape=jax.ShapeDtypeStruct((n, ho, wo, nop), x_nhwc.dtype),
        grid_spec=pltpu.PrefetchScalarGridSpec(
            num_scalar_prefetch=0,
            grid=(n, nop // tn, cp // ctk),
            in_specs=[
                pl.BlockSpec((1, h + 2, w + 2, ctk), lambda b, j, l: (b, 0, 0, l)),
                pl.BlockSpec((3, 3, ctk, tn), lambda b, j, l: (0, 0, l, j)),
                pl.BlockSpec((1, tn), lambda b, j, l: (0, j)),
            ],
            out_specs=pl.BlockSpec((1, ho, wo, tn), lambda b, j, l: (b, 0, 0, j)),
            scratch_shapes=[pltpu.VMEM((ho * wo, tn), jnp.float32)],
        ),
        compiler_params=pltpu.CompilerParams(
            dimension_semantics=("parallel", "parallel", "arbitrary"),
            vmem_limit_bytes=_VMEM_LIMIT),
        cost_estimate=cost,
    )(xp, wp, bp)
    return out, ho, wo


# -------------- strided downsample conv1x1 + BN (residual branch) -------------


def _downsample_kernel(x_ref, w_ref, b_ref, o_ref, *, stride, ho, wo):
    c_in = x_ref.shape[-1]
    if stride == 1:
        win = x_ref[:, pl.ds(0, ho), pl.ds(0, wo), :]
    else:                                   # fused strided spatial gather
        win = x_ref[:, pl.ds(0, ho, stride=stride),
                    pl.ds(0, wo, stride=stride), :]
    y = jnp.dot(win.reshape(ho * wo, c_in), w_ref[...],
                preferred_element_type=jnp.float32) + b_ref[...]
    o_ref[0] = y.reshape(ho, wo, -1).astype(o_ref.dtype)


def downsample_conv1x1_bn(x_nhwc, w_io, bias, *, stride, tn_cap=None):
    """1x1 conv with spatial stride + folded BN (no ReLU); gather done in-kernel."""
    tn_cap = tn_cap or _TN_CAP
    n, h, w, cin = x_nhwc.shape
    cin_w, cout = w_io.shape
    assert cin_w == cin
    ho = (h - 1) // stride + 1
    wo = (w - 1) // stride + 1

    tn = min(tn_cap, _round_up(cout, 128))
    nop = _round_up(cout, tn)
    wp = _pad2(w_io.astype(_COMPUTE_DTYPE), cin, nop)
    bp = _pad2(bias.reshape(1, -1).astype(jnp.float32), 1, nop)

    cost = _cost(2 * n * ho * wo * cin * nop,
                 _nbytes(x_nhwc) + _nbytes(wp) + _nbytes(bp) + n * ho * wo * nop * 2)

    out = pl.pallas_call(
        functools.partial(_downsample_kernel, stride=stride, ho=ho, wo=wo),
        out_shape=jax.ShapeDtypeStruct((n, ho, wo, nop), _COMPUTE_DTYPE),
        grid_spec=pltpu.PrefetchScalarGridSpec(
            num_scalar_prefetch=0,
            grid=(n, nop // tn),
            in_specs=[
                pl.BlockSpec((1, h, w, cin), lambda b, j: (b, 0, 0, 0)),
                pl.BlockSpec((cin, tn), lambda b, j: (0, j)),
                pl.BlockSpec((1, tn), lambda b, j: (0, j)),
            ],
            out_specs=pl.BlockSpec((1, ho, wo, tn), lambda b, j: (b, 0, 0, j)),
        ),
        compiler_params=pltpu.CompilerParams(
            dimension_semantics=("parallel", "parallel"),
            vmem_limit_bytes=_VMEM_LIMIT),
        cost_estimate=cost,
    )(x_nhwc.astype(_COMPUTE_DTYPE), wp, bp)
    return out


# ------------------------------ Bottleneck fwd --------------------------------


def bottleneck_forward(x_nchw, p, *, stride, downsampling, expansion):
    n, cin, h, w = x_nchw.shape
    places = p["w1"].shape[0]
    cout = places * expansion

    # Single NCHW->NHWC pass at the edge; bf16 lane-dense activations inside.
    x = jnp.transpose(x_nchw, (0, 2, 3, 1)).astype(_COMPUTE_DTYPE)
    x_flat = x.reshape(-1, cin)

    # conv1 1x1 + BN + ReLU (BN scale folded into weight columns)
    s1, b1 = _fold_bn(*p["bn1"])
    w1 = p["w1"][:, :, 0, 0].T * s1[None, :]              # (Cin, places)
    y1 = matmul_bias_act(x_flat, w1, b1, relu=True, keep_padded_cols=True)
    cp = y1.shape[-1]                                      # padded channel count
    y1 = y1.reshape(n, h, w, cp)

    # conv2 3x3 (stride, pad=1) + BN + ReLU: 9 taps reduced inside the kernel
    s2, b2 = _fold_bn(*p["bn2"])
    w2 = jnp.transpose(p["w2"], (2, 3, 1, 0)) * s2[None, None, None, :]
    y2, ho, wo = conv3x3_bn_relu(y1, w2, b2, stride=stride)
    cp2 = y2.shape[-1]
    y2_flat = y2.reshape(-1, cp2)

    # residual branch
    if downsampling:
        sd, bd = _fold_bn(*p["bnd"])
        wd = p["wd"][:, :, 0, 0].T * sd[None, :]           # (Cin, cout)
        if stride == 1:
            res = matmul_bias_act(x_flat, wd, bd, relu=False,
                                  keep_padded_cols=True)
        else:
            res = downsample_conv1x1_bn(x, wd, bd, stride=stride)
            res = res.reshape(n * ho * wo, -1)
    else:
        assert stride == 1 and cin == cout, \
            "identity residual requires stride=1 and cin == places*expansion"
        res = x_flat

    # conv3 1x1 + BN + residual add + final ReLU (fully fused epilogue)
    s3, b3 = _fold_bn(*p["bn3"])
    w3 = p["w3"][:, :, 0, 0].T * s3[None, :]               # (places, cout)
    w3 = jnp.pad(w3, ((0, cp2 - w3.shape[0]), (0, 0)))     # match padded K of y2
    out = matmul_bias_act(y2_flat, w3, b3, relu=True, res=res)

    out = out.reshape(n, ho, wo, cout)
    return jnp.transpose(out, (0, 3, 1, 2)).astype(x_nchw.dtype)   # back to NCHW


# ------------------------------ parameter init --------------------------------


def init_params(key, in_places, places, expansion, downsampling):
    cout = places * expansion
    ks = list(jax.random.split(key, 8))

    def conv_w(k, co, ci, kh, kw):
        return 0.3 * jax.random.normal(k, (co, ci, kh, kw), jnp.float32)

    def bn(k, c):
        k1, k2, k3, k4 = jax.random.split(k, 4)
        gamma = 1.0 + 0.1 * jax.random.normal(k1, (c,), jnp.float32)
        beta = 0.1 * jax.random.normal(k2, (c,), jnp.float32)
        mean = 0.1 * jax.random.normal(k3, (c,), jnp.float32)
        var = 1.0 + 0.2 * jax.random.uniform(k4, (c,), jnp.float32)
        return (gamma, beta, mean, var)

    p = {
        "w1": conv_w(ks[0], places, in_places, 1, 1),
        "bn1": bn(ks[1], places),
        "w2": conv_w(ks[2], places, places, 3, 3),
        "bn2": bn(ks[3], places),
        "w3": conv_w(ks[4], cout, places, 1, 1),
        "bn3": bn(ks[5], cout),
    }
    if downsampling:
        p["wd"] = conv_w(ks[6], cout, in_places, 1, 1)
        p["bnd"] = bn(ks[7], cout)
    return p


# ------------------------------- pure-JAX ref ---------------------------------


def _conv_nchw(x, w, stride, padding):
    return jax.lax.conv_general_dilated(
        x, w, (stride, stride), padding,
        dimension_numbers=("NCHW", "OIHW", "NCHW"),
        precision=jax.lax.Precision.HIGHEST)


def _bn_nchw(x, gamma, beta, mean, var):
    shp = (1, -1, 1, 1)
    return ((x - mean.reshape(shp)) / jnp.sqrt(var.reshape(shp) + _BN_EPS)
            * gamma.reshape(shp) + beta.reshape(shp))


def bottleneck_reference(x, p, *, stride, downsampling):
    y = jnp.maximum(_bn_nchw(_conv_nchw(x, p["w1"], 1, "VALID"), *p["bn1"]), 0.0)
    y = jnp.maximum(
        _bn_nchw(_conv_nchw(y, p["w2"], stride, ((1, 1), (1, 1))), *p["bn2"]), 0.0)
    y = _bn_nchw(_conv_nchw(y, p["w3"], 1, "VALID"), *p["bn3"])
    if downsampling:
        r = _bn_nchw(_conv_nchw(x, p["wd"], stride, "VALID"), *p["bnd"])
    else:
        r = x
    return jnp.maximum(y + r, 0.0)


# ----------------------------------- main -------------------------------------


if __name__ == "__main__":
    configs = [
        # (in_places, places, expansion, stride, downsampling)
        dict(in_places=4, places=4, expansion=4, stride=1, downsampling=True),
        dict(in_places=8, places=4, expansion=4, stride=2, downsampling=True),
        dict(in_places=16, places=4, expansion=4, stride=1, downsampling=False),
    ]
    key = jax.random.PRNGKey(0)
    for cfg in configs:
        key, kx, kp = jax.random.split(key, 3)
        x = jax.random.normal(kx, (2, cfg["in_places"], 16, 16), jnp.float32)
        params = init_params(kp, cfg["in_places"], cfg["places"],
                             cfg["expansion"], cfg["downsampling"])

        fwd = jax.jit(functools.partial(
            bottleneck_forward, stride=cfg["stride"],
            downsampling=cfg["downsampling"], expansion=cfg["expansion"]))
        out = jax.block_until_ready(fwd(x, params))

        ref = bottleneck_reference(x, params, stride=cfg["stride"],
                                   downsampling=cfg["downsampling"])
        assert out.shape == ref.shape, (out.shape, ref.shape)
        max_err = float(jnp.max(jnp.abs(out.astype(jnp.float32) - ref)))
        # bf16 MXU inputs (f32 accumulate): tolerance is relative to magnitude.
        tol = 8e-2 * float(jnp.max(jnp.abs(ref))) + 5e-3
        assert max_err < tol, (cfg, max_err, tol)

    print("KERNEL_OK")
</pallas_src>

<mosaic_0001>
module attributes {stable_mosaic.version = 11 : i64} {
  func.func @_matmul_kernel(%arg0: i32, %arg1: i32, %arg2: i32, %arg3: memref<512x4xbf16, #tpu.memory_space<vmem>>, %arg4: memref<4x128xbf16, #tpu.memory_space<vmem>>, %arg5: memref<1x128xf32, #tpu.memory_space<vmem>>, %arg6: memref<512x128xbf16, #tpu.memory_space<vmem>>, %arg7: memref<512x128xf32, #tpu.memory_space<vmem>>) attributes {dimension_semantics = [#tpu.dimension_semantics<parallel>, #tpu.dimension_semantics<parallel>, #tpu.dimension_semantics<arbitrary>], iteration_bounds = array<i64: 1, 1, 1>, scalar_prefetch = 0 : i64, scratch_operands = 1 : i64, tpu.core_type = #tpu.core_type<tc>, window_params = [{transform_indices = @transform_0, window_bounds = array<i64: 512, 4>}, {transform_indices = @transform_1, window_bounds = array<i64: 4, 128>}, {transform_indices = @transform_2, window_bounds = array<i64: 1, 128>}, {transform_indices = @transform_3, window_bounds = array<i64: 512, 128>}]} {
    %c0_i32 = arith.constant 0 : i32
    %0 = arith.cmpi eq, %arg2, %c0_i32 : i32
    %1 = arith.extui %0 : i1 to i32
    %c0_i32_0 = arith.constant 0 : i32
    %2 = arith.cmpi ne, %1, %c0_i32_0 : i32
    scf.if %2 {
      %cst_10 = arith.constant 0.000000e+00 : f32
      %12 = vector.broadcast %cst_10 : f32 to vector<512x128xf32>
      %c0_11 = arith.constant 0 : index
      %c0_12 = arith.constant 0 : index
      %13 = vector.load %arg7[%c0_11, %c0_12] : memref<512x128xf32, #tpu.memory_space<vmem>>, vector<512x128xf32>
      tpu.vector_store %arg7[%c0_11, %c0_12], %12 {strides = array<i32>} : memref<512x128xf32, #tpu.memory_space<vmem>>, vector<512x128xf32>,
    } else {
    }
    %c0 = arith.constant 0 : index
    %c0_1 = arith.constant 0 : index
    %3 = vector.load %arg7[%c0, %c0_1] : memref<512x128xf32, #tpu.memory_space<vmem>>, vector<512x128xf32>
    %c0_2 = arith.constant 0 : index
    %c0_3 = arith.constant 0 : index
    %4 = vector.load %arg3[%c0_2, %c0_3] : memref<512x4xbf16, #tpu.memory_space<vmem>>, vector<512x4xbf16>
    %c0_4 = arith.constant 0 : index
    %c0_5 = arith.constant 0 : index
    %5 = vector.load %arg4[%c0_4, %c0_5] : memref<4x128xbf16, #tpu.memory_space<vmem>>, vector<4x128xbf16>
    %cst = arith.constant dense<0.000000e+00> : vector<512x128xf32>
    %6 = tpu.matmul %4, %5, %cst {dimension_numbers = #tpu.dot_dimension_numbers<[1], [0], [0], [1], [0, 0, 1, 1], [], []>} : vector<512x4xbf16>, vector<4x128xbf16>, vector<512x128xf32> -> vector<512x128xf32>
    %7 = arith.addf %3, %6 : vector<512x128xf32>
    %c0_6 = arith.constant 0 : index
    %c0_7 = arith.constant 0 : index
    %8 = vector.load %arg7[%c0_6, %c0_7] : memref<512x128xf32, #tpu.memory_space<vmem>>, vector<512x128xf32>
    tpu.vector_store %arg7[%c0_6, %c0_7], %7 {strides = array<i32>} : memref<512x128xf32, #tpu.memory_space<vmem>>, vector<512x128xf32>,
    %c0_i32_8 = arith.constant 0 : i32
    %9 = arith.cmpi eq, %arg2, %c0_i32_8 : i32
    %10 = arith.extui %9 : i1 to i32
    %c0_i32_9 = arith.constant 0 : i32
    %11 = arith.cmpi ne, %10, %c0_i32_9 : i32
    scf.if %11 {
      %c0_10 = arith.constant 0 : index
      %c0_11 = arith.constant 0 : index
      %12 = vector.load %arg7[%c0_10, %c0_11] : memref<512x128xf32, #tpu.memory_space<vmem>>, vector<512x128xf32>
      %c0_12 = arith.constant 0 : index
      %c0_13 = arith.constant 0 : index
      %13 = vector.load %arg5[%c0_12, %c0_13] : memref<1x128xf32, #tpu.memory_space<vmem>>, vector<1x128xf32>
      %14 = vector.broadcast %13 : vector<1x128xf32> to vector<512x128xf32>
      %15 = arith.addf %12, %14 : vector<512x128xf32>
      %cst_14 = arith.constant 0.000000e+00 : f32
      %16 = vector.broadcast %cst_14 : f32 to vector<512x128xf32>
      %17 = arith.maximumf %15, %16 : vector<512x128xf32>
      %18 = arith.truncf %17 : vector<512x128xf32> to vector<512x128xbf16>
      %c0_15 = arith.constant 0 : index
      %c0_16 = arith.constant 0 : index
      %19 = vector.load %arg6[%c0_15, %c0_16] : memref<512x128xbf16, #tpu.memory_space<vmem>>, vector<512x128xbf16>
      tpu.vector_store %arg6[%c0_15, %c0_16], %18 {strides = array<i32>} : memref<512x128xbf16, #tpu.memory_space<vmem>>, vector<512x128xbf16>,
    } else {
    }
    return
  }
  func.func @transform_0(%arg0: i32, %arg1: i32, %arg2: i32) -> (i32, i32) {
    %c0_i32 = arith.constant 0 : i32
    return %arg0, %arg2 : i32, i32
  }
  func.func @transform_1(%arg0: i32, %arg1: i32, %arg2: i32) -> (i32, i32) {
    %c0_i32 = arith.constant 0 : i32
    return %arg2, %arg1 : i32, i32
  }
  func.func @transform_2(%arg0: i32, %arg1: i32, %arg2: i32) -> (i32, i32) {
    %c0_i32 = arith.constant 0 : i32
    %c0_i32_0 = arith.constant 0 : i32
    return %c0_i32, %arg1 : i32, i32
  }
  func.func @transform_3(%arg0: i32, %arg1: i32, %arg2: i32) -> (i32, i32) {
    %c0_i32 = arith.constant 0 : i32
    return %arg0, %arg1 : i32, i32
  }
}

module attributes {stable_mosaic.version = 11 : i64} {
  func.func @_conv3x3_kernel(%arg0: i32, %arg1: i32, %arg2: i32, %arg3: memref<1x18x18x128xbf16, #tpu.memory_space<vmem>>, %arg4: memref<3x3x128x128xbf16, #tpu.memory_space<vmem>>, %arg5: memref<1x128xf32, #tpu.memory_space<vmem>>, %arg6: memref<1x16x16x128xbf16, #tpu.memory_space<vmem>>, %arg7: memref<256x128xf32, #tpu.memory_space<vmem>>) attributes {dimension_semantics = [#tpu.dimension_semantics<parallel>, #tpu.dimension_semantics<parallel>, #tpu.dimension_semantics<arbitrary>], iteration_bounds = array<i64: 2, 1, 1>, scalar_prefetch = 0 : i64, scratch_operands = 1 : i64, tpu.core_type = #tpu.core_type<tc>, window_params = [{transform_indices = @transform_0, window_bounds = array<i64: 1, 18, 18, 128>}, {transform_indices = @transform_1, window_bounds = array<i64: 3, 3, 128, 128>}, {transform_indices = @transform_2, window_bounds = array<i64: 1, 128>}, {transform_indices = @transform_3, window_bounds = array<i64: 1, 16, 16, 128>}]} {
    %c0_i32 = arith.constant 0 : i32
    %0 = arith.cmpi eq, %arg2, %c0_i32 : i32
    %1 = arith.extui %0 : i1 to i32
    %c0_i32_0 = arith.constant 0 : i32
    %2 = arith.cmpi ne, %1, %c0_i32_0 : i32
    scf.if %2 {
      %cst_116 = arith.constant 0.000000e+00 : f32
      %78 = vector.broadcast %cst_116 : f32 to vector<256x128xf32>
      %c0_117 = arith.constant 0 : index
      %c0_118 = arith.constant 0 : index
      %79 = vector.load %arg7[%c0_117, %c0_118] : memref<256x128xf32, #tpu.memory_space<vmem>>, vector<256x128xf32>
      tpu.vector_store %arg7[%c0_117, %c0_118], %78 {strides = array<i32>} : memref<256x128xf32, #tpu.memory_space<vmem>>, vector<256x128xf32>,
    } else {
    }
    %c0 = arith.constant 0 : index
    %c0_1 = arith.constant 0 : index
    %c0_2 = arith.constant 0 : index
    %c0_3 = arith.constant 0 : index
    %3 = vector.load %arg3[%c0, %c0_1, %c0_2, %c0_3] : memref<1x18x18x128xbf16, #tpu.memory_space<vmem>>, vector<1x16x16x128xbf16>
    %c0_4 = arith.constant 0 : index
    %c0_5 = arith.constant 0 : index
    %4 = vector.load %arg7[%c0_4, %c0_5] : memref<256x128xf32, #tpu.memory_space<vmem>>, vector<256x128xf32>
    %5 = vector.shape_cast %3 : vector<1x16x16x128xbf16> to vector<256x128xbf16>
    %c0_6 = arith.constant 0 : index
    %c0_7 = arith.constant 0 : index
    %c0_8 = arith.constant 0 : index
    %c0_9 = arith.constant 0 : index
    %6 = vector.load %arg4[%c0_6, %c0_7, %c0_8, %c0_9] : memref<3x3x128x128xbf16, #tpu.memory_space<vmem>>, vector<1x1x128x128xbf16>
    %7 = vector.shape_cast %6 : vector<1x1x128x128xbf16> to vector<128x128xbf16>
    %cst = arith.constant dense<0.000000e+00> : vector<256x128xf32>
    %8 = tpu.matmul %5, %7, %cst {dimension_numbers = #tpu.dot_dimension_numbers<[1], [0], [0], [1], [0, 0, 1, 1], [], []>} : vector<256x128xbf16>, vector<128x128xbf16>, vector<256x128xf32> -> vector<256x128xf32>
    %9 = arith.addf %4, %8 : vector<256x128xf32>
    %c0_10 = arith.constant 0 : index
    %c0_11 = arith.constant 0 : index
    %10 = vector.load %arg7[%c0_10, %c0_11] : memref<256x128xf32, #tpu.memory_space<vmem>>, vector<256x128xf32>
    tpu.vector_store %arg7[%c0_10, %c0_11], %9 {strides = array<i32>} : memref<256x128xf32, #tpu.memory_space<vmem>>, vector<256x128xf32>,
    %c0_12 = arith.constant 0 : index
    %c0_13 = arith.constant 0 : index
    %c1 = arith.constant 1 : index
    %c0_14 = arith.constant 0 : index
    %11 = vector.load %arg3[%c0_12, %c0_13, %c1, %c0_14] : memref<1x18x18x128xbf16, #tpu.memory_space<vmem>>, vector<1x16x16x128xbf16>
    %c0_15 = arith.constant 0 : index
    %c0_16 = arith.constant 0 : index
    %12 = vector.load %arg7[%c0_15, %c0_16] : memref<256x128xf32, #tpu.memory_space<vmem>>, vector<256x128xf32>
    %13 = vector.shape_cast %11 : vector<1x16x16x128xbf16> to vector<256x128xbf16>
    %c0_17 = arith.constant 0 : index
    %c1_18 = arith.constant 1 : index
    %c0_19 = arith.constant 0 : index
    %c0_20 = arith.constant 0 : index
    %14 = vector.load %arg4[%c0_17, %c1_18, %c0_19, %c0_20] : memref<3x3x128x128xbf16, #tpu.memory_space<vmem>>, vector<1x1x128x128xbf16>
    %15 = vector.shape_cast %14 : vector<1x1x128x128xbf16> to vector<128x128xbf16>
    %cst_21 = arith.constant dense<0.000000e+00> : vector<256x128xf32>
    %16 = tpu.matmul %13, %15, %cst_21 {dimension_numbers = #tpu.dot_dimension_numbers<[1], [0], [0], [1], [0, 0, 1, 1], [], []>} : vector<256x128xbf16>, vector<128x128xbf16>, vector<256x128xf32> -> vector<256x128xf32>
    %17 = arith.addf %12, %16 : vector<256x128xf32>
    %c0_22 = arith.constant 0 : index
    %c0_23 = arith.constant 0 : index
    %18 = vector.load %arg7[%c0_22, %c0_23] : memref<256x128xf32, #tpu.memory_space<vmem>>, vector<256x128xf32>
    tpu.vector_store %arg7[%c0_22, %c0_23], %17 {strides = array<i32>} : memref<256x128xf32, #tpu.memory_space<vmem>>, vector<256x128xf32>,
    %c0_24 = arith.constant 0 : index
    %c0_25 = arith.constant 0 : index
    %c2 = arith.constant 2 : index
    %c0_26 = arith.constant 0 : index
    %19 = vector.load %arg3[%c0_24, %c0_25, %c2, %c0_26] : memref<1x18x18x128xbf16, #tpu.memory_space<vmem>>, vector<1x16x16x128xbf16>
    %c0_27 = arith.constant 0 : index
    %c0_28 = arith.constant 0 : index
    %20 = vector.load %arg7[%c0_27, %c0_28] : memref<256x128xf32, #tpu.memory_space<vmem>>, vector<256x128xf32>
    %21 = vector.shape_cast %19 : vector<1x16x16x128xbf16> to vector<256x128xbf16>
    %c0_29 = arith.constant 0 : index
    %c2_30 = arith.constant 2 : index
    %c0_31 = arith.constant 0 : index
    %c0_32 = arith.constant 0 : index
    %22 = vector.load %arg4[%c0_29, %c2_30, %c0_31, %c0_32] : memref<3x3x128x128xbf16, #tpu.memory_space<vmem>>, vector<1x1x128x128xbf16>
    %23 = vector.shape_cast %22 : vector<1x1x128x128xbf16> to vector<128x128xbf16>
    %cst_33 = arith.constant dense<0.000000e+00> : vector<256x128xf32>
    %24 = tpu.matmul %21, %23, %cst_33 {dimension_numbers = #tpu.dot_dimension_numbers<[1], [0], [0], [1], [0, 0, 1, 1], [], []>} : vector<256x128xbf16>, vector<128x128xbf16>, vector<256x128xf32> -> vector<256x128xf32>
    %25 = arith.addf %20, %24 : vector<256x128xf32>
    %c0_34 = arith.constant 0 : index
    %c0_35 = arith.constant 0 : index
    %26 = vector.load %arg7[%c0_34, %c0_35] : memref<256x128xf32, #tpu.memory_space<vmem>>, vector<256x128xf32>
    tpu.vector_store %arg7[%c0_34, %c0_35], %25 {strides = array<i32>} : memref<256x128xf32, #tpu.memory_space<vmem>>, vector<256x128xf32>,
    %c0_36 = arith.constant 0 : index
    %c1_37 = arith.constant 1 : index
    %c0_38 = arith.constant 0 : index
    %c0_39 = arith.constant 0 : index
    %27 = vector.load %arg3[%c0_36, %c1_37, %c0_38, %c0_39] : memref<1x18x18x128xbf16, #tpu.memory_space<vmem>>, vector<1x16x16x128xbf16>
    %c0_40 = arith.constant 0 : index
    %c0_41 = arith.constant 0 : index
    %28 = vector.load %arg7[%c0_40, %c0_41] : memref<256x128xf32, #tpu.memory_space<vmem>>, vector<256x128xf32>
    %29 = vector.shape_cast %27 : vector<1x16x16x128xbf16> to vector<256x128xbf16>
    %c1_42 = arith.constant 1 : index
    %c0_43 = arith.constant 0 : index
    %c0_44 = arith.constant 0 : index
    %c0_45 = arith.constant 0 : index
    %30 = vector.load %arg4[%c1_42, %c0_43, %c0_44, %c0_45] : memref<3x3x128x128xbf16, #tpu.memory_space<vmem>>, vector<1x1x128x128xbf16>
    %31 = vector.shape_cast %30 : vector<1x1x128x128xbf16> to vector<128x128xbf16>
    %cst_46 = arith.constant dense<0.000000e+00> : vector<256x128xf32>
    %32 = tpu.matmul %29, %31, %cst_46 {dimension_numbers = #tpu.dot_dimension_numbers<[1], [0], [0], [1], [0, 0, 1, 1], [], []>} : vector<256x128xbf16>, vector<128x128xbf16>, vector<256x128xf32> -> vector<256x128xf32>
    %33 = arith.addf %28, %32 : vector<256x128xf32>
    %c0_47 = arith.constant 0 : index
    %c0_48 = arith.constant 0 : index
    %34 = vector.load %arg7[%c0_47, %c0_48] : memref<256x128xf32, #tpu.memory_space<vmem>>, vector<256x128xf32>
    tpu.vector_store %arg7[%c0_47, %c0_48], %33 {strides = array<i32>} : memref<256x128xf32, #tpu.memory_space<vmem>>, vector<256x128xf32>,
    %c0_49 = arith.constant 0 : index
    %c1_50 = arith.constant 1 : index
    %c1_51 = arith.constant 1 : index
    %c0_52 = arith.constant 0 : index
    %35 = vector.load %arg3[%c0_49, %c1_50, %c1_51, %c0_52] : memref<1x18x18x128xbf16, #tpu.memory_space<vmem>>, vector<1x16x16x128xbf16>
    %c0_53 = arith.constant 0 : index
    %c0_54 = arith.constant 0 : index
    %36 = vector.load %arg7[%c0_53, %c0_54] : memref<256x128xf32, #tpu.memory_space<vmem>>, vector<256x128xf32>
    %37 = vector.shape_cast %35 : vector<1x16x16x128xbf16> to vector<256x128xbf16>
    %c1_55 = arith.constant 1 : index
    %c1_56 = arith.constant 1 : index
    %c0_57 = arith.constant 0 : index
    %c0_58 = arith.constant 0 : index
    %38 = vector.load %arg4[%c1_55, %c1_56, %c0_57, %c0_58] : memref<3x3x128x128xbf16, #tpu.memory_space<vmem>>, vector<1x1x128x128xbf16>
    %39 = vector.shape_cast %38 : vector<1x1x128x128xbf16> to vector<128x128xbf16>
    %cst_59 = arith.constant dense<0.000000e+00> : vector<256x128xf32>
    %40 = tpu.matmul %37, %39, %cst_59 {dimension_numbers = #tpu.dot_dimension_numbers<[1], [0], [0], [1], [0, 0, 1, 1], [], []>} : vector<256x128xbf16>, vector<128x128xbf16>, vector<256x128xf32> -> vector<256x128xf32>
    %41 = arith.addf %36, %40 : vector<256x128xf32>
    %c0_60 = arith.constant 0 : index
    %c0_61 = arith.constant 0 : index
    %42 = vector.load %arg7[%c0_60, %c0_61] : memref<256x128xf32, #tpu.memory_space<vmem>>, vector<256x128xf32>
    tpu.vector_store %arg7[%c0_60, %c0_61], %41 {strides = array<i32>} : memref<256x128xf32, #tpu.memory_space<vmem>>, vector<256x128xf32>,
    %c0_62 = arith.constant 0 : index
    %c1_63 = arith.constant 1 : index
    %c2_64 = arith.constant 2 : index
    %c0_65 = arith.constant 0 : index
    %43 = vector.load %arg3[%c0_62, %c1_63, %c2_64, %c0_65] : memref<1x18x18x128xbf16, #tpu.memory_space<vmem>>, vector<1x16x16x128xbf16>
    %c0_66 = arith.constant 0 : index
    %c0_67 = arith.constant 0 : index
    %44 = vector.load %arg7[%c0_66, %c0_67] : memref<256x128xf32, #tpu.memory_space<vmem>>, vector<256x128xf32>
    %45 = vector.shape_cast %43 : vector<1x16x16x128xbf16> to vector<256x128xbf16>
    %c1_68 = arith.constant 1 : index
    %c2_69 = arith.constant 2 : index
    %c0_70 = arith.constant 0 : index
    %c0_71 = arith.constant 0 : index
    %46 = vector.load %arg4[%c1_68, %c2_69, %c0_70, %c0_71] : memref<3x3x128x128xbf16, #tpu.memory_space<vmem>>, vector<1x1x128x128xbf16>
    %47 = vector.shape_cast %46 : vector<1x1x128x128xbf16> to vector<128x128xbf16>
    %cst_72 = arith.constant dense<0.000000e+00> : vector<256x128xf32>
    %48 = tpu.matmul %45, %47, %cst_72 {dimension_numbers = #tpu.dot_dimension_numbers<[1], [0], [0], [1], [0, 0, 1, 1], [], []>} : vector<256x128xbf16>, vector<128x128xbf16>, vector<256x128xf32> -> vector<256x128xf32>
    %49 = arith.addf %44, %48 : vector<256x128xf32>
    %c0_73 = arith.constant 0 : index
    %c0_74 = arith.constant 0 : index
    %50 = vector.load %arg7[%c0_73, %c0_74] : memref<256x128xf32, #tpu.memory_space<vmem>>, vector<256x128xf32>
    tpu.vector_store %arg7[%c0_73, %c0_74], %49 {strides = array<i32>} : memref<256x128xf32, #tpu.memory_space<vmem>>, vector<256x128xf32>,
    %c0_75 = arith.constant 0 : index
    %c2_76 = arith.constant 2 : index
    %c0_77 = arith.constant 0 : index
    %c0_78 = arith.constant 0 : index
    %51 = vector.load %arg3[%c0_75, %c2_76, %c0_77, %c0_78] : memref<1x18x18x128xbf16, #tpu.memory_space<vmem>>, vector<1x16x16x128xbf16>
    %c0_79 = arith.constant 0 : index
    %c0_80 = arith.constant 0 : index
    %52 = vector.load %arg7[%c0_79, %c0_80] : memref<256x128xf32, #tpu.memory_space<vmem>>, vector<256x128xf32>
    %53 = vector.shape_cast %51 : vector<1x16x16x128xbf16> to vector<256x128xbf16>
    %c2_81 = arith.constant 2 : index
    %c0_82 = arith.constant 0 : index
    %c0_83 = arith.constant 0 : index
    %c0_84 = arith.constant 0 : index
    %54 = vector.load %arg4[%c2_81, %c0_82, %c0_83, %c0_84] : memref<3x3x128x128xbf16, #tpu.memory_space<vmem>>, vector<1x1x128x128xbf16>
    %55 = vector.shape_cast %54 : vector<1x1x128x128xbf16> to vector<128x128xbf16>
    %cst_85 = arith.constant dense<0.000000e+00> : vector<256x128xf32>
    %56 = tpu.matmul %53, %55, %cst_85 {dimension_numbers = #tpu.dot_dimension_numbers<[1], [0], [0], [1], [0, 0, 1, 1], [], []>} : vector<256x128xbf16>, vector<128x128xbf16>, vector<256x128xf32> -> vector<256x128xf32>
    %57 = arith.addf %52, %56 : vector<256x128xf32>
    %c0_86 = arith.constant 0 : index
    %c0_87 = arith.constant 0 : index
    %58 = vector.load %arg7[%c0_86, %c0_87] : memref<256x128xf32, #tpu.memory_space<vmem>>, vector<256x128xf32>
    tpu.vector_store %arg7[%c0_86, %c0_87], %57 {strides = array<i32>} : memref<256x128xf32, #tpu.memory_space<vmem>>, vector<256x128xf32>,
    %c0_88 = arith.constant 0 : index
    %c2_89 = arith.constant 2 : index
    %c1_90 = arith.constant 1 : index
    %c0_91 = arith.constant 0 : index
    %59 = vector.load %arg3[%c0_88, %c2_89, %c1_90, %c0_91] : memref<1x18x18x128xbf16, #tpu.memory_space<vmem>>, vector<1x16x16x128xbf16>
    %c0_92 = arith.constant 0 : index
    %c0_93 = arith.constant 0 : index
    %60 = vector.load %arg7[%c0_92, %c0_93] : memref<256x128xf32, #tpu.memory_space<vmem>>, vector<256x128xf32>
    %61 = vector.shape_cast %59 : vector<1x16x16x128xbf16> to vector<256x128xbf16>
    %c2_94 = arith.constant 2 : index
    %c1_95 = arith.constant 1 : index
    %c0_96 = arith.constant 0 : index
    %c0_97 = arith.constant 0 : index
    %62 = vector.load %arg4[%c2_94, %c1_95, %c0_96, %c0_97] : memref<3x3x128x128xbf16, #tpu.memory_space<vmem>>, vector<1x1x128x128xbf16>
    %63 = vector.shape_cast %62 : vector<1x1x128x128xbf16> to vector<128x128xbf16>
    %cst_98 = arith.constant dense<0.000000e+00> : vector<256x128xf32>
    %64 = tpu.matmul %61, %63, %cst_98 {dimension_numbers = #tpu.dot_dimension_numbers<[1], [0], [0], [1], [0, 0, 1, 1], [], []>} : vector<256x128xbf16>, vector<128x128xbf16>, vector<256x128xf32> -> vector<256x128xf32>
    %65 = arith.addf %60, %64 : vector<256x128xf32>
    %c0_99 = arith.constant 0 : index
    %c0_100 = arith.constant 0 : index
    %66 = vector.load %arg7[%c0_99, %c0_100] : memref<256x128xf32, #tpu.memory_space<vmem>>, vector<256x128xf32>
    tpu.vector_store %arg7[%c0_99, %c0_100], %65 {strides = array<i32>} : memref<256x128xf32, #tpu.memory_space<vmem>>, vector<256x128xf32>,
    %c0_101 = arith.constant 0 : index
    %c2_102 = arith.constant 2 : index
    %c2_103 = arith.constant 2 : index
    %c0_104 = arith.constant 0 : index
    %67 = vector.load %arg3[%c0_101, %c2_102, %c2_103, %c0_104] : memref<1x18x18x128xbf16, #tpu.memory_space<vmem>>, vector<1x16x16x128xbf16>
    %c0_105 = arith.constant 0 : index
    %c0_106 = arith.constant 0 : index
    %68 = vector.load %arg7[%c0_105, %c0_106] : memref<256x128xf32, #tpu.memory_space<vmem>>, vector<256x128xf32>
    %69 = vector.shape_cast %67 : vector<1x16x16x128xbf16> to vector<256x128xbf16>
    %c2_107 = arith.constant 2 : index
    %c2_108 = arith.constant 2 : index
    %c0_109 = arith.constant 0 : index
    %c0_110 = arith.constant 0 : index
    %70 = vector.load %arg4[%c2_107, %c2_108, %c0_109, %c0_110] : memref<3x3x128x128xbf16, #tpu.memory_space<vmem>>, vector<1x1x128x128xbf16>
    %71 = vector.shape_cast %70 : vector<1x1x128x128xbf16> to vector<128x128xbf16>
    %cst_111 = arith.constant dense<0.000000e+00> : vector<256x128xf32>
    %72 = tpu.matmul %69, %71, %cst_111 {dimension_numbers = #tpu.dot_dimension_numbers<[1], [0], [0], [1], [0, 0, 1, 1], [], []>} : vector<256x128xbf16>, vector<128x128xbf16>, vector<256x128xf32> -> vector<256x128xf32>
    %73 = arith.addf %68, %72 : vector<256x128xf32>
    %c0_112 = arith.constant 0 : index
    %c0_113 = arith.constant 0 : index
    %74 = vector.load %arg7[%c0_112, %c0_113] : memref<256x128xf32, #tpu.memory_space<vmem>>, vector<256x128xf32>
    tpu.vector_store %arg7[%c0_112, %c0_113], %73 {strides = array<i32>} : memref<256x128xf32, #tpu.memory_space<vmem>>, vector<256x128xf32>,
    %c0_i32_114 = arith.constant 0 : i32
    %75 = arith.cmpi eq, %arg2, %c0_i32_114 : i32
    %76 = arith.extui %75 : i1 to i32
    %c0_i32_115 = arith.constant 0 : i32
    %77 = arith.cmpi ne, %76, %c0_i32_115 : i32
    scf.if %77 {
      %c0_116 = arith.constant 0 : index
      %c0_117 = arith.constant 0 : index
      %78 = vector.load %arg7[%c0_116, %c0_117] : memref<256x128xf32, #tpu.memory_space<vmem>>, vector<256x128xf32>
      %c0_118 = arith.constant 0 : index
      %c0_119 = arith.constant 0 : index
      %79 = vector.load %arg5[%c0_118, %c0_119] : memref<1x128xf32, #tpu.memory_space<vmem>>, vector<1x128xf32>
      %80 = vector.broadcast %79 : vector<1x128xf32> to vector<256x128xf32>
      %81 = arith.addf %78, %80 : vector<256x128xf32>
      %cst_120 = arith.constant 0.000000e+00 : f32
      %82 = vector.broadcast %cst_120 : f32 to vector<256x128xf32>
      %83 = arith.maximumf %81, %82 : vector<256x128xf32>
      %84 = vector.shape_cast %83 : vector<256x128xf32> to vector<16x16x128xf32>
      %85 = arith.truncf %84 : vector<16x16x128xf32> to vector<16x16x128xbf16>
      %c0_121 = arith.constant 0 : index
      %c0_122 = arith.constant 0 : index
      %c0_123 = arith.constant 0 : index
      %c0_124 = arith.constant 0 : index
      %86 = vector.load %arg6[%c0_121, %c0_122, %c0_123, %c0_124] : memref<1x16x16x128xbf16, #tpu.memory_space<vmem>>, vector<1x16x16x128xbf16>
      %87 = vector.shape_cast %86 : vector<1x16x16x128xbf16> to vector<16x16x128xbf16>
      %88 = vector.shape_cast %85 : vector<16x16x128xbf16> to vector<1x16x16x128xbf16>
      tpu.vector_store %arg6[%c0_121, %c0_122, %c0_123, %c0_124], %88 {strides = array<i32>} : memref<1x16x16x128xbf16, #tpu.memory_space<vmem>>, vector<1x16x16x128xbf16>,
    } else {
    }
    return
  }
  func.func @transform_0(%arg0: i32, %arg1: i32, %arg2: i32) -> (i32, i32, i32, i32) {
    %c0_i32 = arith.constant 0 : i32
    %c0_i32_0 = arith.constant 0 : i32
    %c0_i32_1 = arith.constant 0 : i32
    return %arg0, %c0_i32, %c0_i32_0, %arg2 : i32, i32, i32, i32
  }
  func.func @transform_1(%arg0: i32, %arg1: i32, %arg2: i32) -> (i32, i32, i32, i32) {
    %c0_i32 = arith.constant 0 : i32
    %c0_i32_0 = arith.constant 0 : i32
    %c0_i32_1 = arith.constant 0 : i32
    return %c0_i32, %c0_i32_0, %arg2, %arg1 : i32, i32, i32, i32
  }
  func.func @transform_2(%arg0: i32, %arg1: i32, %arg2: i32) -> (i32, i32) {
    %c0_i32 = arith.constant 0 : i32
    %c0_i32_0 = arith.constant 0 : i32
    return %c0_i32, %arg1 : i32, i32
  }
  func.func @transform_3(%arg0: i32, %arg1: i32, %arg2: i32) -> (i32, i32, i32, i32) {
    %c0_i32 = arith.constant 0 : i32
    %c0_i32_0 = arith.constant 0 : i32
    %c0_i32_1 = arith.constant 0 : i32
    return %arg0, %c0_i32, %c0_i32_0, %arg1 : i32, i32, i32, i32
  }
}

module attributes {stable_mosaic.version = 11 : i64} {
  func.func @_matmul_kernel(%arg0: i32, %arg1: i32, %arg2: i32, %arg3: memref<512x4xbf16, #tpu.memory_space<vmem>>, %arg4: memref<4x128xbf16, #tpu.memory_space<vmem>>, %arg5: memref<1x128xf32, #tpu.memory_space<vmem>>, %arg6: memref<512x128xbf16, #tpu.memory_space<vmem>>, %arg7: memref<512x128xf32, #tpu.memory_space<vmem>>) attributes {dimension_semantics = [#tpu.dimension_semantics<parallel>, #tpu.dimension_semantics<parallel>, #tpu.dimension_semantics<arbitrary>], iteration_bounds = array<i64: 1, 1, 1>, scalar_prefetch = 0 : i64, scratch_operands = 1 : i64, tpu.core_type = #tpu.core_type<tc>, window_params = [{transform_indices = @transform_0, window_bounds = array<i64: 512, 4>}, {transform_indices = @transform_1, window_bounds = array<i64: 4, 128>}, {transform_indices = @transform_2, window_bounds = array<i64: 1, 128>}, {transform_indices = @transform_3, window_bounds = array<i64: 512, 128>}]} {
    %c0_i32 = arith.constant 0 : i32
    %0 = arith.cmpi eq, %arg2, %c0_i32 : i32
    %1 = arith.extui %0 : i1 to i32
    %c0_i32_0 = arith.constant 0 : i32
    %2 = arith.cmpi ne, %1, %c0_i32_0 : i32
    scf.if %2 {
      %cst_10 = arith.constant 0.000000e+00 : f32
      %12 = vector.broadcast %cst_10 : f32 to vector<512x128xf32>
      %c0_11 = arith.constant 0 : index
      %c0_12 = arith.constant 0 : index
      %13 = vector.load %arg7[%c0_11, %c0_12] : memref<512x128xf32, #tpu.memory_space<vmem>>, vector<512x128xf32>
      tpu.vector_store %arg7[%c0_11, %c0_12], %12 {strides = array<i32>} : memref<512x128xf32, #tpu.memory_space<vmem>>, vector<512x128xf32>,
    } else {
    }
    %c0 = arith.constant 0 : index
    %c0_1 = arith.constant 0 : index
    %3 = vector.load %arg7[%c0, %c0_1] : memref<512x128xf32, #tpu.memory_space<vmem>>, vector<512x128xf32>
    %c0_2 = arith.constant 0 : index
    %c0_3 = arith.constant 0 : index
    %4 = vector.load %arg3[%c0_2, %c0_3] : memref<512x4xbf16, #tpu.memory_space<vmem>>, vector<512x4xbf16>
    %c0_4 = arith.constant 0 : index
    %c0_5 = arith.constant 0 : index
    %5 = vector.load %arg4[%c0_4, %c0_5] : memref<4x128xbf16, #tpu.memory_space<vmem>>, vector<4x128xbf16>
    %cst = arith.constant dense<0.000000e+00> : vector<512x128xf32>
    %6 = tpu.matmul %4, %5, %cst {dimension_numbers = #tpu.dot_dimension_numbers<[1], [0], [0], [1], [0, 0, 1, 1], [], []>} : vector<512x4xbf16>, vector<4x128xbf16>, vector<512x128xf32> -> vector<512x128xf32>
    %7 = arith.addf %3, %6 : vector<512x128xf32>
    %c0_6 = arith.constant 0 : index
    %c0_7 = arith.constant 0 : index
    %8 = vector.load %arg7[%c0_6, %c0_7] : memref<512x128xf32, #tpu.memory_space<vmem>>, vector<512x128xf32>
    tpu.vector_store %arg7[%c0_6, %c0_7], %7 {strides = array<i32>} : memref<512x128xf32, #tpu.memory_space<vmem>>, vector<512x128xf32>,
    %c0_i32_8 = arith.constant 0 : i32
    %9 = arith.cmpi eq, %arg2, %c0_i32_8 : i32
    %10 = arith.extui %9 : i1 to i32
    %c0_i32_9 = arith.constant 0 : i32
    %11 = arith.cmpi ne, %10, %c0_i32_9 : i32
    scf.if %11 {
      %c0_10 = arith.constant 0 : index
      %c0_11 = arith.constant 0 : index
      %12 = vector.load %arg7[%c0_10, %c0_11] : memref<512x128xf32, #tpu.memory_space<vmem>>, vector<512x128xf32>
      %c0_12 = arith.constant 0 : index
      %c0_13 = arith.constant 0 : index
      %13 = vector.load %arg5[%c0_12, %c0_13] : memref<1x128xf32, #tpu.memory_space<vmem>>, vector<1x128xf32>
      %14 = vector.broadcast %13 : vector<1x128xf32> to vector<512x128xf32>
      %15 = arith.addf %12, %14 : vector<512x128xf32>
      %16 = arith.truncf %15 : vector<512x128xf32> to vector<512x128xbf16>
      %c0_14 = arith.constant 0 : index
      %c0_15 = arith.constant 0 : index
      %17 = vector.load %arg6[%c0_14, %c0_15] : memref<512x128xbf16, #tpu.memory_space<vmem>>, vector<512x128xbf16>
      tpu.vector_store %arg6[%c0_14, %c0_15], %16 {strides = array<i32>} : memref<512x128xbf16, #tpu.memory_space<vmem>>, vector<512x128xbf16>,
    } else {
    }
    return
  }
  func.func @transform_0(%arg0: i32, %arg1: i32, %arg2: i32) -> (i32, i32) {
    %c0_i32 = arith.constant 0 : i32
    return %arg0, %arg2 : i32, i32
  }
  func.func @transform_1(%arg0: i32, %arg1: i32, %arg2: i32) -> (i32, i32) {
    %c0_i32 = arith.constant 0 : i32
    return %arg2, %arg1 : i32, i32
  }
  func.func @transform_2(%arg0: i32, %arg1: i32, %arg2: i32) -> (i32, i32) {
    %c0_i32 = arith.constant 0 : i32
    %c0_i32_0 = arith.constant 0 : i32
    return %c0_i32, %arg1 : i32, i32
  }
  func.func @transform_3(%arg0: i32, %arg1: i32, %arg2: i32) -> (i32, i32) {
    %c0_i32 = arith.constant 0 : i32
    return %arg0, %arg1 : i32, i32
  }
}

module attributes {stable_mosaic.version = 11 : i64} {
  func.func @_matmul_kernel(%arg0: i32, %arg1: i32, %arg2: i32, %arg3: memref<512x128xbf16, #tpu.memory_space<vmem>>, %arg4: memref<128x128xbf16, #tpu.memory_space<vmem>>, %arg5: memref<1x128xf32, #tpu.memory_space<vmem>>, %arg6: memref<512x128xbf16, #tpu.memory_space<vmem>>, %arg7: memref<512x128xbf16, #tpu.memory_space<vmem>>, %arg8: memref<512x128xf32, #tpu.memory_space<vmem>>) attributes {dimension_semantics = [#tpu.dimension_semantics<parallel>, #tpu.dimension_semantics<parallel>, #tpu.dimension_semantics<arbitrary>], iteration_bounds = array<i64: 1, 1, 1>, scalar_prefetch = 0 : i64, scratch_operands = 1 : i64, tpu.core_type = #tpu.core_type<tc>, window_params = [{transform_indices = @transform_0, window_bounds = array<i64: 512, 128>}, {transform_indices = @transform_1, window_bounds = array<i64: 128, 128>}, {transform_indices = @transform_2, window_bounds = array<i64: 1, 128>}, {transform_indices = @transform_3, window_bounds = array<i64: 512, 128>}, {transform_indices = @transform_4, window_bounds = array<i64: 512, 128>}]} {
    %c0_i32 = arith.constant 0 : i32
    %0 = arith.cmpi eq, %arg2, %c0_i32 : i32
    %1 = arith.extui %0 : i1 to i32
    %c0_i32_0 = arith.constant 0 : i32
    %2 = arith.cmpi ne, %1, %c0_i32_0 : i32
    scf.if %2 {
      %cst_10 = arith.constant 0.000000e+00 : f32
      %12 = vector.broadcast %cst_10 : f32 to vector<512x128xf32>
      %c0_11 = arith.constant 0 : index
      %c0_12 = arith.constant 0 : index
      %13 = vector.load %arg8[%c0_11, %c0_12] : memref<512x128xf32, #tpu.memory_space<vmem>>, vector<512x128xf32>
      tpu.vector_store %arg8[%c0_11, %c0_12], %12 {strides = array<i32>} : memref<512x128xf32, #tpu.memory_space<vmem>>, vector<512x128xf32>,
    } else {
    }
    %c0 = arith.constant 0 : index
    %c0_1 = arith.constant 0 : index
    %3 = vector.load %arg8[%c0, %c0_1] : memref<512x128xf32, #tpu.memory_space<vmem>>, vector<512x128xf32>
    %c0_2 = arith.constant 0 : index
    %c0_3 = arith.constant 0 : index
    %4 = vector.load %arg3[%c0_2, %c0_3] : memref<512x128xbf16, #tpu.memory_space<vmem>>, vector<512x128xbf16>
    %c0_4 = arith.constant 0 : index
    %c0_5 = arith.constant 0 : index
    %5 = vector.load %arg4[%c0_4, %c0_5] : memref<128x128xbf16, #tpu.memory_space<vmem>>, vector<128x128xbf16>
    %cst = arith.constant dense<0.000000e+00> : vector<512x128xf32>
    %6 = tpu.matmul %4, %5, %cst {dimension_numbers = #tpu.dot_dimension_numbers<[1], [0], [0], [1], [0, 0, 1, 1], [], []>} : vector<512x128xbf16>, vector<128x128xbf16>, vector<512x128xf32> -> vector<512x128xf32>
    %7 = arith.addf %3, %6 : vector<512x128xf32>
    %c0_6 = arith.constant 0 : index
    %c0_7 = arith.constant 0 : index
    %8 = vector.load %arg8[%c0_6, %c0_7] : memref<512x128xf32, #tpu.memory_space<vmem>>, vector<512x128xf32>
    tpu.vector_store %arg8[%c0_6, %c0_7], %7 {strides = array<i32>} : memref<512x128xf32, #tpu.memory_space<vmem>>, vector<512x128xf32>,
    %c0_i32_8 = arith.constant 0 : i32
    %9 = arith.cmpi eq, %arg2, %c0_i32_8 : i32
    %10 = arith.extui %9 : i1 to i32
    %c0_i32_9 = arith.constant 0 : i32
    %11 = arith.cmpi ne, %10, %c0_i32_9 : i32
    scf.if %11 {
      %c0_10 = arith.constant 0 : index
      %c0_11 = arith.constant 0 : index
      %12 = vector.load %arg8[%c0_10, %c0_11] : memref<512x128xf32, #tpu.memory_space<vmem>>, vector<512x128xf32>
      %c0_12 = arith.constant 0 : index
      %c0_13 = arith.constant 0 : index
      %13 = vector.load %arg5[%c0_12, %c0_13] : memref<1x128xf32, #tpu.memory_space<vmem>>, vector<1x128xf32>
      %14 = vector.broadcast %13 : vector<1x128xf32> to vector<512x128xf32>
      %15 = arith.addf %12, %14 : vector<512x128xf32>
      %c0_14 = arith.constant 0 : index
      %c0_15 = arith.constant 0 : index
      %16 = vector.load %arg6[%c0_14, %c0_15] : memref<512x128xbf16, #tpu.memory_space<vmem>>, vector<512x128xbf16>
      %17 = arith.extf %16 : vector<512x128xbf16> to vector<512x128xf32>
      %18 = arith.addf %15, %17 : vector<512x128xf32>
      %cst_16 = arith.constant 0.000000e+00 : f32
      %19 = vector.broadcast %cst_16 : f32 to vector<512x128xf32>
      %20 = arith.maximumf %18, %19 : vector<512x128xf32>
      %21 = arith.truncf %20 : vector<512x128xf32> to vector<512x128xbf16>
      %c0_17 = arith.constant 0 : index
      %c0_18 = arith.constant 0 : index
      %22 = vector.load %arg7[%c0_17, %c0_18] : memref<512x128xbf16, #tpu.memory_space<vmem>>, vector<512x128xbf16>
      tpu.vector_store %arg7[%c0_17, %c0_18], %21 {strides = array<i32>} : memref<512x128xbf16, #tpu.memory_space<vmem>>, vector<512x128xbf16>,
    } else {
    }
    return
  }
  func.func @transform_0(%arg0: i32, %arg1: i32, %arg2: i32) -> (i32, i32) {
    %c0_i32 = arith.constant 0 : i32
    return %arg0, %arg2 : i32, i32
  }
  func.func @transform_1(%arg0: i32, %arg1: i32, %arg2: i32) -> (i32, i32) {
    %c0_i32 = arith.constant 0 : i32
    return %arg2, %arg1 : i32, i32
  }
  func.func @transform_2(%arg0: i32, %arg1: i32, %arg2: i32) -> (i32, i32) {
    %c0_i32 = arith.constant 0 : i32
    %c0_i32_0 = arith.constant 0 : i32
    return %c0_i32, %arg1 : i32, i32
  }
  func.func @transform_3(%arg0: i32, %arg1: i32, %arg2: i32) -> (i32, i32) {
    %c0_i32 = arith.constant 0 : i32
    return %arg0, %arg1 : i32, i32
  }
  func.func @transform_4(%arg0: i32, %arg1: i32, %arg2: i32) -> (i32, i32) {
    %c0_i32 = arith.constant 0 : i32
    return %arg0, %arg1 : i32, i32
  }
}

</mosaic_0001>

<bundles_post_ra>
// kernel: bottleneck_forward.4
= control target key start
LH: loop header
LB: loop body
LE: loop exit
PB: predicated region body
PF: predicated region fallthrough
CT: control target
= control target key end

     0   :  { %vm469_vm0 = vcmask 1041408   ;;  %vm372_vm1 = vcmask 31744   ;;  %s2251_s1 = inlined_call_operand.vmem [shape: bf16[4,128], index: 1, kind: input, shape index: {}]   ;;  %s2252_s0 = inlined_call_operand.vmem [shape: bf16[512,4], index: 0, kind: input, shape index: {}]   ;;  %s2253_s2 = inlined_call_operand.vmem [shape: f32[1,128], index: 2, kind: input, shape index: {}]   ;;  %s2254_s3 = inlined_call_operand.vmem [shape: bf16[512,128], index: 3, kind: output, shape index: {}]  }
   0x1   :  { %v211_v0 = vld [vmem:[%s2251_s1] sm:$0x3]  ;;  %v1905_v4 = vld [vmem:[%s2252_s0 + $0x8] sm:$0xff]   ;;  %v1907_v6 = vld [vmem:[%s2252_s0 + $0x10] sm:$0xff]  }
   0x2   :  { %1901 = vmatprep.subr.msk.bf16.mxu0 %vm469_vm0, %v211_v0  ;;  %1902 = vmatprep.subr.msk.bf16.mxu1 %vm469_vm0, %v211_v0  ;;  %v471_v1 = vsel %vm469_vm0, %v211_v0, 0  ;;  %v1903_v2 = vld [vmem:[%s2252_s0] sm:$0xff]   ;;  %v1906_v5 = vld [vmem:[%s2252_s0 + $0x88] sm:$0xff]   ;;  %v1908_v7 = vld [vmem:[%s2252_s0 + $0x90] sm:$0xff]  }
   0x3   :  { %1834 = vmatpush3.bf16.msra.mxu0 %v471_v1  ;;  %1900 = vmatpush3.bf16.msra.mxu1 %v471_v1  ;;  %v1904_v3 = vld [vmem:[%s2252_s0 + $0x80] sm:$0xff]   ;;  %v1909_v8 = vld [vmem:[%s2252_s0 + $0x18] sm:$0xff]   ;;  %v1913_v12 = vld [vmem:[%s2252_s0 + $0x28] sm:$0xff]  }
   0x4   :  { %1835 = vmatprep.mubr.msk.bf16.mxu0 %vm372_vm1, %v1903_v2  ;;  %1867 = vmatprep.mubr.msk.bf16.mxu1 %vm372_vm1, %v1904_v3  ;;  %v1910_v9 = vld [vmem:[%s2252_s0 + $0x98] sm:$0xff]   ;;  %v1911_v10 = vld [vmem:[%s2252_s0 + $0x20] sm:$0xff]   ;;  %v1914_v13 = vld [vmem:[%s2252_s0 + $0xa8] sm:$0xff]  }
   0x5   :  { %v1912_v11 = vld [vmem:[%s2252_s0 + $0xa0] sm:$0xff]   ;;  %v1915_v14 = vld [vmem:[%s2252_s0 + $0x30] sm:$0xff]   ;;  %v1917_v16 = vld [vmem:[%s2252_s0 + $0x38] sm:$0xff]  }
   0x6   :  { %1836 = vmatmul.mubr.msk.bf16.vlgmr.msra.gmra.mxu0 %vm372_vm1, %v1905_v4  ;;  %1868 = vmatmul.mubr.msk.bf16.vlgmr.msra.gmra.mxu1 %vm372_vm1, %v1906_v5  ;;  %v1916_v15 = vld [vmem:[%s2252_s0 + $0xb0] sm:$0xff]   ;;  %v1918_v17 = vld [vmem:[%s2252_s0 + $0xb8] sm:$0xff]   ;;  %v1919_v18 = vld [vmem:[%s2252_s0 + $0x40] sm:$0xff]  }
   0x7   :  { %1839 = vmatprep.mubr.msk.bf16.mxu0 %vm372_vm1, %v1907_v6  ;;  %1871 = vmatprep.mubr.msk.bf16.mxu1 %vm372_vm1, %v1908_v7  ;;  %v1920_v19 = vld [vmem:[%s2252_s0 + $0xc0] sm:$0xff]   ;;  %v1921_v20 = vld [vmem:[%s2252_s0 + $0x48] sm:$0xff]   ;;  %v1923_v22 = vld [vmem:[%s2252_s0 + $0x50] sm:$0xff]  }
   0x8   :  { %v1922_v21 = vld [vmem:[%s2252_s0 + $0xc8] sm:$0xff]   ;;  %v1924_v23 = vld [vmem:[%s2252_s0 + $0xd0] sm:$0xff]   ;;  %v1925_v24 = vld [vmem:[%s2252_s0 + $0x58] sm:$0xff]  }
   0x9   :  { %v1926_v25 = vld [vmem:[%s2252_s0 + $0xd8] sm:$0xff]   ;;  %v1927_v26 = vld [vmem:[%s2252_s0 + $0x60] sm:$0xff]   ;;  %v1929_v28 = vld [vmem:[%s2252_s0 + $0x68] sm:$0xff]  }
   0xa   :  { %v1928_v27 = vld [vmem:[%s2252_s0 + $0xe0] sm:$0xff]   ;;  %v1930_v29 = vld [vmem:[%s2252_s0 + $0xe8] sm:$0xff]   ;;  %v1931_v30 = vld [vmem:[%s2252_s0 + $0x70] sm:$0xff]  }
   0xb   :  { %v1932_v31 = vld [vmem:[%s2252_s0 + $0xf0] sm:$0xff]   ;;  %v1933_v32 = vld [vmem:[%s2252_s0 + $0x78] sm:$0xff]   ;;  %v2089_v35 = vld [vmem:[%s2253_s2] ss:$0 sm:$0xff] }
   0xc   :  { %v1934_v33 = vld [vmem:[%s2252_s0 + $0xf8] sm:$0xff]  }
   0xe   :  { %1840 = vmatmul.mubr.msk.bf16.gmra.mxu0 %vm372_vm1, %v1909_v8  ;;  %1872 = vmatmul.mubr.msk.bf16.gmra.mxu1 %vm372_vm1, %v1910_v9 }
   0xf   :  { %1843 = vmatprep.mubr.msk.bf16.mxu0 %vm372_vm1, %v1911_v10  ;;  %1875 = vmatprep.mubr.msk.bf16.mxu1 %vm372_vm1, %v1912_v11 }
  0x16   :  { %1844 = vmatmul.mubr.msk.bf16.gmra.mxu0 %vm372_vm1, %v1913_v12  ;;  %1876 = vmatmul.mubr.msk.bf16.gmra.mxu1 %vm372_vm1, %v1914_v13 }
  0x17   :  { %1847 = vmatprep.mubr.msk.bf16.mxu0 %vm372_vm1, %v1915_v14  ;;  %1879 = vmatprep.mubr.msk.bf16.mxu1 %vm372_vm1, %v1916_v15 }
  0x1e   :  { %1848 = vmatmul.mubr.msk.bf16.gmra.mxu0 %vm372_vm1, %v1917_v16  ;;  %1880 = vmatmul.mubr.msk.bf16.gmra.mxu1 %vm372_vm1, %v1918_v17 }
  0x1f   :  { %1851 = vmatprep.mubr.msk.bf16.mxu0 %vm372_vm1, %v1919_v18  ;;  %1883 = vmatprep.mubr.msk.bf16.mxu1 %vm372_vm1, %v1920_v19 }
  0x26   :  { %1852 = vmatmul.mubr.msk.bf16.gmra.mxu0 %vm372_vm1, %v1921_v20  ;;  %1884 = vmatmul.mubr.msk.bf16.gmra.mxu1 %vm372_vm1, %v1922_v21 }
  0x27   :  { %1855 = vmatprep.mubr.msk.bf16.mxu0 %vm372_vm1, %v1923_v22  ;;  %1887 = vmatprep.mubr.msk.bf16.mxu1 %vm372_vm1, %v1924_v23 }
  0x2e   :  { %1856 = vmatmul.mubr.msk.bf16.gmra.mxu0 %vm372_vm1, %v1925_v24  ;;  %1888 = vmatmul.mubr.msk.bf16.gmra.mxu1 %vm372_vm1, %v1926_v25 }
  0x2f   :  { %1859 = vmatprep.mubr.msk.bf16.mxu0 %vm372_vm1, %v1927_v26  ;;  %1891 = vmatprep.mubr.msk.bf16.mxu1 %vm372_vm1, %v1928_v27 }
  0x36   :  { %1860 = vmatmul.mubr.msk.bf16.gmra.mxu0 %vm372_vm1, %v1929_v28  ;;  %1892 = vmatmul.mubr.msk.bf16.gmra.mxu1 %vm372_vm1, %v1930_v29 }
  0x37   :  { %1863 = vmatprep.mubr.msk.bf16.mxu0 %vm372_vm1, %v1931_v30  ;;  %1895 = vmatprep.mubr.msk.bf16.mxu1 %vm372_vm1, %v1932_v31 }
  0x3e   :  { %1864 = vmatmul.mubr.msk.bf16.gmra.mxu0 %vm372_vm1, %v1933_v32  ;;  %1896 = vmatmul.mubr.msk.bf16.gmra.mxu1 %vm372_vm1, %v1934_v33 }
  0xc6   :  { %v1837_v34 = vpop.f32.mrf.mxu0  ;;  %v1869_v36 = vpop.f32.mrf.mxu1 }
  0xc7   :  { %v966_v38 = vadd.f32 %v1837_v34, %v2089_v35  ;;  %v998_v40 = vadd.f32 %v1869_v36, %v2089_v35 }
  0xc8   :  { %v507_v37 = vpop.f32.mrf.mxu0  ;;  %v635_v39 = vpop.f32.mrf.mxu1 }
  0xc9   :  { %v964_v42 = vadd.f32 %v2089_v35, %v507_v37  ;;  %v996_v45 = vadd.f32 %v2089_v35, %v635_v39  ;;  %v1030_v48 = vmax.f32 %v966_v38, 0.0  ;;  %v1062_v52 = vmax.f32 %v998_v40, 0.0 }
  0xca   :  { %v1838_v41 = vpop.f32.mrf.mxu0  ;;  %v1870_v44 = vpop.f32.mrf.mxu1 }
  0xcb   :  { %v967_v43 = vadd.f32 %v1838_v41, %v2089_v35  ;;  %v999_v46 = vadd.f32 %v1870_v44, %v2089_v35  ;;  %v1028_v56 = vmax.f32 %v964_v42, 0.0  ;;  %v1060_v60 = vmax.f32 %v996_v45, 0.0 }
  0xcc   :  { %v510_v47 = vpop.f32.mrf.mxu0  ;;  %v638_v51 = vpop.f32.mrf.mxu1 }
  0xcd   :  { %v1031_v49 = vmax.f32 %v967_v43, 0.0  ;;  %v965_v50 = vadd.f32 %v2089_v35, %v510_v47  ;;  %v1063_v53 = vmax.f32 %v999_v46, 0.0  ;;  %v997_v54 = vadd.f32 %v2089_v35, %v638_v51 }
  0xce   :  { %v1841_v55 = vpop.f32.mrf.mxu0  ;;  %v1873_v59 = vpop.f32.mrf.mxu1 }
  0xcf   :  { %v1617_v57 = vpack.c.bf16 %v1031_v49, %v1030_v48  ;;  %v1029_v58 = vmax.f32 %v965_v50, 0.0  ;;  %v1697_v61 = vpack.c.bf16 %v1063_v53, %v1062_v52  ;;  %v1061_v62 = vmax.f32 %v997_v54, 0.0 }
  0xd0   :  { %v523_v63 = vpop.f32.mrf.mxu0  ;;  %v970_v1 = vadd.f32 %v1841_v55, %v2089_v35  ;;  %v651_v2 = vpop.f32.mrf.mxu1  ;;  %v1002_v4 = vadd.f32 %v1873_v59, %v2089_v35 }
  0xd1   :  { %1769 = vst [vmem:[%s2254_s3 + $0x8] sm:$0xff] %v1617_v57   ;;  %v1612_v0 = vpack.c.bf16 %v1029_v58, %v1028_v56  ;;  %1785 = vst [vmem:[%s2254_s3 + $0x88] sm:$0xff] %v1697_v61   ;;  %v1692_v3 = vpack.c.bf16 %v1061_v62, %v1060_v60  ;;  %v968_v6 = vadd.f32 %v2089_v35, %v523_v63 }
  0xd2   :  { %v1842_v5 = vpop.f32.mrf.mxu0  ;;  %v1874_v8 = vpop.f32.mrf.mxu1  ;;  %v1000_v9 = vadd.f32 %v2089_v35, %v651_v2  ;;  %v1034_v12 = vmax.f32 %v970_v1, 0.0  ;;  %v1066_v16 = vmax.f32 %v1002_v4, 0.0 }
  0xd3   :  { %1613 = vst [vmem:[%s2254_s3] sm:$0xff] %v1612_v0   ;;  %v971_v7 = vadd.f32 %v1842_v5, %v2089_v35  ;;  %1784 = vst [vmem:[%s2254_s3 + $0x80] sm:$0xff] %v1692_v3   ;;  %v1003_v10 = vadd.f32 %v1874_v8, %v2089_v35  ;;  %v1032_v20 = vmax.f32 %v968_v6, 0.0 }
  0xd4   :  { %v526_v11 = vpop.f32.mrf.mxu0  ;;  %v654_v15 = vpop.f32.mrf.mxu1  ;;  %v1064_v24 = vmax.f32 %v1000_v9, 0.0 }
  0xd5   :  { %v1035_v13 = vmax.f32 %v971_v7, 0.0  ;;  %v969_v14 = vadd.f32 %v2089_v35, %v526_v11  ;;  %v1067_v17 = vmax.f32 %v1003_v10, 0.0  ;;  %v1001_v18 = vadd.f32 %v2089_v35, %v654_v15 }
  0xd6   :  { %v1845_v19 = vpop.f32.mrf.mxu0  ;;  %v1877_v23 = vpop.f32.mrf.mxu1 }
  0xd7   :  { %v1627_v21 = vpack.c.bf16 %v1035_v13, %v1034_v12  ;;  %v1033_v22 = vmax.f32 %v969_v14, 0.0  ;;  %v1707_v25 = vpack.c.bf16 %v1067_v17, %v1066_v16  ;;  %v1065_v26 = vmax.f32 %v1001_v18, 0.0 }
  0xd8   :  { %v539_v27 = vpop.f32.mrf.mxu0  ;;  %v974_v29 = vadd.f32 %v1845_v19, %v2089_v35  ;;  %v667_v30 = vpop.f32.mrf.mxu1  ;;  %v1006_v32 = vadd.f32 %v1877_v23, %v2089_v35 }
  0xd9   :  { %1771 = vst [vmem:[%s2254_s3 + $0x18] sm:$0xff] %v1627_v21   ;;  %v1622_v28 = vpack.c.bf16 %v1033_v22, %v1032_v20  ;;  %1787 = vst [vmem:[%s2254_s3 + $0x98] sm:$0xff] %v1707_v25   ;;  %v1702_v31 = vpack.c.bf16 %v1065_v26, %v1064_v24  ;;  %v972_v34 = vadd.f32 %v2089_v35, %v539_v27 }
  0xda   :  { %v1846_v33 = vpop.f32.mrf.mxu0  ;;  %v1878_v37 = vpop.f32.mrf.mxu1  ;;  %v1004_v38 = vadd.f32 %v2089_v35, %v667_v30  ;;  %v1038_v41 = vmax.f32 %v974_v29, 0.0  ;;  %v1070_v45 = vmax.f32 %v1006_v32, 0.0 }
  0xdb   :  { %1770 = vst [vmem:[%s2254_s3 + $0x10] sm:$0xff] %v1622_v28   ;;  %v975_v36 = vadd.f32 %v1846_v33, %v2089_v35  ;;  %1786 = vst [vmem:[%s2254_s3 + $0x90] sm:$0xff] %v1702_v31   ;;  %v1007_v39 = vadd.f32 %v1878_v37, %v2089_v35  ;;  %v1036_v49 = vmax.f32 %v972_v34, 0.0 }
  0xdc   :  { %v542_v40 = vpop.f32.mrf.mxu0  ;;  %v670_v44 = vpop.f32.mrf.mxu1  ;;  %v1068_v53 = vmax.f32 %v1004_v38, 0.0 }
  0xdd   :  { %v1039_v42 = vmax.f32 %v975_v36, 0.0  ;;  %v973_v43 = vadd.f32 %v2089_v35, %v542_v40  ;;  %v1071_v46 = vmax.f32 %v1007_v39, 0.0  ;;  %v1005_v47 = vadd.f32 %v2089_v35, %v670_v44 }
  0xde   :  { %v1849_v48 = vpop.f32.mrf.mxu0  ;;  %v1881_v52 = vpop.f32.mrf.mxu1 }
  0xdf   :  { %v1637_v50 = vpack.c.bf16 %v1039_v42, %v1038_v41  ;;  %v1037_v51 = vmax.f32 %v973_v43, 0.0  ;;  %v1717_v54 = vpack.c.bf16 %v1071_v46, %v1070_v45  ;;  %v1069_v55 = vmax.f32 %v1005_v47, 0.0 }
  0xe0   :  { %v555_v56 = vpop.f32.mrf.mxu0  ;;  %v978_v58 = vadd.f32 %v1849_v48, %v2089_v35  ;;  %v683_v59 = vpop.f32.mrf.mxu1  ;;  %v1010_v61 = vadd.f32 %v1881_v52, %v2089_v35 }
  0xe1   :  { %1773 = vst [vmem:[%s2254_s3 + $0x28] sm:$0xff] %v1637_v50   ;;  %v1632_v57 = vpack.c.bf16 %v1037_v51, %v1036_v49  ;;  %1789 = vst [vmem:[%s2254_s3 + $0xa8] sm:$0xff] %v1717_v54   ;;  %v1712_v60 = vpack.c.bf16 %v1069_v55, %v1068_v53  ;;  %v976_v63 = vadd.f32 %v2089_v35, %v555_v56 }
  0xe2   :  { %v1850_v62 = vpop.f32.mrf.mxu0  ;;  %v1882_v1 = vpop.f32.mrf.mxu1  ;;  %v1008_v2 = vadd.f32 %v2089_v35, %v683_v59  ;;  %v1042_v5 = vmax.f32 %v978_v58, 0.0  ;;  %v1074_v9 = vmax.f32 %v1010_v61, 0.0 }
  0xe3   :  { %1772 = vst [vmem:[%s2254_s3 + $0x20] sm:$0xff] %v1632_v57   ;;  %v979_v0 = vadd.f32 %v1850_v62, %v2089_v35  ;;  %1788 = vst [vmem:[%s2254_s3 + $0xa0] sm:$0xff] %v1712_v60   ;;  %v1011_v3 = vadd.f32 %v1882_v1, %v2089_v35  ;;  %v1040_v13 = vmax.f32 %v976_v63, 0.0 }
  0xe4   :  { %v558_v4 = vpop.f32.mrf.mxu0  ;;  %v686_v8 = vpop.f32.mrf.mxu1  ;;  %v1072_v17 = vmax.f32 %v1008_v2, 0.0 }
  0xe5   :  { %v1043_v6 = vmax.f32 %v979_v0, 0.0  ;;  %v977_v7 = vadd.f32 %v2089_v35, %v558_v4  ;;  %v1075_v10 = vmax.f32 %v1011_v3, 0.0  ;;  %v1009_v11 = vadd.f32 %v2089_v35, %v686_v8 }
  0xe6   :  { %v1853_v12 = vpop.f32.mrf.mxu0  ;;  %v1885_v16 = vpop.f32.mrf.mxu1 }
  0xe7   :  { %v1647_v14 = vpack.c.bf16 %v1043_v6, %v1042_v5  ;;  %v1041_v15 = vmax.f32 %v977_v7, 0.0  ;;  %v1727_v18 = vpack.c.bf16 %v1075_v10, %v1074_v9  ;;  %v1073_v19 = vmax.f32 %v1009_v11, 0.0 }
  0xe8   :  { %v571_v20 = vpop.f32.mrf.mxu0  ;;  %v982_v22 = vadd.f32 %v1853_v12, %v2089_v35  ;;  %v699_v23 = vpop.f32.mrf.mxu1  ;;  %v1014_v25 = vadd.f32 %v1885_v16, %v2089_v35 }
  0xe9   :  { %1775 = vst [vmem:[%s2254_s3 + $0x38] sm:$0xff] %v1647_v14   ;;  %v1642_v21 = vpack.c.bf16 %v1041_v15, %v1040_v13  ;;  %1791 = vst [vmem:[%s2254_s3 + $0xb8] sm:$0xff] %v1727_v18   ;;  %v1722_v24 = vpack.c.bf16 %v1073_v19, %v1072_v17  ;;  %v980_v27 = vadd.f32 %v2089_v35, %v571_v20 }
  0xea   :  { %v1854_v26 = vpop.f32.mrf.mxu0  ;;  %v1886_v29 = vpop.f32.mrf.mxu1  ;;  %v1012_v30 = vadd.f32 %v2089_v35, %v699_v23  ;;  %v1046_v33 = vmax.f32 %v982_v22, 0.0  ;;  %v1078_v38 = vmax.f32 %v1014_v25, 0.0 }
  0xeb   :  { %1774 = vst [vmem:[%s2254_s3 + $0x30] sm:$0xff] %v1642_v21   ;;  %v983_v28 = vadd.f32 %v1854_v26, %v2089_v35  ;;  %1790 = vst [vmem:[%s2254_s3 + $0xb0] sm:$0xff] %v1722_v24   ;;  %v1015_v31 = vadd.f32 %v1886_v29, %v2089_v35  ;;  %v1044_v42 = vmax.f32 %v980_v27, 0.0 }
  0xec   :  { %v574_v32 = vpop.f32.mrf.mxu0  ;;  %v702_v37 = vpop.f32.mrf.mxu1  ;;  %v1076_v46 = vmax.f32 %v1012_v30, 0.0 }
  0xed   :  { %v1047_v34 = vmax.f32 %v983_v28, 0.0  ;;  %v981_v36 = vadd.f32 %v2089_v35, %v574_v32  ;;  %v1079_v39 = vmax.f32 %v1015_v31, 0.0  ;;  %v1013_v40 = vadd.f32 %v2089_v35, %v702_v37 }
  0xee   :  { %v1857_v41 = vpop.f32.mrf.mxu0  ;;  %v1889_v45 = vpop.f32.mrf.mxu1 }
  0xef   :  { %v1657_v43 = vpack.c.bf16 %v1047_v34, %v1046_v33  ;;  %v1045_v44 = vmax.f32 %v981_v36, 0.0  ;;  %v1737_v47 = vpack.c.bf16 %v1079_v39, %v1078_v38  ;;  %v1077_v48 = vmax.f32 %v1013_v40, 0.0 }
  0xf0   :  { %v587_v49 = vpop.f32.mrf.mxu0  ;;  %v986_v51 = vadd.f32 %v1857_v41, %v2089_v35  ;;  %v715_v52 = vpop.f32.mrf.mxu1  ;;  %v1018_v54 = vadd.f32 %v1889_v45, %v2089_v35 }
  0xf1   :  { %1777 = vst [vmem:[%s2254_s3 + $0x48] sm:$0xff] %v1657_v43   ;;  %v1652_v50 = vpack.c.bf16 %v1045_v44, %v1044_v42  ;;  %1793 = vst [vmem:[%s2254_s3 + $0xc8] sm:$0xff] %v1737_v47   ;;  %v1732_v53 = vpack.c.bf16 %v1077_v48, %v1076_v46  ;;  %v984_v56 = vadd.f32 %v2089_v35, %v587_v49 }
  0xf2   :  { %v1858_v55 = vpop.f32.mrf.mxu0  ;;  %v1890_v58 = vpop.f32.mrf.mxu1  ;;  %v1016_v59 = vadd.f32 %v2089_v35, %v715_v52  ;;  %v1050_v62 = vmax.f32 %v986_v51, 0.0  ;;  %v1082_v2 = vmax.f32 %v1018_v54, 0.0 }
  0xf3   :  { %1776 = vst [vmem:[%s2254_s3 + $0x40] sm:$0xff] %v1652_v50   ;;  %v987_v57 = vadd.f32 %v1858_v55, %v2089_v35  ;;  %1792 = vst [vmem:[%s2254_s3 + $0xc0] sm:$0xff] %v1732_v53   ;;  %v1019_v60 = vadd.f32 %v1890_v58, %v2089_v35  ;;  %v1048_v6 = vmax.f32 %v984_v56, 0.0 }
  0xf4   :  { %v590_v61 = vpop.f32.mrf.mxu0  ;;  %v718_v1 = vpop.f32.mrf.mxu1  ;;  %v1080_v10 = vmax.f32 %v1016_v59, 0.0 }
  0xf5   :  { %v1051_v63 = vmax.f32 %v987_v57, 0.0  ;;  %v985_v0 = vadd.f32 %v2089_v35, %v590_v61  ;;  %v1083_v3 = vmax.f32 %v1019_v60, 0.0  ;;  %v1017_v4 = vadd.f32 %v2089_v35, %v718_v1 }
  0xf6   :  { %v1861_v5 = vpop.f32.mrf.mxu0  ;;  %v1893_v9 = vpop.f32.mrf.mxu1 }
  0xf7   :  { %v1667_v7 = vpack.c.bf16 %v1051_v63, %v1050_v62  ;;  %v1049_v8 = vmax.f32 %v985_v0, 0.0  ;;  %v1747_v11 = vpack.c.bf16 %v1083_v3, %v1082_v2  ;;  %v1081_v12 = vmax.f32 %v1017_v4, 0.0 }
  0xf8   :  { %v603_v13 = vpop.f32.mrf.mxu0  ;;  %v990_v15 = vadd.f32 %v1861_v5, %v2089_v35  ;;  %v731_v16 = vpop.f32.mrf.mxu1  ;;  %v1022_v18 = vadd.f32 %v1893_v9, %v2089_v35 }
  0xf9   :  { %1779 = vst [vmem:[%s2254_s3 + $0x58] sm:$0xff] %v1667_v7   ;;  %v1662_v14 = vpack.c.bf16 %v1049_v8, %v1048_v6  ;;  %1795 = vst [vmem:[%s2254_s3 + $0xd8] sm:$0xff] %v1747_v11   ;;  %v1742_v17 = vpack.c.bf16 %v1081_v12, %v1080_v10  ;;  %v988_v20 = vadd.f32 %v2089_v35, %v603_v13 }
  0xfa   :  { %v1862_v19 = vpop.f32.mrf.mxu0  ;;  %v1894_v22 = vpop.f32.mrf.mxu1  ;;  %v1020_v23 = vadd.f32 %v2089_v35, %v731_v16  ;;  %v1054_v26 = vmax.f32 %v990_v15, 0.0  ;;  %v1086_v30 = vmax.f32 %v1022_v18, 0.0 }
  0xfb   :  { %1778 = vst [vmem:[%s2254_s3 + $0x50] sm:$0xff] %v1662_v14   ;;  %v991_v21 = vadd.f32 %v1862_v19, %v2089_v35  ;;  %1794 = vst [vmem:[%s2254_s3 + $0xd0] sm:$0xff] %v1742_v17   ;;  %v1023_v24 = vadd.f32 %v1894_v22, %v2089_v35  ;;  %v1052_v34 = vmax.f32 %v988_v20, 0.0 }
  0xfc   :  { %v606_v25 = vpop.f32.mrf.mxu0  ;;  %v734_v29 = vpop.f32.mrf.mxu1  ;;  %v1084_v39 = vmax.f32 %v1020_v23, 0.0 }
  0xfd   :  { %v1055_v27 = vmax.f32 %v991_v21, 0.0  ;;  %v989_v28 = vadd.f32 %v2089_v35, %v606_v25  ;;  %v1087_v31 = vmax.f32 %v1023_v24, 0.0  ;;  %v1021_v32 = vadd.f32 %v2089_v35, %v734_v29 }
  0xfe   :  { %v1865_v33 = vpop.f32.mrf.mxu0  ;;  %v1897_v38 = vpop.f32.mrf.mxu1 }
  0xff   :  { %v1677_v36 = vpack.c.bf16 %v1055_v27, %v1054_v26  ;;  %v1053_v37 = vmax.f32 %v989_v28, 0.0  ;;  %v1757_v40 = vpack.c.bf16 %v1087_v31, %v1086_v30  ;;  %v1085_v41 = vmax.f32 %v1021_v32, 0.0 }
 0x100   :  { %v619_v42 = vpop.f32.mrf.mxu0  ;;  %v994_v44 = vadd.f32 %v1865_v33, %v2089_v35  ;;  %v747_v45 = vpop.f32.mrf.mxu1  ;;  %v1026_v47 = vadd.f32 %v1897_v38, %v2089_v35 }
 0x101   :  { %1781 = vst [vmem:[%s2254_s3 + $0x68] sm:$0xff] %v1677_v36   ;;  %v1672_v43 = vpack.c.bf16 %v1053_v37, %v1052_v34  ;;  %1797 = vst [vmem:[%s2254_s3 + $0xe8] sm:$0xff] %v1757_v40   ;;  %v1752_v46 = vpack.c.bf16 %v1085_v41, %v1084_v39  ;;  %v992_v49 = vadd.f32 %v2089_v35, %v619_v42 }
 0x102   :  { %v1866_v48 = vpop.f32.mrf.mxu0  ;;  %v1898_v51 = vpop.f32.mrf.mxu1  ;;  %v1024_v52 = vadd.f32 %v2089_v35, %v747_v45  ;;  %v1058_v55 = vmax.f32 %v994_v44, 0.0  ;;  %v1090_v59 = vmax.f32 %v1026_v47, 0.0 }
 0x103   :  { %1780 = vst [vmem:[%s2254_s3 + $0x60] sm:$0xff] %v1672_v43   ;;  %v995_v50 = vadd.f32 %v1866_v48, %v2089_v35  ;;  %1796 = vst [vmem:[%s2254_s3 + $0xe0] sm:$0xff] %v1752_v46   ;;  %v1027_v53 = vadd.f32 %v1898_v51, %v2089_v35  ;;  %v1056_v62 = vmax.f32 %v992_v49, 0.0 }
 0x104   :  { %v622_v54 = vpop.f32.mrf.mxu0  ;;  %v750_v58 = vpop.f32.mrf.mxu1  ;;  %v1088_v1 = vmax.f32 %v1024_v52, 0.0 }
 0x105   :  { %v1059_v56 = vmax.f32 %v995_v50, 0.0  ;;  %v993_v57 = vadd.f32 %v2089_v35, %v622_v54  ;;  %v1091_v60 = vmax.f32 %v1027_v53, 0.0  ;;  %v1025_v61 = vadd.f32 %v2089_v35, %v750_v58 }
 0x107   :  { %v1687_v63 = vpack.c.bf16 %v1059_v56, %v1058_v55  ;;  %v1057_v0 = vmax.f32 %v993_v57, 0.0  ;;  %v1767_v2 = vpack.c.bf16 %v1091_v60, %v1090_v59  ;;  %v1089_v3 = vmax.f32 %v1025_v61, 0.0 }
 0x109   :  { %1783 = vst [vmem:[%s2254_s3 + $0x78] sm:$0xff] %v1687_v63   ;;  %v1682_v4 = vpack.c.bf16 %v1057_v0, %v1056_v62  ;;  %1799 = vst [vmem:[%s2254_s3 + $0xf8] sm:$0xff] %v1767_v2   ;;  %v1762_v5 = vpack.c.bf16 %v1089_v3, %v1088_v1 }
 0x10b   :  { %1782 = vst [vmem:[%s2254_s3 + $0x70] sm:$0xff] %v1682_v4   ;;  %1798 = vst [vmem:[%s2254_s3 + $0xf0] sm:$0xff] %v1762_v5  }

// kernel: bottleneck_forward.6
= control target key start
LH: loop header
LB: loop body
LE: loop exit
PB: predicated region body
PF: predicated region fallthrough
CT: control target
= control target key end

     0   :  { %vm469_vm0 = vcmask 1041408   ;;  %vm372_vm1 = vcmask 31744   ;;  %s2187_s1 = inlined_call_operand.vmem [shape: bf16[4,128], index: 1, kind: input, shape index: {}]   ;;  %s2188_s0 = inlined_call_operand.vmem [shape: bf16[512,4], index: 0, kind: input, shape index: {}]   ;;  %s2189_s2 = inlined_call_operand.vmem [shape: f32[1,128], index: 2, kind: input, shape index: {}]   ;;  %s2190_s3 = inlined_call_operand.vmem [shape: bf16[512,128], index: 3, kind: output, shape index: {}]  }
   0x1   :  { %v211_v0 = vld [vmem:[%s2187_s1] sm:$0x3]  ;;  %v1841_v4 = vld [vmem:[%s2188_s0 + $0x8] sm:$0xff]   ;;  %v1843_v6 = vld [vmem:[%s2188_s0 + $0x10] sm:$0xff]  }
   0x2   :  { %1837 = vmatprep.subr.msk.bf16.mxu0 %vm469_vm0, %v211_v0  ;;  %1838 = vmatprep.subr.msk.bf16.mxu1 %vm469_vm0, %v211_v0  ;;  %v471_v1 = vsel %vm469_vm0, %v211_v0, 0  ;;  %v1839_v2 = vld [vmem:[%s2188_s0] sm:$0xff]   ;;  %v1842_v5 = vld [vmem:[%s2188_s0 + $0x88] sm:$0xff]   ;;  %v1844_v7 = vld [vmem:[%s2188_s0 + $0x90] sm:$0xff]  }
   0x3   :  { %1770 = vmatpush3.bf16.msra.mxu0 %v471_v1  ;;  %1836 = vmatpush3.bf16.msra.mxu1 %v471_v1  ;;  %v1840_v3 = vld [vmem:[%s2188_s0 + $0x80] sm:$0xff]   ;;  %v1845_v8 = vld [vmem:[%s2188_s0 + $0x18] sm:$0xff]   ;;  %v1849_v12 = vld [vmem:[%s2188_s0 + $0x28] sm:$0xff]  }
   0x4   :  { %1771 = vmatprep.mubr.msk.bf16.mxu0 %vm372_vm1, %v1839_v2  ;;  %1803 = vmatprep.mubr.msk.bf16.mxu1 %vm372_vm1, %v1840_v3  ;;  %v1846_v9 = vld [vmem:[%s2188_s0 + $0x98] sm:$0xff]   ;;  %v1847_v10 = vld [vmem:[%s2188_s0 + $0x20] sm:$0xff]   ;;  %v1850_v13 = vld [vmem:[%s2188_s0 + $0xa8] sm:$0xff]  }
   0x5   :  { %v1848_v11 = vld [vmem:[%s2188_s0 + $0xa0] sm:$0xff]   ;;  %v1851_v14 = vld [vmem:[%s2188_s0 + $0x30] sm:$0xff]   ;;  %v1853_v16 = vld [vmem:[%s2188_s0 + $0x38] sm:$0xff]  }
   0x6   :  { %1772 = vmatmul.mubr.msk.bf16.vlgmr.msra.gmra.mxu0 %vm372_vm1, %v1841_v4  ;;  %1804 = vmatmul.mubr.msk.bf16.vlgmr.msra.gmra.mxu1 %vm372_vm1, %v1842_v5  ;;  %v1852_v15 = vld [vmem:[%s2188_s0 + $0xb0] sm:$0xff]   ;;  %v1854_v17 = vld [vmem:[%s2188_s0 + $0xb8] sm:$0xff]   ;;  %v1855_v18 = vld [vmem:[%s2188_s0 + $0x40] sm:$0xff]  }
   0x7   :  { %1775 = vmatprep.mubr.msk.bf16.mxu0 %vm372_vm1, %v1843_v6  ;;  %1807 = vmatprep.mubr.msk.bf16.mxu1 %vm372_vm1, %v1844_v7  ;;  %v1856_v19 = vld [vmem:[%s2188_s0 + $0xc0] sm:$0xff]   ;;  %v1857_v20 = vld [vmem:[%s2188_s0 + $0x48] sm:$0xff]   ;;  %v1859_v22 = vld [vmem:[%s2188_s0 + $0x50] sm:$0xff]  }
   0x8   :  { %v1858_v21 = vld [vmem:[%s2188_s0 + $0xc8] sm:$0xff]   ;;  %v1860_v23 = vld [vmem:[%s2188_s0 + $0xd0] sm:$0xff]   ;;  %v1861_v24 = vld [vmem:[%s2188_s0 + $0x58] sm:$0xff]  }
   0x9   :  { %v1862_v25 = vld [vmem:[%s2188_s0 + $0xd8] sm:$0xff]   ;;  %v1863_v26 = vld [vmem:[%s2188_s0 + $0x60] sm:$0xff]   ;;  %v1865_v28 = vld [vmem:[%s2188_s0 + $0x68] sm:$0xff]  }
   0xa   :  { %v1864_v27 = vld [vmem:[%s2188_s0 + $0xe0] sm:$0xff]   ;;  %v1866_v29 = vld [vmem:[%s2188_s0 + $0xe8] sm:$0xff]   ;;  %v1867_v30 = vld [vmem:[%s2188_s0 + $0x70] sm:$0xff]  }
   0xb   :  { %v1868_v31 = vld [vmem:[%s2188_s0 + $0xf0] sm:$0xff]   ;;  %v1869_v32 = vld [vmem:[%s2188_s0 + $0x78] sm:$0xff]   ;;  %v2025_v36 = vld [vmem:[%s2189_s2] ss:$0 sm:$0xff] }
   0xc   :  { %v1870_v33 = vld [vmem:[%s2188_s0 + $0xf8] sm:$0xff]  }
   0xe   :  { %1776 = vmatmul.mubr.msk.bf16.gmra.mxu0 %vm372_vm1, %v1845_v8  ;;  %1808 = vmatmul.mubr.msk.bf16.gmra.mxu1 %vm372_vm1, %v1846_v9 }
   0xf   :  { %1779 = vmatprep.mubr.msk.bf16.mxu0 %vm372_vm1, %v1847_v10  ;;  %1811 = vmatprep.mubr.msk.bf16.mxu1 %vm372_vm1, %v1848_v11 }
  0x16   :  { %1780 = vmatmul.mubr.msk.bf16.gmra.mxu0 %vm372_vm1, %v1849_v12  ;;  %1812 = vmatmul.mubr.msk.bf16.gmra.mxu1 %vm372_vm1, %v1850_v13 }
  0x17   :  { %1783 = vmatprep.mubr.msk.bf16.mxu0 %vm372_vm1, %v1851_v14  ;;  %1815 = vmatprep.mubr.msk.bf16.mxu1 %vm372_vm1, %v1852_v15 }
  0x1e   :  { %1784 = vmatmul.mubr.msk.bf16.gmra.mxu0 %vm372_vm1, %v1853_v16  ;;  %1816 = vmatmul.mubr.msk.bf16.gmra.mxu1 %vm372_vm1, %v1854_v17 }
  0x1f   :  { %1787 = vmatprep.mubr.msk.bf16.mxu0 %vm372_vm1, %v1855_v18  ;;  %1819 = vmatprep.mubr.msk.bf16.mxu1 %vm372_vm1, %v1856_v19 }
  0x26   :  { %1788 = vmatmul.mubr.msk.bf16.gmra.mxu0 %vm372_vm1, %v1857_v20  ;;  %1820 = vmatmul.mubr.msk.bf16.gmra.mxu1 %vm372_vm1, %v1858_v21 }
  0x27   :  { %1791 = vmatprep.mubr.msk.bf16.mxu0 %vm372_vm1, %v1859_v22  ;;  %1823 = vmatprep.mubr.msk.bf16.mxu1 %vm372_vm1, %v1860_v23 }
  0x2e   :  { %1792 = vmatmul.mubr.msk.bf16.gmra.mxu0 %vm372_vm1, %v1861_v24  ;;  %1824 = vmatmul.mubr.msk.bf16.gmra.mxu1 %vm372_vm1, %v1862_v25 }
  0x2f   :  { %1795 = vmatprep.mubr.msk.bf16.mxu0 %vm372_vm1, %v1863_v26  ;;  %1827 = vmatprep.mubr.msk.bf16.mxu1 %vm372_vm1, %v1864_v27 }
  0x36   :  { %1796 = vmatmul.mubr.msk.bf16.gmra.mxu0 %vm372_vm1, %v1865_v28  ;;  %1828 = vmatmul.mubr.msk.bf16.gmra.mxu1 %vm372_vm1, %v1866_v29 }
  0x37   :  { %1799 = vmatprep.mubr.msk.bf16.mxu0 %vm372_vm1, %v1867_v30  ;;  %1831 = vmatprep.mubr.msk.bf16.mxu1 %vm372_vm1, %v1868_v31 }
  0x3e   :  { %1800 = vmatmul.mubr.msk.bf16.gmra.mxu0 %vm372_vm1, %v1869_v32  ;;  %1832 = vmatmul.mubr.msk.bf16.gmra.mxu1 %vm372_vm1, %v1870_v33 }
  0xc6   :  { %v1773_v34 = vpop.f32.mrf.mxu0  ;;  %v1805_v35 = vpop.f32.mrf.mxu1 }
  0xc7   :  { %v966_v40 = vadd.f32 %v1773_v34, %v2025_v36  ;;  %v998_v43 = vadd.f32 %v1805_v35, %v2025_v36 }
  0xc8   :  { %v507_v37 = vpop.f32.mrf.mxu0  ;;  %v635_v38 = vpop.f32.mrf.mxu1 }
  0xc9   :  { %v964_v46 = vadd.f32 %v2025_v36, %v507_v37  ;;  %v996_v50 = vadd.f32 %v2025_v36, %v635_v38 }
  0xca   :  { %v1774_v39 = vpop.f32.mrf.mxu0  ;;  %v1806_v42 = vpop.f32.mrf.mxu1 }
  0xcb   :  { %v967_v41 = vadd.f32 %v1774_v39, %v2025_v36  ;;  %v999_v44 = vadd.f32 %v1806_v42, %v2025_v36 }
  0xcc   :  { %v510_v45 = vpop.f32.mrf.mxu0  ;;  %v638_v49 = vpop.f32.mrf.mxu1 }
  0xcd   :  { %v1553_v47 = vpack.c.bf16 %v967_v41, %v966_v40  ;;  %v965_v48 = vadd.f32 %v2025_v36, %v510_v45  ;;  %v1633_v51 = vpack.c.bf16 %v999_v44, %v998_v43  ;;  %v997_v52 = vadd.f32 %v2025_v36, %v638_v49 }
  0xce   :  { %v1777_v53 = vpop.f32.mrf.mxu0  ;;  %v1809_v55 = vpop.f32.mrf.mxu1 }
  0xcf   :  { %1705 = vst [vmem:[%s2190_s3 + $0x8] sm:$0xff] %v1553_v47   ;;  %v1548_v54 = vpack.c.bf16 %v965_v48, %v964_v46  ;;  %1721 = vst [vmem:[%s2190_s3 + $0x88] sm:$0xff] %v1633_v51   ;;  %v1628_v56 = vpack.c.bf16 %v997_v52, %v996_v50  ;;  %v970_v60 = vadd.f32 %v1777_v53, %v2025_v36 }
  0xd0   :  { %v523_v57 = vpop.f32.mrf.mxu0  ;;  %v651_v58 = vpop.f32.mrf.mxu1  ;;  %v1002_v63 = vadd.f32 %v1809_v55, %v2025_v36 }
  0xd1   :  { %1549 = vst [vmem:[%s2190_s3] sm:$0xff] %v1548_v54   ;;  %1720 = vst [vmem:[%s2190_s3 + $0x80] sm:$0xff] %v1628_v56   ;;  %v968_v2 = vadd.f32 %v2025_v36, %v523_v57  ;;  %v1000_v6 = vadd.f32 %v2025_v36, %v651_v58 }
  0xd2   :  { %v1778_v59 = vpop.f32.mrf.mxu0  ;;  %v1810_v62 = vpop.f32.mrf.mxu1 }
  0xd3   :  { %v971_v61 = vadd.f32 %v1778_v59, %v2025_v36  ;;  %v1003_v0 = vadd.f32 %v1810_v62, %v2025_v36 }
  0xd4   :  { %v526_v1 = vpop.f32.mrf.mxu0  ;;  %v654_v5 = vpop.f32.mrf.mxu1 }
  0xd5   :  { %v1563_v3 = vpack.c.bf16 %v971_v61, %v970_v60  ;;  %v969_v4 = vadd.f32 %v2025_v36, %v526_v1  ;;  %v1643_v7 = vpack.c.bf16 %v1003_v0, %v1002_v63  ;;  %v1001_v8 = vadd.f32 %v2025_v36, %v654_v5 }
  0xd6   :  { %v1781_v9 = vpop.f32.mrf.mxu0  ;;  %v1813_v11 = vpop.f32.mrf.mxu1 }
  0xd7   :  { %1707 = vst [vmem:[%s2190_s3 + $0x18] sm:$0xff] %v1563_v3   ;;  %v1558_v10 = vpack.c.bf16 %v969_v4, %v968_v2  ;;  %1723 = vst [vmem:[%s2190_s3 + $0x98] sm:$0xff] %v1643_v7   ;;  %v1638_v12 = vpack.c.bf16 %v1001_v8, %v1000_v6  ;;  %v974_v16 = vadd.f32 %v1781_v9, %v2025_v36 }
  0xd8   :  { %v539_v13 = vpop.f32.mrf.mxu0  ;;  %v667_v14 = vpop.f32.mrf.mxu1  ;;  %v1006_v19 = vadd.f32 %v1813_v11, %v2025_v36 }
  0xd9   :  { %1706 = vst [vmem:[%s2190_s3 + $0x10] sm:$0xff] %v1558_v10   ;;  %1722 = vst [vmem:[%s2190_s3 + $0x90] sm:$0xff] %v1638_v12   ;;  %v972_v22 = vadd.f32 %v2025_v36, %v539_v13  ;;  %v1004_v26 = vadd.f32 %v2025_v36, %v667_v14 }
  0xda   :  { %v1782_v15 = vpop.f32.mrf.mxu0  ;;  %v1814_v18 = vpop.f32.mrf.mxu1 }
  0xdb   :  { %v975_v17 = vadd.f32 %v1782_v15, %v2025_v36  ;;  %v1007_v20 = vadd.f32 %v1814_v18, %v2025_v36 }
  0xdc   :  { %v542_v21 = vpop.f32.mrf.mxu0  ;;  %v670_v25 = vpop.f32.mrf.mxu1 }
  0xdd   :  { %v1573_v23 = vpack.c.bf16 %v975_v17, %v974_v16  ;;  %v973_v24 = vadd.f32 %v2025_v36, %v542_v21  ;;  %v1653_v27 = vpack.c.bf16 %v1007_v20, %v1006_v19  ;;  %v1005_v28 = vadd.f32 %v2025_v36, %v670_v25 }
  0xde   :  { %v1785_v29 = vpop.f32.mrf.mxu0  ;;  %v1817_v31 = vpop.f32.mrf.mxu1 }
  0xdf   :  { %1709 = vst [vmem:[%s2190_s3 + $0x28] sm:$0xff] %v1573_v23   ;;  %v1568_v30 = vpack.c.bf16 %v973_v24, %v972_v22  ;;  %1725 = vst [vmem:[%s2190_s3 + $0xa8] sm:$0xff] %v1653_v27   ;;  %v1648_v32 = vpack.c.bf16 %v1005_v28, %v1004_v26  ;;  %v978_v37 = vadd.f32 %v1785_v29, %v2025_v36 }
  0xe0   :  { %v555_v33 = vpop.f32.mrf.mxu0  ;;  %v683_v34 = vpop.f32.mrf.mxu1  ;;  %v1010_v40 = vadd.f32 %v1817_v31, %v2025_v36 }
  0xe1   :  { %1708 = vst [vmem:[%s2190_s3 + $0x20] sm:$0xff] %v1568_v30   ;;  %1724 = vst [vmem:[%s2190_s3 + $0xa0] sm:$0xff] %v1648_v32   ;;  %v976_v43 = vadd.f32 %v2025_v36, %v555_v33  ;;  %v1008_v47 = vadd.f32 %v2025_v36, %v683_v34 }
  0xe2   :  { %v1786_v35 = vpop.f32.mrf.mxu0  ;;  %v1818_v39 = vpop.f32.mrf.mxu1 }
  0xe3   :  { %v979_v38 = vadd.f32 %v1786_v35, %v2025_v36  ;;  %v1011_v41 = vadd.f32 %v1818_v39, %v2025_v36 }
  0xe4   :  { %v558_v42 = vpop.f32.mrf.mxu0  ;;  %v686_v46 = vpop.f32.mrf.mxu1 }
  0xe5   :  { %v1583_v44 = vpack.c.bf16 %v979_v38, %v978_v37  ;;  %v977_v45 = vadd.f32 %v2025_v36, %v558_v42  ;;  %v1663_v48 = vpack.c.bf16 %v1011_v41, %v1010_v40  ;;  %v1009_v49 = vadd.f32 %v2025_v36, %v686_v46 }
  0xe6   :  { %v1789_v50 = vpop.f32.mrf.mxu0  ;;  %v1821_v52 = vpop.f32.mrf.mxu1 }
  0xe7   :  { %1711 = vst [vmem:[%s2190_s3 + $0x38] sm:$0xff] %v1583_v44   ;;  %v1578_v51 = vpack.c.bf16 %v977_v45, %v976_v43  ;;  %1727 = vst [vmem:[%s2190_s3 + $0xb8] sm:$0xff] %v1663_v48   ;;  %v1658_v53 = vpack.c.bf16 %v1009_v49, %v1008_v47  ;;  %v982_v57 = vadd.f32 %v1789_v50, %v2025_v36 }
  0xe8   :  { %v571_v54 = vpop.f32.mrf.mxu0  ;;  %v699_v55 = vpop.f32.mrf.mxu1  ;;  %v1014_v60 = vadd.f32 %v1821_v52, %v2025_v36 }
  0xe9   :  { %1710 = vst [vmem:[%s2190_s3 + $0x30] sm:$0xff] %v1578_v51   ;;  %1726 = vst [vmem:[%s2190_s3 + $0xb0] sm:$0xff] %v1658_v53   ;;  %v980_v63 = vadd.f32 %v2025_v36, %v571_v54  ;;  %v1012_v3 = vadd.f32 %v2025_v36, %v699_v55 }
  0xea   :  { %v1790_v56 = vpop.f32.mrf.mxu0  ;;  %v1822_v59 = vpop.f32.mrf.mxu1 }
  0xeb   :  { %v983_v58 = vadd.f32 %v1790_v56, %v2025_v36  ;;  %v1015_v61 = vadd.f32 %v1822_v59, %v2025_v36 }
  0xec   :  { %v574_v62 = vpop.f32.mrf.mxu0  ;;  %v702_v2 = vpop.f32.mrf.mxu1 }
  0xed   :  { %v1593_v0 = vpack.c.bf16 %v983_v58, %v982_v57  ;;  %v981_v1 = vadd.f32 %v2025_v36, %v574_v62  ;;  %v1673_v4 = vpack.c.bf16 %v1015_v61, %v1014_v60  ;;  %v1013_v5 = vadd.f32 %v2025_v36, %v702_v2 }
  0xee   :  { %v1793_v6 = vpop.f32.mrf.mxu0  ;;  %v1825_v8 = vpop.f32.mrf.mxu1 }
  0xef   :  { %1713 = vst [vmem:[%s2190_s3 + $0x48] sm:$0xff] %v1593_v0   ;;  %v1588_v7 = vpack.c.bf16 %v981_v1, %v980_v63  ;;  %1729 = vst [vmem:[%s2190_s3 + $0xc8] sm:$0xff] %v1673_v4   ;;  %v1668_v9 = vpack.c.bf16 %v1013_v5, %v1012_v3  ;;  %v986_v13 = vadd.f32 %v1793_v6, %v2025_v36 }
  0xf0   :  { %v587_v10 = vpop.f32.mrf.mxu0  ;;  %v715_v11 = vpop.f32.mrf.mxu1  ;;  %v1018_v16 = vadd.f32 %v1825_v8, %v2025_v36 }
  0xf1   :  { %1712 = vst [vmem:[%s2190_s3 + $0x40] sm:$0xff] %v1588_v7   ;;  %1728 = vst [vmem:[%s2190_s3 + $0xc0] sm:$0xff] %v1668_v9   ;;  %v984_v19 = vadd.f32 %v2025_v36, %v587_v10  ;;  %v1016_v23 = vadd.f32 %v2025_v36, %v715_v11 }
  0xf2   :  { %v1794_v12 = vpop.f32.mrf.mxu0  ;;  %v1826_v15 = vpop.f32.mrf.mxu1 }
  0xf3   :  { %v987_v14 = vadd.f32 %v1794_v12, %v2025_v36  ;;  %v1019_v17 = vadd.f32 %v1826_v15, %v2025_v36 }
  0xf4   :  { %v590_v18 = vpop.f32.mrf.mxu0  ;;  %v718_v22 = vpop.f32.mrf.mxu1 }
  0xf5   :  { %v1603_v20 = vpack.c.bf16 %v987_v14, %v986_v13  ;;  %v985_v21 = vadd.f32 %v2025_v36, %v590_v18  ;;  %v1683_v24 = vpack.c.bf16 %v1019_v17, %v1018_v16  ;;  %v1017_v25 = vadd.f32 %v2025_v36, %v718_v22 }
  0xf6   :  { %v1797_v26 = vpop.f32.mrf.mxu0  ;;  %v1829_v28 = vpop.f32.mrf.mxu1 }
  0xf7   :  { %1715 = vst [vmem:[%s2190_s3 + $0x58] sm:$0xff] %v1603_v20   ;;  %v1598_v27 = vpack.c.bf16 %v985_v21, %v984_v19  ;;  %1731 = vst [vmem:[%s2190_s3 + $0xd8] sm:$0xff] %v1683_v24   ;;  %v1678_v29 = vpack.c.bf16 %v1017_v25, %v1016_v23  ;;  %v990_v33 = vadd.f32 %v1797_v26, %v2025_v36 }
  0xf8   :  { %v603_v30 = vpop.f32.mrf.mxu0  ;;  %v731_v31 = vpop.f32.mrf.mxu1  ;;  %v1022_v37 = vadd.f32 %v1829_v28, %v2025_v36 }
  0xf9   :  { %1714 = vst [vmem:[%s2190_s3 + $0x50] sm:$0xff] %v1598_v27   ;;  %1730 = vst [vmem:[%s2190_s3 + $0xd0] sm:$0xff] %v1678_v29   ;;  %v988_v40 = vadd.f32 %v2025_v36, %v603_v30  ;;  %v1020_v44 = vadd.f32 %v2025_v36, %v731_v31 }
  0xfa   :  { %v1798_v32 = vpop.f32.mrf.mxu0  ;;  %v1830_v35 = vpop.f32.mrf.mxu1 }
  0xfb   :  { %v991_v34 = vadd.f32 %v1798_v32, %v2025_v36  ;;  %v1023_v38 = vadd.f32 %v1830_v35, %v2025_v36 }
  0xfc   :  { %v606_v39 = vpop.f32.mrf.mxu0  ;;  %v734_v43 = vpop.f32.mrf.mxu1 }
  0xfd   :  { %v1613_v41 = vpack.c.bf16 %v991_v34, %v990_v33  ;;  %v989_v42 = vadd.f32 %v2025_v36, %v606_v39  ;;  %v1693_v45 = vpack.c.bf16 %v1023_v38, %v1022_v37  ;;  %v1021_v46 = vadd.f32 %v2025_v36, %v734_v43 }
  0xfe   :  { %v1801_v47 = vpop.f32.mrf.mxu0  ;;  %v1833_v49 = vpop.f32.mrf.mxu1 }
  0xff   :  { %1717 = vst [vmem:[%s2190_s3 + $0x68] sm:$0xff] %v1613_v41   ;;  %v1608_v48 = vpack.c.bf16 %v989_v42, %v988_v40  ;;  %1733 = vst [vmem:[%s2190_s3 + $0xe8] sm:$0xff] %v1693_v45   ;;  %v1688_v50 = vpack.c.bf16 %v1021_v46, %v1020_v44  ;;  %v994_v54 = vadd.f32 %v1801_v47, %v2025_v36 }
 0x100   :  { %v619_v51 = vpop.f32.mrf.mxu0  ;;  %v747_v52 = vpop.f32.mrf.mxu1  ;;  %v1026_v57 = vadd.f32 %v1833_v49, %v2025_v36 }
 0x101   :  { %1716 = vst [vmem:[%s2190_s3 + $0x60] sm:$0xff] %v1608_v48   ;;  %1732 = vst [vmem:[%s2190_s3 + $0xe0] sm:$0xff] %v1688_v50   ;;  %v992_v60 = vadd.f32 %v2025_v36, %v619_v51  ;;  %v1024_v0 = vadd.f32 %v2025_v36, %v747_v52 }
 0x102   :  { %v1802_v53 = vpop.f32.mrf.mxu0  ;;  %v1834_v56 = vpop.f32.mrf.mxu1 }
 0x103   :  { %v995_v55 = vadd.f32 %v1802_v53, %v2025_v36  ;;  %v1027_v58 = vadd.f32 %v1834_v56, %v2025_v36 }
 0x104   :  { %v622_v59 = vpop.f32.mrf.mxu0  ;;  %v750_v63 = vpop.f32.mrf.mxu1 }
 0x105   :  { %v1623_v61 = vpack.c.bf16 %v995_v55, %v994_v54  ;;  %v993_v62 = vadd.f32 %v2025_v36, %v622_v59  ;;  %v1703_v1 = vpack.c.bf16 %v1027_v58, %v1026_v57  ;;  %v1025_v2 = vadd.f32 %v2025_v36, %v750_v63 }
 0x107   :  { %1719 = vst [vmem:[%s2190_s3 + $0x78] sm:$0xff] %v1623_v61   ;;  %v1618_v3 = vpack.c.bf16 %v993_v62, %v992_v60  ;;  %1735 = vst [vmem:[%s2190_s3 + $0xf8] sm:$0xff] %v1703_v1   ;;  %v1698_v4 = vpack.c.bf16 %v1025_v2, %v1024_v0 }
 0x109   :  { %1718 = vst [vmem:[%s2190_s3 + $0x70] sm:$0xff] %v1618_v3   ;;  %1734 = vst [vmem:[%s2190_s3 + $0xf0] sm:$0xff] %v1698_v4  }

// kernel: bottleneck_forward.7
= control target key start
LH: loop header
LB: loop body
LE: loop exit
PB: predicated region body
PF: predicated region fallthrough
CT: control target
= control target key end

     0   :  { %s2946_s1 = inlined_call_operand.vmem [shape: bf16[128,128], index: 1, kind: input, shape index: {}]   ;;  %s2947_s0 = inlined_call_operand.vmem [shape: bf16[512,128], index: 0, kind: input, shape index: {}]   ;;  %s2948_s3 = inlined_call_operand.vmem [shape: bf16[512,128], index: 3, kind: input, shape index: {}]   ;;  %s2949_s2 = inlined_call_operand.vmem [shape: f32[1,128], index: 2, kind: input, shape index: {}]   ;;  %s2950_s4 = inlined_call_operand.vmem [shape: bf16[512,128], index: 4, kind: output, shape index: {}]  }
   0x1   :  { %v2260_v0 = vld [vmem:[%s2946_s1 + $0x38] sm:$0xff]   ;;  %v2261_v1 = vld [vmem:[%s2946_s1 + $0x30] sm:$0xff]   ;;  %v2262_v2 = vld [vmem:[%s2946_s1 + $0x28] sm:$0xff]  }
   0x2   :  { %2164 = vmatprep.subr.bf16.mxu0 %v2260_v0  ;;  %2244 = vmatprep.subr.bf16.mxu1 %v2260_v0  ;;  %v2263_v3 = vld [vmem:[%s2946_s1 + $0x20] sm:$0xff]   ;;  %v2264_v6 = vld [vmem:[%s2946_s1 + $0x18] sm:$0xff]   ;;  %v2265_v7 = vld [vmem:[%s2946_s1 + $0x10] sm:$0xff]  }
   0x3   :  { %2165 = vmatpush3.bf16.msra.mxu0 %v2260_v0  ;;  %2252 = vmatpush3.bf16.msra.mxu1 %v2260_v0  ;;  %v2268_v4 = vld [vmem:[%s2947_s0] sm:$0xff]   ;;  %v2266_v8 = vld [vmem:[%s2946_s1 + $0x8] sm:$0xff]   ;;  %v2272_v12 = vld [vmem:[%s2947_s0 + $0x10] sm:$0xff]  }
   0x4   :  { %2166 = vmatprep.subr.bf16.mxu0 %v2261_v1  ;;  %2245 = vmatprep.subr.bf16.mxu1 %v2261_v1  ;;  %v2269_v5 = vld [vmem:[%s2947_s0 + $0x80] sm:$0xff]   ;;  %v2270_v10 = vld [vmem:[%s2947_s0 + $0x8] sm:$0xff]   ;;  %v2273_v13 = vld [vmem:[%s2947_s0 + $0x90] sm:$0xff]  }
   0x5   :  { %2180 = vmatprep.mubr.bf16.mxu0 %v2268_v4  ;;  %2212 = vmatprep.mubr.bf16.mxu1 %v2269_v5  ;;  %v2267_v9 = vld [vmem:[%s2946_s1] sm:$0xff]   ;;  %v2271_v11 = vld [vmem:[%s2947_s0 + $0x88] sm:$0xff]   ;;  %v2274_v14 = vld [vmem:[%s2947_s0 + $0x18] sm:$0xff]  }
   0x6   :  { %v2275_v15 = vld [vmem:[%s2947_s0 + $0x98] sm:$0xff]   ;;  %v2276_v16 = vld [vmem:[%s2947_s0 + $0x20] sm:$0xff]   ;;  %v2278_v18 = vld [vmem:[%s2947_s0 + $0x28] sm:$0xff]  }
   0x7   :  { %2167 = vmatpush3.bf16.msra.mxu0 %v2261_v1  ;;  %2253 = vmatpush3.bf16.msra.mxu1 %v2261_v1  ;;  %v2277_v17 = vld [vmem:[%s2947_s0 + $0xa0] sm:$0xff]   ;;  %v2279_v19 = vld [vmem:[%s2947_s0 + $0xa8] sm:$0xff]   ;;  %v2280_v20 = vld [vmem:[%s2947_s0 + $0x30] sm:$0xff]  }
   0x8   :  { %2168 = vmatprep.subr.bf16.mxu0 %v2262_v2  ;;  %2246 = vmatprep.subr.bf16.mxu1 %v2262_v2  ;;  %v2281_v21 = vld [vmem:[%s2947_s0 + $0xb0] sm:$0xff]   ;;  %v2282_v22 = vld [vmem:[%s2947_s0 + $0x38] sm:$0xff]   ;;  %v2284_v24 = vld [vmem:[%s2947_s0 + $0x40] sm:$0xff]  }
   0x9   :  { %v2283_v23 = vld [vmem:[%s2947_s0 + $0xb8] sm:$0xff]   ;;  %v2285_v25 = vld [vmem:[%s2947_s0 + $0xc0] sm:$0xff]   ;;  %v2286_v26 = vld [vmem:[%s2947_s0 + $0x48] sm:$0xff]  }
   0xa   :  { %v2287_v27 = vld [vmem:[%s2947_s0 + $0xc8] sm:$0xff]   ;;  %v2288_v28 = vld [vmem:[%s2947_s0 + $0x50] sm:$0xff]   ;;  %v2290_v30 = vld [vmem:[%s2947_s0 + $0x58] sm:$0xff]  }
   0xb   :  { %2169 = vmatpush3.bf16.msra.mxu0 %v2262_v2  ;;  %2254 = vmatpush3.bf16.msra.mxu1 %v2262_v2  ;;  %v2289_v29 = vld [vmem:[%s2947_s0 + $0xd0] sm:$0xff]   ;;  %v2291_v31 = vld [vmem:[%s2947_s0 + $0xd8] sm:$0xff]   ;;  %v2292_v32 = vld [vmem:[%s2947_s0 + $0x60] sm:$0xff]  }
   0xc   :  { %2170 = vmatprep.subr.bf16.mxu0 %v2263_v3  ;;  %2247 = vmatprep.subr.bf16.mxu1 %v2263_v3  ;;  %v2293_v33 = vld [vmem:[%s2947_s0 + $0xe0] sm:$0xff]   ;;  %v2294_v34 = vld [vmem:[%s2947_s0 + $0x68] sm:$0xff]   ;;  %v2296_v36 = vld [vmem:[%s2947_s0 + $0x70] sm:$0xff]  }
   0xd   :  { %v2295_v35 = vld [vmem:[%s2947_s0 + $0xe8] sm:$0xff]   ;;  %v2297_v37 = vld [vmem:[%s2947_s0 + $0xf0] sm:$0xff]   ;;  %v2298_v38 = vld [vmem:[%s2947_s0 + $0x78] sm:$0xff]  }
   0xe   :  { %v2299_v39 = vld [vmem:[%s2947_s0 + $0xf8] sm:$0xff]   ;;  %v2448_v40 = vld [vmem:[%s2948_s3 + $0x8] sm:$0xff]   ;;  %v2458_v42 = vld [vmem:[%s2948_s3] sm:$0xff]  }
   0xf   :  { %2171 = vmatpush3.bf16.msra.mxu0 %v2263_v3  ;;  %2255 = vmatpush3.bf16.msra.mxu1 %v2263_v3  ;;  %v2453_v41 = vld [vmem:[%s2948_s3 + $0x88] sm:$0xff]   ;;  %v2463_v43 = vld [vmem:[%s2948_s3 + $0x80] sm:$0xff]   ;;  %v2468_v44 = vld [vmem:[%s2948_s3 + $0x18] sm:$0xff]   ;;  %v1780_v48 = vunpack.c.l.bf16 %v2448_v40  ;;  %v1776_v50 = vunpack.c.l.bf16 %v2458_v42  ;;  %v1781_v53 = vunpack.c.h.bf16 %v2448_v40  ;;  %v1777_v55 = vunpack.c.h.bf16 %v2458_v42 }
  0x10   :  { %2172 = vmatprep.subr.bf16.mxu0 %v2264_v6  ;;  %2248 = vmatprep.subr.bf16.mxu1 %v2264_v6  ;;  %v2473_v45 = vld [vmem:[%s2948_s3 + $0x98] sm:$0xff]   ;;  %v2478_v46 = vld [vmem:[%s2948_s3 + $0x10] sm:$0xff]   ;;  %v1844_v49 = vunpack.c.l.bf16 %v2453_v41  ;;  %v1840_v51 = vunpack.c.l.bf16 %v2463_v43  ;;  %v2492_v52 = vld [vmem:[%s2948_s3 + $0x28] sm:$0xff]   ;;  %v1845_v54 = vunpack.c.h.bf16 %v2453_v41  ;;  %v1841_v56 = vunpack.c.h.bf16 %v2463_v43 }
  0x11   :  { %v2483_v47 = vld [vmem:[%s2948_s3 + $0x90] sm:$0xff]   ;;  %v2501_v57 = vld [vmem:[%s2948_s3 + $0xa8] sm:$0xff]   ;;  %v2506_v58 = vld [vmem:[%s2948_s3 + $0x20] sm:$0xff]   ;;  %v1788_v61 = vunpack.c.l.bf16 %v2468_v44  ;;  %v1852_v62 = vunpack.c.l.bf16 %v2473_v45  ;;  %v1784_v63 = vunpack.c.l.bf16 %v2478_v46  ;;  %v1789_v1 = vunpack.c.h.bf16 %v2468_v44 }
  0x12   :  { %v2511_v59 = vld [vmem:[%s2948_s3 + $0xa0] sm:$0xff]   ;;  %v1848_v0 = vunpack.c.l.bf16 %v2483_v47  ;;  %v1853_v2 = vunpack.c.h.bf16 %v2473_v45  ;;  %v1785_v3 = vunpack.c.h.bf16 %v2478_v46  ;;  %v1849_v4 = vunpack.c.h.bf16 %v2483_v47  ;;  %v2529_v5 = vld [vmem:[%s2948_s3 + $0x38] sm:$0xff]   ;;  %v2663_v46 = vld [vmem:[%s2948_s3 + $0x50] sm:$0xff]  }
  0x13   :  { %2173 = vmatpush3.bf16.msra.mxu0 %v2264_v6  ;;  %2256 = vmatpush3.bf16.msra.mxu1 %v2264_v6  ;;  %v2516_v60 = vld [vmem:[%s2949_s2] ss:$0 sm:$0xff]  ;;  %v2534_v6 = vld [vmem:[%s2948_s3 + $0xb8] sm:$0xff]   ;;  %v2668_v47 = vld [vmem:[%s2948_s3 + $0xd0] sm:$0xff]  }
  0x14   :  { %2174 = vmatprep.subr.bf16.mxu0 %v2265_v7  ;;  %2249 = vmatprep.subr.bf16.mxu1 %v2265_v7 }
  0x17   :  { %2175 = vmatpush3.bf16.msra.mxu0 %v2265_v7  ;;  %2257 = vmatpush3.bf16.msra.mxu1 %v2265_v7 }
  0x18   :  { %2176 = vmatprep.subr.bf16.mxu0 %v2266_v8  ;;  %2250 = vmatprep.subr.bf16.mxu1 %v2266_v8 }
  0x1b   :  { %2177 = vmatpush3.bf16.msra.mxu0 %v2266_v8  ;;  %2258 = vmatpush3.bf16.msra.mxu1 %v2266_v8 }
  0x1c   :  { %2178 = vmatprep.subr.bf16.mxu0 %v2267_v9  ;;  %2251 = vmatprep.subr.bf16.mxu1 %v2267_v9 }
  0x1f   :  { %2179 = vmatpush3.bf16.msra.mxu0 %v2267_v9  ;;  %2259 = vmatpush3.bf16.msra.mxu1 %v2267_v9  ;;  %v1796_v9 = vunpack.c.l.bf16 %v2492_v52 }
  0x22   :  { %2181 = vmatmul.mubr.bf16.vlgmr.msra.gmra.mxu0 %v2270_v10  ;;  %2213 = vmatmul.mubr.bf16.vlgmr.msra.gmra.mxu1 %v2271_v11  ;;  %v1860_v10 = vunpack.c.l.bf16 %v2501_v57  ;;  %v1792_v11 = vunpack.c.l.bf16 %v2506_v58 }
  0x23   :  { %2184 = vmatprep.mubr.bf16.mxu0 %v2272_v12  ;;  %2216 = vmatprep.mubr.bf16.mxu1 %v2273_v13  ;;  %v1856_v12 = vunpack.c.l.bf16 %v2511_v59  ;;  %v2543_v13 = vld [vmem:[%s2948_s3 + $0x30] sm:$0xff]  }
  0x2a   :  { %2185 = vmatmul.mubr.bf16.gmra.mxu0 %v2274_v14  ;;  %2217 = vmatmul.mubr.bf16.gmra.mxu1 %v2275_v15  ;;  %v2548_v14 = vld [vmem:[%s2948_s3 + $0xb0] sm:$0xff]  }
  0x2b   :  { %2188 = vmatprep.mubr.bf16.mxu0 %v2276_v16  ;;  %2220 = vmatprep.mubr.bf16.mxu1 %v2277_v17  ;;  %v1797_v17 = vunpack.c.h.bf16 %v2492_v52 }
  0x32   :  { %2189 = vmatmul.mubr.bf16.gmra.mxu0 %v2278_v18  ;;  %2221 = vmatmul.mubr.bf16.gmra.mxu1 %v2279_v19  ;;  %v1861_v18 = vunpack.c.h.bf16 %v2501_v57 }
  0x33   :  { %2192 = vmatprep.mubr.bf16.mxu0 %v2280_v20  ;;  %2224 = vmatprep.mubr.bf16.mxu1 %v2281_v21  ;;  %v1793_v21 = vunpack.c.h.bf16 %v2506_v58 }
  0x3a   :  { %2193 = vmatmul.mubr.bf16.gmra.mxu0 %v2282_v22  ;;  %2225 = vmatmul.mubr.bf16.gmra.mxu1 %v2283_v23  ;;  %v1857_v22 = vunpack.c.h.bf16 %v2511_v59  ;;  %v1804_v23 = vunpack.c.l.bf16 %v2529_v5 }
  0x3b   :  { %2196 = vmatprep.mubr.bf16.mxu0 %v2284_v24  ;;  %2228 = vmatprep.mubr.bf16.mxu1 %v2285_v25  ;;  %v2561_v25 = vld [vmem:[%s2948_s3 + $0x48] sm:$0xff]  }
  0x42   :  { %2197 = vmatmul.mubr.bf16.gmra.mxu0 %v2286_v26  ;;  %2229 = vmatmul.mubr.bf16.gmra.mxu1 %v2287_v27  ;;  %v2566_v26 = vld [vmem:[%s2948_s3 + $0xc8] sm:$0xff]  }
  0x43   :  { %2200 = vmatprep.mubr.bf16.mxu0 %v2288_v28  ;;  %2232 = vmatprep.mubr.bf16.mxu1 %v2289_v29 }
  0x4a   :  { %2201 = vmatmul.mubr.bf16.gmra.mxu0 %v2290_v30  ;;  %2233 = vmatmul.mubr.bf16.gmra.mxu1 %v2291_v31  ;;  %v2575_v31 = vld [vmem:[%s2948_s3 + $0x40] sm:$0xff]  }
  0x4b   :  { %2204 = vmatprep.mubr.bf16.mxu0 %v2292_v32  ;;  %2236 = vmatprep.mubr.bf16.mxu1 %v2293_v33  ;;  %v2580_v32 = vld [vmem:[%s2948_s3 + $0xc0] sm:$0xff]  }
  0x52   :  { %2205 = vmatmul.mubr.bf16.gmra.mxu0 %v2294_v34  ;;  %2237 = vmatmul.mubr.bf16.gmra.mxu1 %v2295_v35 }
  0x53   :  { %2208 = vmatprep.mubr.bf16.mxu0 %v2296_v36  ;;  %2240 = vmatprep.mubr.bf16.mxu1 %v2297_v37 }
  0x5a   :  { %2209 = vmatmul.mubr.bf16.gmra.mxu0 %v2298_v38  ;;  %2241 = vmatmul.mubr.bf16.gmra.mxu1 %v2299_v39  ;;  %v1865_v38 = vunpack.c.h.bf16 %v2548_v14 }
  0xe2   :  { %v2182_v7 = vpop.f32.mrf.mxu0  ;;  %v2214_v8 = vpop.f32.mrf.mxu1 }
  0xe3   :  { %v963_v15 = vadd.f32 %v2182_v7, %v2516_v60  ;;  %v995_v16 = vadd.f32 %v2214_v8, %v2516_v60  ;;  %v1812_v8 = vunpack.c.l.bf16 %v2561_v25 }
  0xe4   :  { %v504_v19 = vpop.f32.mrf.mxu0  ;;  %v632_v20 = vpop.f32.mrf.mxu1 }
  0xe5   :  { %v961_v27 = vadd.f32 %v2516_v60, %v504_v19  ;;  %v993_v28 = vadd.f32 %v2516_v60, %v632_v20  ;;  %v1155_v39 = vadd.f32 %v1780_v48, %v963_v15  ;;  %v1187_v7 = vadd.f32 %v1844_v49, %v995_v16 }
  0xe6   :  { %v2183_v33 = vpop.f32.mrf.mxu0  ;;  %v2215_v34 = vpop.f32.mrf.mxu1 }
  0xe7   :  { %v964_v20 = vadd.f32 %v2183_v33, %v2516_v60  ;;  %v996_v30 = vadd.f32 %v2215_v34, %v2516_v60  ;;  %v1153_v37 = vadd.f32 %v1776_v50, %v961_v27  ;;  %v1185_v48 = vadd.f32 %v1840_v51, %v993_v28 }
  0xe8   :  { %v507_v29 = vpop.f32.mrf.mxu0  ;;  %v635_v24 = vpop.f32.mrf.mxu1  ;;  %v1219_v50 = vmax.f32 %v1155_v39, 0.0  ;;  %v1251_v27 = vmax.f32 %v1187_v7, 0.0 }
  0xe9   :  { %v962_v49 = vadd.f32 %v2516_v60, %v507_v29  ;;  %v994_v15 = vadd.f32 %v2516_v60, %v635_v24  ;;  %v1156_v16 = vadd.f32 %v1781_v53, %v964_v20  ;;  %v1188_v33 = vadd.f32 %v1845_v54, %v996_v30 }
  0xea   :  { %v2186_v34 = vpop.f32.mrf.mxu0  ;;  %v2218_v35 = vpop.f32.mrf.mxu1  ;;  %v1217_v30 = vmax.f32 %v1153_v37, 0.0  ;;  %v1249_v20 = vmax.f32 %v1185_v48, 0.0  ;;  %v2617_v37 = vld [vmem:[%s2948_s3 + $0x58] sm:$0xff]  }
  0xeb   :  { %v1154_v51 = vadd.f32 %v1777_v55, %v962_v49  ;;  %v1186_v24 = vadd.f32 %v1841_v56, %v994_v15  ;;  %v1220_v28 = vmax.f32 %v1156_v16, 0.0  ;;  %v1252_v40 = vmax.f32 %v1188_v33, 0.0  ;;  %v2622_v48 = vld [vmem:[%s2948_s3 + $0xd8] sm:$0xff]  }
  0xec   :  { %v967_v53 = vadd.f32 %v2186_v34, %v2516_v60  ;;  %v999_v41 = vadd.f32 %v2218_v35, %v2516_v60  ;;  %v520_v54 = vpop.f32.mrf.mxu0  ;;  %v648_v29 = vpop.f32.mrf.mxu1  ;;  %v1809_v16 = vunpack.c.h.bf16 %v2575_v31  ;;  %v1873_v35 = vunpack.c.h.bf16 %v2580_v32 }
  0xed   :  { %v1218_v36 = vmax.f32 %v1154_v51, 0.0  ;;  %v1250_v19 = vmax.f32 %v1186_v24, 0.0  ;;  %v1910_v39 = vpack.c.bf16 %v1220_v28, %v1219_v50  ;;  %v1990_v7 = vpack.c.bf16 %v1252_v40, %v1251_v27 }
  0xee   :  { %v965_v42 = vadd.f32 %v2516_v60, %v520_v54  ;;  %v997_v55 = vadd.f32 %v2516_v60, %v648_v29  ;;  %v2187_v43 = vpop.f32.mrf.mxu0  ;;  %v2219_v56 = vpop.f32.mrf.mxu1  ;;  %v1820_v54 = vunpack.c.l.bf16 %v2617_v37  ;;  %v1884_v29 = vunpack.c.l.bf16 %v2622_v48 }
  0xef   :  { %v1905_v49 = vpack.c.bf16 %v1218_v36, %v1217_v30  ;;  %v1985_v15 = vpack.c.bf16 %v1250_v19, %v1249_v20  ;;  %2093 = vst [vmem:[%s2950_s4 + $0x8] sm:$0xff] %v1910_v39   ;;  %2109 = vst [vmem:[%s2950_s4 + $0x88] sm:$0xff] %v1990_v7   ;;  %v1159_v36 = vadd.f32 %v1788_v61, %v967_v53 }
  0xf0   :  { %v1191_v19 = vadd.f32 %v1852_v62, %v999_v41  ;;  %v968_v33 = vadd.f32 %v2187_v43, %v2516_v60  ;;  %v1000_v34 = vadd.f32 %v2219_v56, %v2516_v60  ;;  %v523_v50 = vpop.f32.mrf.mxu0  ;;  %v651_v27 = vpop.f32.mrf.mxu1  ;;  %v1157_v61 = vadd.f32 %v1784_v63, %v965_v42 }
  0xf1   :  { %1906 = vst [vmem:[%s2950_s4] sm:$0xff] %v1905_v49   ;;  %2108 = vst [vmem:[%s2950_s4 + $0x80] sm:$0xff] %v1985_v15   ;;  %v1189_v62 = vadd.f32 %v1848_v0, %v997_v55  ;;  %v966_v51 = vadd.f32 %v2516_v60, %v523_v50  ;;  %v998_v24 = vadd.f32 %v2516_v60, %v651_v27 }
  0xf2   :  { %v1160_v28 = vadd.f32 %v1789_v1, %v968_v33  ;;  %v1192_v40 = vadd.f32 %v1853_v2, %v1000_v34  ;;  %v2190_v53 = vpop.f32.mrf.mxu0  ;;  %v2222_v41 = vpop.f32.mrf.mxu1  ;;  %v1223_v1 = vmax.f32 %v1159_v36, 0.0  ;;  %v1255_v20 = vmax.f32 %v1191_v19, 0.0 }
  0xf3   :  { %v1158_v63 = vadd.f32 %v1785_v3, %v966_v51  ;;  %v1190_v0 = vadd.f32 %v1849_v4, %v998_v24  ;;  %v971_v30 = vadd.f32 %v2190_v53, %v2516_v60  ;;  %v1003_v44 = vadd.f32 %v2222_v41, %v2516_v60 }
  0xf4   :  { %v1224_v45 = vmax.f32 %v1160_v28, 0.0  ;;  %v1256_v2 = vmax.f32 %v1192_v40, 0.0  ;;  %v536_v39 = vpop.f32.mrf.mxu0  ;;  %v664_v7 = vpop.f32.mrf.mxu1  ;;  %v1221_v42 = vmax.f32 %v1157_v61, 0.0  ;;  %v1253_v55 = vmax.f32 %v1189_v62, 0.0 }
  0xf5   :  { %v1222_v43 = vmax.f32 %v1158_v63, 0.0  ;;  %v1254_v56 = vmax.f32 %v1190_v0, 0.0  ;;  %v969_v49 = vadd.f32 %v2516_v60, %v536_v39  ;;  %v1001_v15 = vadd.f32 %v2516_v60, %v664_v7 }
  0xf6   :  { %v1920_v3 = vpack.c.bf16 %v1224_v45, %v1223_v1  ;;  %v2000_v4 = vpack.c.bf16 %v1256_v2, %v1255_v20  ;;  %v2191_v36 = vpop.f32.mrf.mxu0  ;;  %v2223_v19 = vpop.f32.mrf.mxu1  ;;  %v1163_v50 = vadd.f32 %v1796_v9, %v971_v30  ;;  %v1195_v27 = vadd.f32 %v1860_v10, %v1003_v44 }
  0xf7   :  { %v1915_v33 = vpack.c.bf16 %v1222_v43, %v1221_v42  ;;  %v1995_v34 = vpack.c.bf16 %v1254_v56, %v1253_v55  ;;  %v972_v61 = vadd.f32 %v2191_v36, %v2516_v60  ;;  %v1004_v62 = vadd.f32 %v2223_v19, %v2516_v60 }
  0xf8   :  { %2095 = vst [vmem:[%s2950_s4 + $0x18] sm:$0xff] %v1920_v3   ;;  %2111 = vst [vmem:[%s2950_s4 + $0x98] sm:$0xff] %v2000_v4   ;;  %v539_v51 = vpop.f32.mrf.mxu0  ;;  %v667_v24 = vpop.f32.mrf.mxu1  ;;  %v1816_v28 = vunpack.c.l.bf16 %v2663_v46  ;;  %v1880_v9 = vunpack.c.l.bf16 %v2668_v47  ;;  %v1161_v10 = vadd.f32 %v1792_v11, %v969_v49  ;;  %v1193_v40 = vadd.f32 %v1856_v12, %v1001_v15 }
  0xf9   :  { %2094 = vst [vmem:[%s2950_s4 + $0x10] sm:$0xff] %v1915_v33   ;;  %2110 = vst [vmem:[%s2950_s4 + $0x90] sm:$0xff] %v1995_v34   ;;  %v970_v53 = vadd.f32 %v2516_v60, %v539_v51  ;;  %v1002_v41 = vadd.f32 %v2516_v60, %v667_v24  ;;  %v1164_v63 = vadd.f32 %v1797_v17, %v972_v61  ;;  %v1821_v1 = vunpack.c.h.bf16 %v2617_v37  ;;  %v2717_v33 = vld [vmem:[%s2948_s3 + $0x68] sm:$0xff]  }
  0xfa   :  { %v1196_v0 = vadd.f32 %v1861_v18, %v1004_v62  ;;  %v2194_v30 = vpop.f32.mrf.mxu0  ;;  %v2226_v44 = vpop.f32.mrf.mxu1  ;;  %v1885_v20 = vunpack.c.h.bf16 %v2622_v48  ;;  %v1227_v11 = vmax.f32 %v1163_v50, 0.0  ;;  %v1259_v45 = vmax.f32 %v1195_v27, 0.0  ;;  %v2722_v34 = vld [vmem:[%s2948_s3 + $0xe8] sm:$0xff]  }
  0xfb   :  { %v1162_v12 = vadd.f32 %v1793_v21, %v970_v53  ;;  %v1194_v2 = vadd.f32 %v1857_v22, %v1002_v41  ;;  %v1228_v39 = vmax.f32 %v1164_v63, 0.0  ;;  %v975_v17 = vadd.f32 %v2194_v30, %v2516_v60 }
  0xfc   :  { %v1260_v52 = vmax.f32 %v1196_v0, 0.0  ;;  %v1007_v57 = vadd.f32 %v2226_v44, %v2516_v60  ;;  %v552_v18 = vpop.f32.mrf.mxu0  ;;  %v680_v7 = vpop.f32.mrf.mxu1  ;;  %v1225_v42 = vmax.f32 %v1161_v10, 0.0  ;;  %v1257_v55 = vmax.f32 %v1193_v40, 0.0 }
  0xfd   :  { %v1226_v43 = vmax.f32 %v1162_v12, 0.0  ;;  %v1258_v56 = vmax.f32 %v1194_v2, 0.0  ;;  %v1930_v3 = vpack.c.bf16 %v1228_v39, %v1227_v11  ;;  %v973_v58 = vadd.f32 %v2516_v60, %v552_v18 }
  0xfe   :  { %v2010_v4 = vpack.c.bf16 %v1260_v52, %v1259_v45  ;;  %v1005_v21 = vadd.f32 %v2516_v60, %v680_v7  ;;  %v2195_v59 = vpop.f32.mrf.mxu0  ;;  %v2227_v22 = vpop.f32.mrf.mxu1  ;;  %v1817_v36 = vunpack.c.h.bf16 %v2663_v46  ;;  %v1881_v19 = vunpack.c.h.bf16 %v2668_v47  ;;  %v2863_v46 = vld [vmem:[%s2948_s3 + $0x70] sm:$0xff]  }
  0xff   :  { %v1925_v49 = vpack.c.bf16 %v1226_v43, %v1225_v42  ;;  %v2005_v15 = vpack.c.bf16 %v1258_v56, %v1257_v55  ;;  %2097 = vst [vmem:[%s2950_s4 + $0x28] sm:$0xff] %v1930_v3   ;;  %v1167_v50 = vadd.f32 %v1804_v23, %v975_v17  ;;  %v2951_v27 = vunpack.c.l.bf16 %v2534_v6  ;;  %v2868_v47 = vld [vmem:[%s2948_s3 + $0xf0] sm:$0xff]  }
 0x100   :  { %2113 = vst [vmem:[%s2950_s4 + $0xa8] sm:$0xff] %v2010_v4   ;;  %v976_v62 = vadd.f32 %v2195_v59, %v2516_v60  ;;  %v1008_v51 = vadd.f32 %v2227_v22, %v2516_v60  ;;  %v555_v24 = vpop.f32.mrf.mxu0  ;;  %v683_v10 = vpop.f32.mrf.mxu1  ;;  %v2952_v40 = vunpack.c.l.bf16 %v2543_v13  ;;  %v2953_v53 = vunpack.c.l.bf16 %v2548_v14  ;;  %v2768_v14 = vld [vmem:[%s2948_s3 + $0xe0] sm:$0xff]  }
 0x101   :  { %v1199_v61 = vadd.f32 %v2951_v27, %v1007_v57  ;;  %2096 = vst [vmem:[%s2950_s4 + $0x20] sm:$0xff] %v1925_v49   ;;  %2112 = vst [vmem:[%s2950_s4 + $0xa0] sm:$0xff] %v2005_v15   ;;  %v974_v63 = vadd.f32 %v2516_v60, %v555_v24  ;;  %v1006_v0 = vadd.f32 %v2516_v60, %v683_v10  ;;  %v2954_v30 = vunpack.c.h.bf16 %v2529_v5 }
 0x102   :  { %v1165_v23 = vadd.f32 %v2952_v40, %v973_v58  ;;  %v1197_v41 = vadd.f32 %v2953_v53, %v1005_v21  ;;  %v2955_v11 = vunpack.c.h.bf16 %v2534_v6  ;;  %v2198_v12 = vpop.f32.mrf.mxu0  ;;  %v2230_v2 = vpop.f32.mrf.mxu1  ;;  %v1828_v39 = vunpack.c.l.bf16 %v2717_v33 }
 0x103   :  { %v1168_v44 = vadd.f32 %v2954_v30, %v976_v62  ;;  %v1892_v52 = vunpack.c.l.bf16 %v2722_v34  ;;  %v2956_v17 = vunpack.c.h.bf16 %v2543_v13  ;;  %v1198_v18 = vadd.f32 %v1865_v38, %v1006_v0  ;;  %v2763_v13 = vld [vmem:[%s2948_s3 + $0x60] sm:$0xff]  }
 0x104   :  { %v1200_v45 = vadd.f32 %v2955_v11, %v1008_v51  ;;  %v979_v7 = vadd.f32 %v2198_v12, %v2516_v60  ;;  %v1011_v5 = vadd.f32 %v2230_v2, %v2516_v60  ;;  %v1231_v42 = vmax.f32 %v1167_v50, 0.0  ;;  %v568_v56 = vpop.f32.mrf.mxu0  ;;  %v696_v3 = vpop.f32.mrf.mxu1 }
 0x105   :  { %v1166_v57 = vadd.f32 %v2956_v17, %v974_v63  ;;  %v1263_v55 = vmax.f32 %v1199_v61, 0.0  ;;  %v1232_v6 = vmax.f32 %v1168_v44, 0.0  ;;  %v1229_v4 = vmax.f32 %v1165_v23, 0.0 }
 0x106   :  { %v1264_v43 = vmax.f32 %v1200_v45, 0.0  ;;  %v1261_v58 = vmax.f32 %v1197_v41, 0.0  ;;  %v1262_v59 = vmax.f32 %v1198_v18, 0.0  ;;  %v977_v49 = vadd.f32 %v2516_v60, %v568_v56  ;;  %v2199_v50 = vpop.f32.mrf.mxu0  ;;  %v2231_v27 = vpop.f32.mrf.mxu1 }
 0x107   :  { %v1230_v21 = vmax.f32 %v1166_v57, 0.0  ;;  %v1940_v38 = vpack.c.bf16 %v1232_v6, %v1231_v42  ;;  %v1009_v15 = vadd.f32 %v2516_v60, %v696_v3  ;;  %v1171_v51 = vadd.f32 %v1812_v8, %v979_v7 }
 0x108   :  { %v2020_v22 = vpack.c.bf16 %v1264_v43, %v1263_v55  ;;  %v2015_v62 = vpack.c.bf16 %v1262_v59, %v1261_v58  ;;  %v2957_v24 = vunpack.c.l.bf16 %v2566_v26  ;;  %v980_v40 = vadd.f32 %v2199_v50, %v2516_v60  ;;  %v571_v53 = vpop.f32.mrf.mxu0  ;;  %v699_v41 = vpop.f32.mrf.mxu1 }
 0x109   :  { %v1935_v61 = vpack.c.bf16 %v1230_v21, %v1229_v4  ;;  %2099 = vst [vmem:[%s2950_s4 + $0x38] sm:$0xff] %v1940_v38   ;;  %v1012_v23 = vadd.f32 %v2231_v27, %v2516_v60  ;;  %v1824_v63 = vunpack.c.l.bf16 %v2763_v13  ;;  %v1888_v8 = vunpack.c.l.bf16 %v2768_v14 }
 0x10a   :  { %v1203_v10 = vadd.f32 %v2957_v24, %v1011_v5  ;;  %2115 = vst [vmem:[%s2950_s4 + $0xb8] sm:$0xff] %v2020_v22   ;;  %2114 = vst [vmem:[%s2950_s4 + $0xb0] sm:$0xff] %v2015_v62   ;;  %v2958_v0 = vunpack.c.l.bf16 %v2575_v31  ;;  %v2959_v44 = vunpack.c.l.bf16 %v2580_v32  ;;  %v978_v45 = vadd.f32 %v2516_v60, %v571_v53  ;;  %v2202_v7 = vpop.f32.mrf.mxu0  ;;  %v2234_v5 = vpop.f32.mrf.mxu1 }
 0x10b   :  { %2098 = vst [vmem:[%s2950_s4 + $0x30] sm:$0xff] %v1935_v61   ;;  %v1010_v12 = vadd.f32 %v2516_v60, %v699_v41  ;;  %v2960_v2 = vunpack.c.h.bf16 %v2561_v25  ;;  %v2961_v57 = vunpack.c.h.bf16 %v2566_v26  ;;  %v1829_v42 = vunpack.c.h.bf16 %v2717_v33 }
 0x10c   :  { %v1169_v30 = vadd.f32 %v2958_v0, %v977_v49  ;;  %v1201_v11 = vadd.f32 %v2959_v44, %v1009_v15  ;;  %v1893_v55 = vunpack.c.h.bf16 %v2722_v34  ;;  %v1235_v6 = vmax.f32 %v1171_v51, 0.0  ;;  %v584_v21 = vpop.f32.mrf.mxu0  ;;  %v712_v59 = vpop.f32.mrf.mxu1 }
 0x10d   :  { %v1172_v17 = vadd.f32 %v2960_v2, %v980_v40  ;;  %v1204_v18 = vadd.f32 %v2961_v57, %v1012_v23  ;;  %v1267_v43 = vmax.f32 %v1203_v10, 0.0  ;;  %v1170_v56 = vadd.f32 %v1809_v16, %v978_v45  ;;  %v2817_v10 = vld [vmem:[%s2948_s3 + $0x78] sm:$0xff]  }
 0x10e   :  { %v1202_v3 = vadd.f32 %v1873_v35, %v1010_v12  ;;  %v983_v58 = vadd.f32 %v2202_v7, %v2516_v60  ;;  %v1015_v26 = vadd.f32 %v2234_v5, %v2516_v60  ;;  %v1233_v38 = vmax.f32 %v1169_v30, 0.0  ;;  %v2203_v32 = vpop.f32.mrf.mxu0  ;;  %v2235_v35 = vpop.f32.mrf.mxu1  ;;  %v2822_v40 = vld [vmem:[%s2948_s3 + $0xf8] sm:$0xff]  }
 0x10f   :  { %v1236_v4 = vmax.f32 %v1172_v17, 0.0  ;;  %v1268_v25 = vmax.f32 %v1204_v18, 0.0  ;;  %v1265_v22 = vmax.f32 %v1201_v11, 0.0  ;;  %v1234_v49 = vmax.f32 %v1170_v56, 0.0 }
 0x110   :  { %v1266_v15 = vmax.f32 %v1202_v3, 0.0  ;;  %v981_v31 = vadd.f32 %v2516_v60, %v584_v21  ;;  %v1013_v16 = vadd.f32 %v2516_v60, %v712_v59  ;;  %v1825_v51 = vunpack.c.h.bf16 %v2763_v13  ;;  %v587_v30 = vpop.f32.mrf.mxu0  ;;  %v715_v44 = vpop.f32.mrf.mxu1 }
 0x111   :  { %v1950_v50 = vpack.c.bf16 %v1236_v4, %v1235_v6  ;;  %v2030_v27 = vpack.c.bf16 %v1268_v25, %v1267_v43  ;;  %v1945_v61 = vpack.c.bf16 %v1234_v49, %v1233_v38  ;;  %v1889_v24 = vunpack.c.h.bf16 %v2768_v14 }
 0x112   :  { %v2025_v62 = vpack.c.bf16 %v1266_v15, %v1265_v22  ;;  %v1175_v23 = vadd.f32 %v1820_v54, %v983_v58  ;;  %v1207_v53 = vadd.f32 %v1884_v29, %v1015_v26  ;;  %v984_v41 = vadd.f32 %v2203_v32, %v2516_v60  ;;  %v2206_v17 = vpop.f32.mrf.mxu0  ;;  %v2238_v57 = vpop.f32.mrf.mxu1 }
 0x113   :  { %2101 = vst [vmem:[%s2950_s4 + $0x48] sm:$0xff] %v1950_v50   ;;  %2117 = vst [vmem:[%s2950_s4 + $0xc8] sm:$0xff] %v2030_v27   ;;  %v1016_v0 = vadd.f32 %v2235_v35, %v2516_v60  ;;  %v1173_v54 = vadd.f32 %v1816_v28, %v981_v31  ;;  %v1205_v29 = vadd.f32 %v1880_v9, %v1013_v16  ;;  %v1836_v18 = vunpack.c.l.bf16 %v2817_v10 }
 0x114   :  { %2100 = vst [vmem:[%s2950_s4 + $0x40] sm:$0xff] %v1945_v61   ;;  %2116 = vst [vmem:[%s2950_s4 + $0xc0] sm:$0xff] %v2025_v62   ;;  %v982_v11 = vadd.f32 %v2516_v60, %v587_v30  ;;  %v1014_v45 = vadd.f32 %v2516_v60, %v715_v44  ;;  %v1176_v12 = vadd.f32 %v1821_v1, %v984_v41  ;;  %v1900_v7 = vunpack.c.l.bf16 %v2822_v40  ;;  %v600_v43 = vpop.f32.mrf.mxu0  ;;  %v728_v56 = vpop.f32.mrf.mxu1 }
 0x115   :  { %v1208_v2 = vadd.f32 %v1885_v20, %v1016_v0  ;;  %v987_v5 = vadd.f32 %v2206_v17, %v2516_v60  ;;  %v1019_v37 = vadd.f32 %v2238_v57, %v2516_v60  ;;  %v1239_v1 = vmax.f32 %v1175_v23, 0.0 }
 0x116   :  { %v1174_v28 = vadd.f32 %v1817_v36, %v982_v11  ;;  %v1206_v9 = vadd.f32 %v1881_v19, %v1014_v45  ;;  %v1271_v6 = vmax.f32 %v1207_v53, 0.0  ;;  %v1240_v48 = vmax.f32 %v1176_v12, 0.0  ;;  %v2207_v59 = vpop.f32.mrf.mxu0  ;;  %v2239_v38 = vpop.f32.mrf.mxu1 }
 0x117   :  { %v1272_v20 = vmax.f32 %v1208_v2, 0.0  ;;  %v1237_v3 = vmax.f32 %v1173_v54, 0.0  ;;  %v1269_v4 = vmax.f32 %v1205_v29, 0.0  ;;  %v985_v26 = vadd.f32 %v2516_v60, %v600_v43 }
 0x118   :  { %v1238_v25 = vmax.f32 %v1174_v28, 0.0  ;;  %v1270_v58 = vmax.f32 %v1206_v9, 0.0  ;;  %v1960_v36 = vpack.c.bf16 %v1240_v48, %v1239_v1  ;;  %v1017_v21 = vadd.f32 %v2516_v60, %v728_v56  ;;  %v603_v16 = vpop.f32.mrf.mxu0  ;;  %v731_v32 = vpop.f32.mrf.mxu1 }
 0x119   :  { %v2040_v19 = vpack.c.bf16 %v1272_v20, %v1271_v6  ;;  %v1179_v15 = vadd.f32 %v1828_v39, %v987_v5  ;;  %v1211_v50 = vadd.f32 %v1892_v52, %v1019_v37  ;;  %v988_v27 = vadd.f32 %v2207_v59, %v2516_v60 }
 0x11a   :  { %v1955_v22 = vpack.c.bf16 %v1238_v25, %v1237_v3  ;;  %v2035_v49 = vpack.c.bf16 %v1270_v58, %v1269_v4  ;;  %2103 = vst [vmem:[%s2950_s4 + $0x58] sm:$0xff] %v1960_v36   ;;  %v1020_v31 = vadd.f32 %v2239_v38, %v2516_v60  ;;  %v1832_v35 = vunpack.c.l.bf16 %v2863_v46  ;;  %v2210_v0 = vpop.f32.mrf.mxu0  ;;  %v2242_v30 = vpop.f32.mrf.mxu1 }
 0x11b   :  { %2119 = vst [vmem:[%s2950_s4 + $0xd8] sm:$0xff] %v2040_v19   ;;  %v1896_v39 = vunpack.c.l.bf16 %v2868_v47  ;;  %v1177_v52 = vadd.f32 %v1824_v63, %v985_v26  ;;  %v1209_v61 = vadd.f32 %v1888_v8, %v1017_v21  ;;  %v986_v62 = vadd.f32 %v2516_v60, %v603_v16 }
 0x11c   :  { %2102 = vst [vmem:[%s2950_s4 + $0x50] sm:$0xff] %v1955_v22   ;;  %2118 = vst [vmem:[%s2950_s4 + $0xd0] sm:$0xff] %v2035_v49   ;;  %v1018_v23 = vadd.f32 %v2516_v60, %v731_v32  ;;  %v1180_v53 = vadd.f32 %v1829_v42, %v988_v27  ;;  %v1212_v41 = vadd.f32 %v1893_v55, %v1020_v31  ;;  %v1837_v44 = vunpack.c.h.bf16 %v2817_v10  ;;  %v616_v55 = vpop.f32.mrf.mxu0  ;;  %v744_v12 = vpop.f32.mrf.mxu1 }
 0x11d   :  { %v1901_v54 = vunpack.c.h.bf16 %v2822_v40  ;;  %v1243_v63 = vmax.f32 %v1179_v15, 0.0  ;;  %v1275_v29 = vmax.f32 %v1211_v50, 0.0  ;;  %v1178_v8 = vadd.f32 %v1825_v51, %v986_v62 }
 0x11e   :  { %v1210_v11 = vadd.f32 %v1889_v24, %v1018_v23  ;;  %v1244_v45 = vmax.f32 %v1180_v53, 0.0  ;;  %v1276_v33 = vmax.f32 %v1212_v41, 0.0  ;;  %v991_v42 = vadd.f32 %v2210_v0, %v2516_v60  ;;  %v2211_v14 = vpop.f32.mrf.mxu0  ;;  %v2243_v24 = vpop.f32.mrf.mxu1 }
 0x11f   :  { %v1023_v34 = vadd.f32 %v2242_v30, %v2516_v60  ;;  %v1241_v2 = vmax.f32 %v1177_v52, 0.0  ;;  %v1273_v17 = vmax.f32 %v1209_v61, 0.0  ;;  %v1242_v57 = vmax.f32 %v1178_v8, 0.0 }
 0x120   :  { %v1274_v28 = vmax.f32 %v1210_v11, 0.0  ;;  %v1970_v9 = vpack.c.bf16 %v1244_v45, %v1243_v63  ;;  %v2050_v5 = vpack.c.bf16 %v1276_v33, %v1275_v29  ;;  %v989_v13 = vadd.f32 %v2516_v60, %v616_v55  ;;  %v619_v4 = vpop.f32.mrf.mxu0  ;;  %v747_v25 = vpop.f32.mrf.mxu1 }
 0x121   :  { %v1021_v51 = vadd.f32 %v2516_v60, %v744_v12  ;;  %v1965_v37 = vpack.c.bf16 %v1242_v57, %v1241_v2  ;;  %v1833_v6 = vunpack.c.h.bf16 %v2863_v46  ;;  %v1897_v48 = vunpack.c.h.bf16 %v2868_v47 }
 0x122   :  { %v2045_v1 = vpack.c.bf16 %v1274_v28, %v1273_v17  ;;  %2105 = vst [vmem:[%s2950_s4 + $0x68] sm:$0xff] %v1970_v9   ;;  %2121 = vst [vmem:[%s2950_s4 + $0xe8] sm:$0xff] %v2050_v5   ;;  %v1183_v20 = vadd.f32 %v1836_v18, %v991_v42  ;;  %v1215_v43 = vadd.f32 %v1900_v7, %v1023_v34 }
 0x123   :  { %v992_v56 = vadd.f32 %v2211_v14, %v2516_v60  ;;  %v1024_v3 = vadd.f32 %v2243_v24, %v2516_v60  ;;  %2104 = vst [vmem:[%s2950_s4 + $0x60] sm:$0xff] %v1965_v37   ;;  %v1181_v58 = vadd.f32 %v1832_v35, %v989_v13  ;;  %v1213_v10 = vadd.f32 %v1896_v39, %v1021_v51 }
 0x124   :  { %2120 = vst [vmem:[%s2950_s4 + $0xe0] sm:$0xff] %v2045_v1   ;;  %v990_v18 = vadd.f32 %v2516_v60, %v619_v4  ;;  %v1022_v40 = vadd.f32 %v2516_v60, %v747_v25  ;;  %v1247_v19 = vmax.f32 %v1183_v20, 0.0  ;;  %v1279_v26 = vmax.f32 %v1215_v43, 0.0 }
 0x125   :  { %v1184_v7 = vadd.f32 %v1837_v44, %v992_v56  ;;  %v1216_v46 = vadd.f32 %v1901_v54, %v1024_v3  ;;  %v1245_v38 = vmax.f32 %v1181_v58, 0.0  ;;  %v1277_v22 = vmax.f32 %v1213_v10, 0.0 }
 0x126   :  { %v1182_v47 = vadd.f32 %v1833_v6, %v990_v18  ;;  %v1214_v36 = vadd.f32 %v1897_v48, %v1022_v40 }
 0x127   :  { %v1248_v21 = vmax.f32 %v1184_v7, 0.0  ;;  %v1280_v59 = vmax.f32 %v1216_v46, 0.0 }
 0x128   :  { %v1246_v49 = vmax.f32 %v1182_v47, 0.0  ;;  %v1278_v15 = vmax.f32 %v1214_v36, 0.0 }
 0x129   :  { %v1980_v50 = vpack.c.bf16 %v1248_v21, %v1247_v19  ;;  %v2060_v27 = vpack.c.bf16 %v1280_v59, %v1279_v26 }
 0x12a   :  { %v1975_v31 = vpack.c.bf16 %v1246_v49, %v1245_v38  ;;  %v2055_v16 = vpack.c.bf16 %v1278_v15, %v1277_v22 }
 0x12b   :  { %2107 = vst [vmem:[%s2950_s4 + $0x78] sm:$0xff] %v1980_v50   ;;  %2123 = vst [vmem:[%s2950_s4 + $0xf8] sm:$0xff] %v2060_v27  }
 0x12c   :  { %2106 = vst [vmem:[%s2950_s4 + $0x70] sm:$0xff] %v1975_v31   ;;  %2122 = vst [vmem:[%s2950_s4 + $0xf0] sm:$0xff] %v2055_v16  }

// kernel: bottleneck_forward.5
= control target key start
LH: loop header
LB: loop body
LE: loop exit
PB: predicated region body
PF: predicated region fallthrough
CT: control target
= control target key end

     0   :  { %s7943_s12 = smov 0   ;;  %s7945_s13 = smov 0   ;;  %s9761_s0 = inlined_call_operand.vmem [shape: bf16[2,18,18,128], index: 0, kind: input, shape index: {}]   ;;  %s9762_s1 = inlined_call_operand.vmem [shape: bf16[3,3,128,128], index: 1, kind: input, shape index: {}]   ;;  %s9763_s2 = inlined_call_operand.vmem [shape: f32[1,128], index: 2, kind: input, shape index: {}]   ;;  %s9764_s3 = inlined_call_operand.vmem [shape: bf16[2,16,16,128], index: 3, kind: output, shape index: {}]  }
   0x1   :  { %s7947_s14 = smov 0  }
   0x2 LB: > { %s32_s15 = sadd.s32 1, %s7917_s13  ;;  %p6275_p0 = scmp.ge.s32.totalorder %s7921_s14, 1  ;;  %s7921_s14 = sphi %s7947_s14, %s13_s14   ;;  %s7917_s13 = sphi %s7945_s13, %s9845_s13   ;;  %s7913_s12 = sphi %s7943_s12, %s9844_s12  }
   0x3   : > { %p34_p1 = scmp.ge.s32.totalorder %s32_s15, 2  ;;  %p187_p2 = scmp.lt.s32.totalorder %s7921_s14, 3 }
   0x5   : > { %s9847_s15 = smov (%p34_p1, %s32_s15), 0  ;;  %p188_p3 = pnand %p6275_p0, %p187_p2 }
   0x7   : > { %191 = sbr.rel (%p188_p3) target bundleno = 595 (0x253), region = 32 }
   0xc   : > { %v7779_v0 = vld [vmem:[%s9762_s1 + $0x38] sm:$0xff]   ;;  %p228_p4 = scmp.lt.s32.totalorder %s7913_s12, 1  ;;  %v7780_v1 = vld [vmem:[%s9762_s1 + $0x30] sm:$0xff]   ;;  %v7781_v2 = vld [vmem:[%s9762_s1 + $0x28] sm:$0xff]   ;;  %vm1691_vm0 = vcmask 1042432   ;;  %vm1692_vm1 = vcmask 1046532  }
   0xd   : > { %7306 = vmatprep.subr.bf16.mxu0 %v7779_v0  ;;  %7738 = vmatprep.subr.bf16.mxu1 %v7779_v0  ;;  %v7782_v3 = vld [vmem:[%s9762_s1 + $0x20] sm:$0xff]   ;;  %v7783_v6 = vld [vmem:[%s9762_s1 + $0x18] sm:$0xff]   ;;  %v7784_v7 = vld [vmem:[%s9762_s1 + $0x10] sm:$0xff]   ;;  %vm822_vm2 = vsmask.f32 3328 }
   0xe   : > { %s9849_s12 = smov (!%p228_p4, %s7913_s12), 1  ;;  %7307 = vmatpush3.bf16.msra.mxu0 %v7779_v0  ;;  %7746 = vmatpush3.bf16.msra.mxu1 %v7779_v0  ;;  %v7785_v8 = vld [vmem:[%s9762_s1 + $0x8] sm:$0xff]   ;;  %v7786_v9 = vld [vmem:[%s9762_s1] sm:$0xff]   ;;  %v7791_v10 = vld [vmem:[%s9762_s1 + $0x78] sm:$0xff]   ;;  %vm823_vm3 = vsmask.f32 7440 }
   0xf   : > { %7308 = vmatprep.subr.bf16.mxu0 %v7780_v1  ;;  %7739 = vmatprep.subr.bf16.mxu1 %v7780_v1  ;;  %s7754_s22 = smul.u32 216, %s9849_s12  ;;  %v7792_v12 = vld [vmem:[%s9762_s1 + $0xb8] sm:$0xff]   ;;  %v7793_v14 = vld [vmem:[%s9762_s1 + $0x70] sm:$0xff]   ;;  %v7799_v18 = vld [vmem:[%s9762_s1 + $0x68] sm:$0xff]   ;;  %s6962_s6 = sshll.u32 %s9849_s12, 7 }
  0x10   : > { %v7794_v15 = vld [vmem:[%s9762_s1 + $0xb0] sm:$0xff]   ;;  %v7800_v20 = vld [vmem:[%s9762_s1 + $0xa8] sm:$0xff]   ;;  %v7801_v22 = vld [vmem:[%s9762_s1 + $0x60] sm:$0xff]   ;;  %s9678_s12 = scalar_lea.vmem %s9764_s3, %s6962_s6 }
  0x11   : > { %s7976_s25 = scalar_lea.vmem %s9761_s0, %s7754_s22  ;;  %v7802_v23 = vld [vmem:[%s9762_s1 + $0xa0] sm:$0xff]   ;;  %v8033_v31 = vld [vmem:[%s9762_s1 + $0x58] sm:$0xff]   ;;  %vm8047_vm4 = vmor %vm1691_vm0, %vm1692_vm1 }
  0x12   : > { %7309 = vmatpush3.bf16.msra.mxu0 %v7780_v1  ;;  %7747 = vmatpush3.bf16.msra.mxu1 %v7780_v1  ;;  %v7787_v4 = vld [vmem:[%s7976_s25] sm:$0xff]   ;;  %v7789_v11 = vld [vmem:[%s7976_s25 + $0xc] sm:$0xff]   ;;  %v7795_v16 = vld [vmem:[%s7976_s25 + $0x18] sm:$0xff]  }
  0x13   : > { %7310 = vmatprep.subr.bf16.mxu0 %v7781_v2  ;;  %7740 = vmatprep.subr.bf16.mxu1 %v7781_v2  ;;  %v7788_v5 = vld [vmem:[%s7976_s25 + $0x60] sm:$0xff]   ;;  %v7790_v13 = vld [vmem:[%s7976_s25 + $0x6c] sm:$0xff]   ;;  %v7796_v17 = vld [vmem:[%s7976_s25 + $0x78] sm:$0xff]  }
  0x14   : > { %7322 = vmatprep.mubr.bf16.mxu0 %v7787_v4  ;;  %7338 = vmatprep.mubr.bf16.mxu1 %v7788_v5  ;;  %v7797_v19 = vld [vmem:[%s7976_s25 + $0x24] sm:$0xff]   ;;  %v7803_v24 = vld [vmem:[%s7976_s25 + $0x30] sm:$0xff]   ;;  %v742_v26 = vld [vmem:[%s7976_s25] sm:$0xf] }
  0x15   : > { %v7798_v21 = vld [vmem:[%s7976_s25 + $0x84] sm:$0xff]   ;;  %v7804_v25 = vld [vmem:[%s7976_s25 + $0x90] sm:$0xff]   ;;  %v826_v29 = vshrl.u32 %v742_v26, 16  ;;  %v829_v30 = vshll.u32 %v742_v26, 16  ;;  %v8038_v32 = vld [vmem:[%s9762_s1 + $0x98] sm:$0xff]  }
  0x16   : > { %7311 = vmatpush3.bf16.msra.mxu0 %v7781_v2  ;;  %7748 = vmatpush3.bf16.msra.mxu1 %v7781_v2  ;;  %v743_v27 = vld [vmem:[%s7976_s25 + $0x4] sm:$0xf]  ;;  %v744_v28 = vld [vmem:[%s7976_s25 + $0x8] sm:$0x1]  ;;  %v1563_v36 = vld [vmem:[%s7976_s25] sm:$0xe] }
  0x17   : > { %7312 = vmatprep.subr.bf16.mxu0 %v7782_v3  ;;  %7741 = vmatprep.subr.bf16.mxu1 %v7782_v3  ;;  %v835_v33 = vshll.u32 %v743_v27, 16  ;;  %v839_v34 = vshrl.u32 %v743_v27, 16  ;;  %v845_v35 = vshll.u32 %v744_v28, 16  ;;  %v828_v37 = vrot.slane %v826_v29, 4  ;;  %v1564_v39 = vld [vmem:[%s7976_s25 + $0x4] sm:$0xf]  ;;  %vm8066_vm5 = vmor %vm822_vm2, %vm823_vm3 }
  0x18   : > { %v831_v38 = vrot.slane %v829_v30, 5  ;;  %v1565_v40 = vld [vmem:[%s7976_s25 + $0x8] sm:$0x1]  ;;  %v7805_v41 = vld [vmem:[%s7976_s25 + $0x3c] sm:$0xff]   ;;  %v6343_v47 = vrot.slane %v1563_v36, 9  ;;  %v1696_v50 = vrot.slane %v1564_v39, 5 }
  0x19   : > { %v7806_v42 = vld [vmem:[%s7976_s25 + $0x9c] sm:$0xff]   ;;  %v837_v43 = vrot.slane %v835_v33, 5  ;;  %v841_v44 = vrot.slane %v839_v34, 4  ;;  %v847_v45 = vrot.slane %v845_v35, 5  ;;  %v745_v48 = vld [vmem:[%s7976_s25 + $0xc] sm:$0xf] }
  0x1a   : > { %7313 = vmatpush3.bf16.msra.mxu0 %v7782_v3  ;;  %7749 = vmatpush3.bf16.msra.mxu1 %v7782_v3  ;;  %v832_v49 = vor.u32 %v831_v38, %v828_v37  ;;  %v1699_v51 = vrot.slane %v1565_v40, 5  ;;  %v746_v52 = vld [vmem:[%s7976_s25 + $0x10] sm:$0xf]  ;;  %v747_v53 = vld [vmem:[%s7976_s25 + $0x14] sm:$0x1]  ;;  %v850_v58 = vshrl.u32 %v745_v48, 16  ;;  %v8075_v1 = vsel %vm8047_vm4, %v6343_v47, %v1696_v50 }
  0x1b   : > { %7314 = vmatprep.subr.bf16.mxu0 %v7783_v6  ;;  %7742 = vmatprep.subr.bf16.mxu1 %v7783_v6  ;;  %v8057_v54 = vld [vmem:[%s9762_s1 + $0x50] sm:$0xff]   ;;  %v842_v57 = vor.u32 %v841_v44, %v837_v43  ;;  %v853_v59 = vshll.u32 %v745_v48, 16  ;;  %v859_v60 = vshll.u32 %v746_v52, 16  ;;  %v1566_v61 = vld [vmem:[%s7976_s25 + $0xc] sm:$0xe]  ;;  %v1698_v2 = vrot.slane %v1696_v50, 4 }
  0x1c   : > { %v8062_v55 = vld [vmem:[%s9762_s1 + $0x90] sm:$0xff]   ;;  %v7811_v62 = vld [vmem:[%s7976_s25 + $0x48] sm:$0xff]   ;;  %v833_v0 = vrot.slane %v832_v49, 4  ;;  %v863_v3 = vshrl.u32 %v746_v52, 16  ;;  %v750_v29 = vld [vmem:[%s7976_s25 + $0x20] sm:$0x1] }
  0x1d   : > { %v7812_v63 = vld [vmem:[%s7976_s25 + $0xa8] sm:$0xff]   ;;  %v1567_v4 = vld [vmem:[%s7976_s25 + $0x10] sm:$0xf]  ;;  %v843_v5 = vrot.slane %v842_v57, 4  ;;  %v7813_v26 = vld [vmem:[%s7976_s25 + $0x54] sm:$0xff]   ;;  %v893_v48 = vshll.u32 %v750_v29, 16 }
  0x1e   : > { %7315 = vmatpush3.bf16.msra.mxu0 %v7783_v6  ;;  %7750 = vmatpush3.bf16.msra.mxu1 %v7783_v6  ;;  %v852_v6 = vrot.slane %v850_v58, 4  ;;  %v1569_v37 = vld [vmem:[%s7976_s25 + $0x18] sm:$0xe]  ;;  %v7817_v38 = vld [vmem:[%s9762_s1 + $0x40] sm:$0xff]   ;;  %v752_v57 = vld [vmem:[%s7976_s25 + $0x28] sm:$0xf] }
  0x1f   : > { %7316 = vmatprep.subr.bf16.mxu0 %v7784_v7  ;;  %7743 = vmatprep.subr.bf16.mxu1 %v7784_v7  ;;  %v1571_v49 = vld [vmem:[%s7976_s25 + $0x20] sm:$0x1]  ;;  %v751_v50 = vld [vmem:[%s7976_s25 + $0x24] sm:$0xf]  ;;  %v753_v58 = vld [vmem:[%s7976_s25 + $0x2c] sm:$0x1] }
  0x20   : > { %v754_v29 = vld [vmem:[%s7976_s25 + $0x30] sm:$0xf] }
  0x22   : > { %7317 = vmatpush3.bf16.msra.mxu0 %v7784_v7  ;;  %7751 = vmatpush3.bf16.msra.mxu1 %v7784_v7  ;;  %v855_v7 = vrot.slane %v853_v59, 5  ;;  %v895_v59 = vrot.slane %v893_v48, 5 }
  0x23   : > { %7318 = vmatprep.subr.bf16.mxu0 %v7785_v8  ;;  %7744 = vmatprep.subr.bf16.mxu1 %v7785_v8 }
  0x26   : > { %7319 = vmatpush3.bf16.msra.mxu0 %v7785_v8  ;;  %7752 = vmatpush3.bf16.msra.mxu1 %v7785_v8  ;;  %v861_v8 = vrot.slane %v859_v60, 5  ;;  %v6345_v60 = vrot.slane %v1569_v37, 9 }
  0x27   : > { %7320 = vmatprep.subr.bf16.mxu0 %v7786_v9  ;;  %7745 = vmatprep.subr.bf16.mxu1 %v7786_v9 }
  0x2a   : > { %7321 = vmatpush3.bf16.msra.mxu0 %v7786_v9  ;;  %7753 = vmatpush3.bf16.msra.mxu1 %v7786_v9  ;;  %v1568_v9 = vld [vmem:[%s7976_s25 + $0x14] sm:$0x1] }
  0x2b   : > { %7354 = vmatprep.subr.bf16.mxu1 %v7791_v10  ;;  %7402 = vmatprep.subr.bf16.mxu0 %v7792_v12  ;;  %v1706_v28 = vrot.slane %v1568_v9, 5  ;;  %v907_v9 = vshll.u32 %v752_v57, 16 }
  0x2d   : > { %7323 = vmatmul.mubr.bf16.vlgmr.msra.gmra.mxu0 %v7789_v11  ;;  %7339 = vmatmul.mubr.bf16.vlgmr.msra.gmra.mxu1 %v7790_v13  ;;  %v8085_v11 = vsel %vm8047_vm4, %v1698_v2, %v1699_v51  ;;  %v869_v13 = vshll.u32 %v747_v53, 16  ;;  %v7818_v51 = vld [vmem:[%s9762_s1 + $0x80] sm:$0xff]  }
  0x2e   : > { %7355 = vmatpush3.bf16.msra.mxu1 %v7791_v10  ;;  %7403 = vmatpush3.bf16.msra.mxu0 %v7792_v12  ;;  %v838_v10 = vsel %vm8066_vm5, %v833_v0, %v837_v43  ;;  %v865_v12 = vrot.slane %v863_v3, 4  ;;  %v1570_v43 = vld [vmem:[%s7976_s25 + $0x1c] sm:$0xf]  ;;  %v898_v3 = vshrl.u32 %v751_v50, 16 }
  0x2f   : > { %7356 = vmatprep.subr.bf16.mxu1 %v7793_v14  ;;  %7404 = vmatprep.subr.bf16.mxu0 %v7794_v15 }
  0x30   : > { %7326 = vmatprep.mubr.bf16.mxu0 %v7795_v16  ;;  %7342 = vmatprep.mubr.bf16.mxu1 %v7796_v17  ;;  %v848_v16 = vsel %vm8066_vm5, %v843_v5, %v847_v45  ;;  %v6375_v17 = vcombine.low %v8075_v1, %v8085_v11  ;;  %v1573_v5 = vld [vmem:[%s7976_s25 + $0x28] sm:$0xf] }
  0x32   : > { %7357 = vmatpush3.bf16.msra.mxu1 %v7793_v14  ;;  %7405 = vmatpush3.bf16.msra.mxu0 %v7794_v15  ;;  %v8090_v14 = vld [vmem:[%s9762_s1 + $0x48] sm:$0xff]  }
  0x33   : > { %7358 = vmatprep.subr.bf16.mxu1 %v7799_v18  ;;  %7406 = vmatprep.subr.bf16.mxu0 %v7800_v20  ;;  %v8095_v15 = vld [vmem:[%s9762_s1 + $0x88] sm:$0xff]  }
  0x35   : > { %7327 = vmatmul.mubr.bf16.gmra.mxu0 %v7797_v19  ;;  %7343 = vmatmul.mubr.bf16.gmra.mxu1 %v7798_v21  ;;  %v6344_v19 = vrot.slane %v1566_v61, 9  ;;  %v866_v21 = vor.u32 %v865_v12, %v861_v8  ;;  %v1710_v61 = vrot.slane %v1570_v43, 5  ;;  %v1574_v12 = vld [vmem:[%s7976_s25 + $0x2c] sm:$0x1] }
  0x36   : > { %7359 = vmatpush3.bf16.msra.mxu1 %v7799_v18  ;;  %7407 = vmatpush3.bf16.msra.mxu0 %v7800_v20  ;;  %v856_v18 = vor.u32 %v855_v7, %v852_v6  ;;  %v8103_v20 = vcombine.low %v838_v10, %v848_v16  ;;  %v7819_v6 = vld [vmem:[%s9762_s1 + $0xf8] sm:$0xff]   ;;  %v911_v10 = vshrl.u32 %v752_v57, 16  ;;  %v900_v16 = vrot.slane %v898_v3, 4 }
  0x37   : > { %7360 = vmatprep.subr.bf16.mxu1 %v7801_v22  ;;  %7408 = vmatprep.subr.bf16.mxu0 %v7802_v23  ;;  %v867_v33 = vrot.slane %v866_v21, 4  ;;  %v1711_v7 = vsel %vm8047_vm4, %v6345_v60, %v1710_v61  ;;  %v909_v21 = vrot.slane %v907_v9, 5  ;;  %v758_v60 = vld [vmem:[%s7976_s25 + $0x40] sm:$0xf] }
  0x38   : > { %7330 = vmatprep.mubr.bf16.mxu0 %v7803_v24  ;;  %7346 = vmatprep.mubr.bf16.mxu1 %v7804_v25  ;;  %v748_v24 = vld [vmem:[%s7976_s25 + $0x18] sm:$0xf]  ;;  %v749_v25 = vld [vmem:[%s7976_s25 + $0x1c] sm:$0xf]  ;;  %v857_v27 = vrot.slane %v856_v18, 4 }
  0x39   : > { %v874_v30 = vshrl.u32 %v748_v24, 16  ;;  %v883_v36 = vshll.u32 %v749_v25, 16  ;;  %v1579_v9 = vld [vmem:[%s7976_s25 + $0x40] sm:$0xf] }
  0x3a   : > { %7361 = vmatpush3.bf16.msra.mxu1 %v7801_v22  ;;  %7409 = vmatpush3.bf16.msra.mxu0 %v7802_v23  ;;  %v871_v22 = vrot.slane %v869_v13, 5  ;;  %v1703_v23 = vrot.slane %v1567_v4, 5  ;;  %v862_v39 = vsel %vm8066_vm5, %v857_v27, %v861_v8  ;;  %v901_v4 = vshll.u32 %v751_v50, 16  ;;  %v7820_v13 = vld [vmem:[%s9762_s1 + $0x138] sm:$0xff]   ;;  %v7823_v50 = vld [vmem:[%s9762_s1 + $0xe8] sm:$0xff]  }
  0x3b   : > { %7362 = vmatprep.subr.bf16.mxu1 %v8033_v31  ;;  %7410 = vmatprep.subr.bf16.mxu0 %v8038_v32  ;;  %v876_v40 = vrot.slane %v874_v30, 4  ;;  %v885_v47 = vrot.slane %v883_v36, 5  ;;  %v1712_v8 = vrot.slane %v1710_v61, 4  ;;  %v755_v30 = vld [vmem:[%s7976_s25 + $0x34] sm:$0xf]  ;;  %v925_v36 = vshll.u32 %v754_v29, 16 }
  0x3c   : > { %v8114_v34 = vsel %vm8047_vm4, %v6344_v19, %v1703_v23  ;;  %v1705_v35 = vrot.slane %v1703_v23, 4  ;;  %v872_v44 = vsel %vm8066_vm5, %v867_v33, %v871_v22  ;;  %v903_v18 = vrot.slane %v901_v4, 5  ;;  %v756_v33 = vld [vmem:[%s7976_s25 + $0x38] sm:$0x1]  ;;  %v759_v61 = vld [vmem:[%s7976_s25 + $0x44] sm:$0x1] }
  0x3d   : > { %7331 = vmatmul.mubr.bf16.gmra.mxu0 %v7805_v41  ;;  %7347 = vmatmul.mubr.bf16.gmra.mxu1 %v7806_v42  ;;  %v887_v42 = vshrl.u32 %v749_v25, 16  ;;  %v8138_v52 = vcombine.low %v862_v39, %v872_v44  ;;  %v913_v22 = vrot.slane %v911_v10, 4  ;;  %v917_v23 = vshll.u32 %v753_v58, 16  ;;  %v1578_v4 = vld [vmem:[%s7976_s25 + $0x3c] sm:$0xe] }
  0x3e   : > { %7363 = vmatpush3.bf16.msra.mxu1 %v8033_v31  ;;  %7411 = vmatpush3.bf16.msra.mxu0 %v8038_v32  ;;  %v877_v31 = vshll.u32 %v748_v24, 16  ;;  %v7814_v32 = vld [vmem:[%s7976_s25 + $0xb4] sm:$0xff]   ;;  %v8129_v45 = vsel %vm8047_vm4, %v1705_v35, %v1706_v28  ;;  %v922_v35 = vshrl.u32 %v754_v29, 16  ;;  %v935_v48 = vshrl.u32 %v755_v30, 16 }
  0x3f   : > { %7364 = vmatprep.subr.bf16.mxu1 %v8057_v54  ;;  %7412 = vmatprep.subr.bf16.mxu0 %v8062_v55  ;;  %v6376_v53 = vcombine.low %v8114_v34, %v8129_v45  ;;  %v914_v1 = vor.u32 %v913_v22, %v909_v21  ;;  %v919_v11 = vrot.slane %v917_v23, 5  ;;  %v7821_v28 = vld [vmem:[%s9762_s1 + $0xf0] sm:$0xff]   ;;  %v7825_v22 = vld [vmem:[%s9762_s1 + $0xe0] sm:$0xff]   ;;  %v8225_v29 = vld [vmem:[%s9762_s1 + $0x118] sm:$0xff]  }
  0x40   : > { %7334 = vmatprep.mubr.bf16.mxu0 %v7811_v62  ;;  %7350 = vmatprep.mubr.bf16.mxu1 %v7812_v63  ;;  %v879_v41 = vrot.slane %v877_v31, 5  ;;  %v1713_v62 = vrot.slane %v1571_v49, 5  ;;  %v1572_v63 = vld [vmem:[%s7976_s25 + $0x24] sm:$0xe]  ;;  %v924_v44 = vrot.slane %v922_v35, 4 }
  0x41   : > { %v6346_v27 = vrot.slane %v1572_v63, 9  ;;  %v915_v37 = vrot.slane %v914_v1, 4  ;;  %v1576_v49 = vld [vmem:[%s7976_s25 + $0x34] sm:$0xf]  ;;  %v760_v35 = vld [vmem:[%s7976_s25 + $0x48] sm:$0xf] }
  0x42   : > { %7365 = vmatpush3.bf16.msra.mxu1 %v8057_v54  ;;  %7413 = vmatpush3.bf16.msra.mxu0 %v8062_v55  ;;  %v880_v54 = vor.u32 %v879_v41, %v876_v40  ;;  %v889_v55 = vrot.slane %v887_v42, 4  ;;  %v1714_v19 = vsel %vm8047_vm4, %v1712_v8, %v1713_v62  ;;  %v7822_v40 = vld [vmem:[%s9762_s1 + $0x130] sm:$0xff]   ;;  %v931_v41 = vshll.u32 %v755_v30, 16  ;;  %v7824_v62 = vld [vmem:[%s9762_s1 + $0x128] sm:$0xff]  }
  0x43   : > { %7366 = vmatprep.subr.bf16.mxu1 %v8090_v14  ;;  %7414 = vmatprep.subr.bf16.mxu0 %v8095_v15  ;;  %v6377_v25 = vcombine.low %v1711_v7, %v1714_v19  ;;  %v1575_v42 = vld [vmem:[%s7976_s25 + $0x30] sm:$0xe] }
  0x44   : > { %v881_v0 = vrot.slane %v880_v54, 4  ;;  %v890_v2 = vor.u32 %v889_v55, %v885_v47  ;;  %v933_v45 = vrot.slane %v931_v41, 5  ;;  %v757_v54 = vld [vmem:[%s7976_s25 + $0x3c] sm:$0xf]  ;;  %v973_v41 = vshll.u32 %v760_v35, 16 }
  0x45   : > { %7335 = vmatmul.mubr.bf16.gmra.mxu0 %v7813_v26  ;;  %7351 = vmatmul.mubr.bf16.gmra.mxu1 %v7814_v32  ;;  %v904_v26 = vor.u32 %v903_v18, %v900_v16  ;;  %v1720_v32 = vrot.slane %v1574_v12, 5  ;;  %v946_v7 = vshrl.u32 %v757_v54, 16  ;;  %v949_v8 = vshll.u32 %v757_v54, 16 }
  0x46   : > { %7367 = vmatpush3.bf16.msra.mxu1 %v8090_v14  ;;  %7415 = vmatpush3.bf16.msra.mxu0 %v8095_v15  ;;  %v886_v14 = vsel %vm8066_vm5, %v881_v0, %v885_v47  ;;  %v891_v15 = vrot.slane %v890_v2, 4  ;;  %v927_v47 = vrot.slane %v925_v36, 5  ;;  %v6347_v0 = vrot.slane %v1575_v42, 9  ;;  %v761_v36 = vld [vmem:[%s7976_s25 + $0x4c] sm:$0xf] }
  0x47   : > { %7368 = vmatprep.subr.bf16.mxu1 %v7817_v38  ;;  %7416 = vmatprep.subr.bf16.mxu0 %v7818_v51  ;;  %v905_v31 = vrot.slane %v904_v26, 4  ;;  %v1724_v2 = vrot.slane %v1576_v49, 5  ;;  %v948_v19 = vrot.slane %v946_v7, 4  ;;  %v965_v26 = vshll.u32 %v759_v61, 16 }
  0x48   : > { %7370 = vmatprep.mubr.bf16.mxu1 %v8103_v20  ;;  %7418 = vmatprep.mubr.bf16.mxu0 %v6375_v17  ;;  %v896_v24 = vsel %vm8066_vm5, %v891_v15, %v895_v59  ;;  %v1717_v17 = vrot.slane %v1573_v5, 5  ;;  %v928_v58 = vor.u32 %v927_v47, %v924_v44  ;;  %v937_v59 = vrot.slane %v935_v48, 4  ;;  %v1580_v15 = vld [vmem:[%s7976_s25 + $0x44] sm:$0x1]  ;;  %v1581_v48 = vld [vmem:[%s7976_s25 + $0x48] sm:$0xe] }
  0x49   : > { %v6321_v20 = vcombine.low %v886_v14, %v896_v24  ;;  %v910_v43 = vsel %vm8066_vm5, %v905_v31, %v909_v21  ;;  %v1725_v10 = vsel %vm8047_vm4, %v6347_v0, %v1724_v2  ;;  %v1726_v12 = vrot.slane %v1724_v2, 4  ;;  %v764_v0 = vld [vmem:[%s7976_s25 + $0x58] sm:$0xf]  ;;  %v765_v2 = vld [vmem:[%s7976_s25 + $0x5c] sm:$0x1] }
  0x4a   : > { %7369 = vmatpush3.bf16.msra.mxu1 %v7817_v38  ;;  %7417 = vmatpush3.bf16.msra.mxu0 %v7818_v51  ;;  %v1718_v38 = vsel %vm8047_vm4, %v6346_v27, %v1717_v17  ;;  %v1719_v39 = vrot.slane %v1717_v17, 4  ;;  %v920_v51 = vsel %vm8066_vm5, %v915_v37, %v919_v11  ;;  %v929_v5 = vrot.slane %v928_v58, 4  ;;  %v7826_v27 = vld [vmem:[%s9762_s1 + $0x120] sm:$0xff]   ;;  %v1583_v58 = vld [vmem:[%s7976_s25 + $0x50] sm:$0x1] }
  0x4b   : > { %7450 = vmatprep.subr.bf16.mxu1 %v7819_v6  ;;  %7498 = vmatprep.subr.bf16.mxu0 %v7820_v13  ;;  %v6322_v55 = vcombine.low %v910_v43, %v920_v51  ;;  %v959_v14 = vshrl.u32 %v758_v60, 16  ;;  %v951_v21 = vrot.slane %v949_v8, 5  ;;  %v6348_v17 = vrot.slane %v1578_v4, 9  ;;  %v1584_v8 = vld [vmem:[%s7976_s25 + $0x54] sm:$0xe] }
  0x4c   : > { %v1721_v34 = vsel %vm8047_vm4, %v1719_v39, %v1720_v32  ;;  %v934_v16 = vsel %vm8066_vm5, %v929_v5, %v933_v45  ;;  %v967_v32 = vrot.slane %v965_v26, 5  ;;  %v762_v39 = vld [vmem:[%s7976_s25 + $0x50] sm:$0x1]  ;;  %v979_v47 = vshll.u32 %v761_v36, 16  ;;  %v7831_v26 = vld [vmem:[%s9762_s1 + $0xc8] sm:$0xff]  }
  0x4d   : > { %7371 = vmatmul.mubr.bf16.vlgmr.msra.gmra.mxu1 %v8138_v52  ;;  %7419 = vmatmul.mubr.bf16.vlgmr.msra.gmra.mxu0 %v6376_v53  ;;  %v941_v52 = vshll.u32 %v756_v33, 16  ;;  %v1577_v53 = vld [vmem:[%s7976_s25 + $0x38] sm:$0x1]  ;;  %v6378_v57 = vcombine.low %v1718_v38, %v1721_v34  ;;  %v952_v11 = vor.u32 %v951_v21, %v948_v19  ;;  %v1731_v33 = vrot.slane %v1579_v9, 5  ;;  %v1586_v21 = vld [vmem:[%s7976_s25 + $0x5c] sm:$0x1] }
  0x4e   : > { %7451 = vmatpush3.bf16.msra.mxu1 %v7819_v6  ;;  %7499 = vmatpush3.bf16.msra.mxu0 %v7820_v13  ;;  %v1727_v3 = vrot.slane %v1577_v53, 5  ;;  %v938_v6 = vor.u32 %v937_v59, %v933_v45  ;;  %v955_v13 = vshll.u32 %v758_v60, 16  ;;  %v1734_v38 = vrot.slane %v1580_v15, 5  ;;  %v1582_v45 = vld [vmem:[%s7976_s25 + $0x4c] sm:$0xf] }
  0x4f   : > { %7374 = vmatprep.mubr.bf16.mxu1 %v6321_v20  ;;  %7422 = vmatprep.mubr.bf16.mxu0 %v6377_v25  ;;  %v943_v63 = vrot.slane %v941_v52, 5  ;;  %v961_v25 = vrot.slane %v959_v14, 4  ;;  %v953_v37 = vrot.slane %v952_v11, 4  ;;  %v1732_v43 = vsel %vm8047_vm4, %v6348_v17, %v1731_v33  ;;  %v7829_v52 = vld [vmem:[%s9762_s1 + $0xd0] sm:$0xff]   ;;  %v1585_v14 = vld [vmem:[%s7976_s25 + $0x58] sm:$0xf] }
  0x50   : > { %7452 = vmatprep.subr.bf16.mxu1 %v7821_v28  ;;  %7500 = vmatprep.subr.bf16.mxu0 %v7822_v40  ;;  %v939_v18 = vrot.slane %v938_v6, 4  ;;  %v1728_v23 = vsel %vm8047_vm4, %v1726_v12, %v1727_v3  ;;  %v957_v24 = vrot.slane %v955_v13, 5  ;;  %v1733_v44 = vrot.slane %v1731_v33, 4  ;;  %v763_v59 = vld [vmem:[%s7976_s25 + $0x54] sm:$0xf]  ;;  %v7832_v17 = vld [vmem:[%s9762_s1 + $0x108] sm:$0xff]  }
  0x51   : > { %v6379_v1 = vcombine.low %v1725_v10, %v1728_v23  ;;  %v975_v51 = vrot.slane %v973_v41, 5  ;;  %v983_v34 = vshrl.u32 %v761_v36, 16  ;;  %v7830_v3 = vld [vmem:[%s9762_s1 + $0x110] sm:$0xff]   ;;  %v6349_v5 = vrot.slane %v1581_v48, 9  ;;  %v8279_v33 = vld [vmem:[%s9762_s1 + $0x100] sm:$0xff]  }
  0x52   : > { %7453 = vmatpush3.bf16.msra.mxu1 %v7821_v28  ;;  %7501 = vmatpush3.bf16.msra.mxu0 %v7822_v40  ;;  %v944_v20 = vsel %vm8066_vm5, %v939_v18, %v943_v63  ;;  %v8220_v28 = vld [vmem:[%s9762_s1 + $0xd8] sm:$0xff]   ;;  %v962_v31 = vor.u32 %v961_v25, %v957_v24  ;;  %v970_v40 = vshrl.u32 %v760_v35, 16  ;;  %v958_v49 = vsel %vm8066_vm5, %v953_v37, %v957_v24 }
  0x53   : > { %7454 = vmatprep.subr.bf16.mxu1 %v7823_v50  ;;  %7502 = vmatprep.subr.bf16.mxu0 %v7824_v62  ;;  %v6323_v30 = vcombine.low %v934_v16, %v944_v20  ;;  %v1735_v54 = vsel %vm8047_vm4, %v1733_v44, %v1734_v38  ;;  %v985_v63 = vrot.slane %v983_v34, 4  ;;  %v1738_v6 = vrot.slane %v1582_v45, 5  ;;  %v1587_v34 = vld [vmem:[%s7976_s25 + $0x60] sm:$0xe] }
  0x54   : > { %v963_v42 = vrot.slane %v962_v31, 4  ;;  %v6380_v61 = vcombine.low %v1732_v43, %v1735_v54  ;;  %v1741_v7 = vrot.slane %v1583_v58, 5  ;;  %v994_v12 = vshrl.u32 %v763_v59, 16  ;;  %v768_v43 = vld [vmem:[%s7976_s25 + $0x68] sm:$0x1] }
  0x55   : > { %7375 = vmatmul.mubr.bf16.gmra.mxu1 %v6322_v55  ;;  %7423 = vmatmul.mubr.bf16.gmra.mxu0 %v6378_v57  ;;  %v981_v55 = vrot.slane %v979_v47, 5  ;;  %v989_v57 = vshll.u32 %v762_v39, 16  ;;  %v997_v13 = vshll.u32 %v763_v59, 16  ;;  %v1739_v15 = vsel %vm8047_vm4, %v6349_v5, %v1738_v6  ;;  %v766_v39 = vld [vmem:[%s7976_s25 + $0x60] sm:$0xf] }
  0x56   : > { %7455 = vmatpush3.bf16.msra.mxu1 %v7823_v50  ;;  %7503 = vmatpush3.bf16.msra.mxu0 %v7824_v62  ;;  %v972_v50 = vrot.slane %v970_v40, 4  ;;  %v968_v53 = vsel %vm8066_vm5, %v963_v42, %v967_v32  ;;  %v1740_v16 = vrot.slane %v1738_v6, 4  ;;  %v1003_v18 = vshll.u32 %v764_v0, 16  ;;  %v8274_v32 = vld [vmem:[%s9762_s1 + $0xc0] sm:$0xff]   ;;  %v770_v5 = vld [vmem:[%s7976_s25 + $0x70] sm:$0xf] }
  0x57   : > { %7426 = vmatprep.mubr.bf16.mxu0 %v6379_v1  ;;  %7456 = vmatprep.subr.bf16.mxu1 %v7825_v22  ;;  %v6324_v60 = vcombine.low %v958_v49, %v968_v53  ;;  %v991_v4 = vrot.slane %v989_v57, 5  ;;  %v986_v10 = vor.u32 %v985_v63, %v981_v55  ;;  %v1007_v19 = vshrl.u32 %v764_v0, 16  ;;  %v767_v40 = vld [vmem:[%s7976_s25 + $0x64] sm:$0xf]  ;;  %v8293_v57 = vld [vmem:[%s9762_s1 + $0x178] sm:$0xff]  }
  0x58   : > { %7378 = vmatprep.mubr.bf16.mxu1 %v6323_v30  ;;  %7504 = vmatprep.subr.bf16.mxu0 %v7826_v27  ;;  %v976_v62 = vor.u32 %v975_v51, %v972_v50  ;;  %v996_v24 = vrot.slane %v994_v12, 4  ;;  %v999_v25 = vrot.slane %v997_v13, 5  ;;  %v1005_v20 = vrot.slane %v1003_v18, 5  ;;  %v769_v63 = vld [vmem:[%s7976_s25 + $0x6c] sm:$0xf] }
  0x59   : > { %v987_v23 = vrot.slane %v986_v10, 4  ;;  %v1009_v1 = vrot.slane %v1007_v19, 4  ;;  %v1013_v11 = vshll.u32 %v765_v2, 16  ;;  %v6350_v31 = vrot.slane %v1584_v8, 9  ;;  %v771_v6 = vld [vmem:[%s7976_s25 + $0x74] sm:$0x1] }
  0x5a   : > { %7457 = vmatpush3.bf16.msra.mxu1 %v7825_v22  ;;  %7505 = vmatpush3.bf16.msra.mxu0 %v7826_v27  ;;  %v977_v9 = vrot.slane %v976_v62, 4  ;;  %v1742_v27 = vsel %vm8047_vm4, %v1740_v16, %v1741_v7  ;;  %v1000_v30 = vor.u32 %v999_v25, %v996_v24  ;;  %v1745_v38 = vrot.slane %v1585_v14, 5  ;;  %v1589_v62 = vld [vmem:[%s7976_s25 + $0x68] sm:$0x1]  ;;  %v8308_v7 = vld [vmem:[%s9762_s1 + $0x1b8] sm:$0xff]  }
  0x5b   : > { %7458 = vmatprep.subr.bf16.mxu1 %v8220_v28  ;;  %7506 = vmatprep.subr.bf16.mxu0 %v8225_v29  ;;  %v1010_v36 = vor.u32 %v1009_v1, %v1005_v20  ;;  %v1015_v37 = vrot.slane %v1013_v11, 5  ;;  %v1748_v42 = vrot.slane %v1586_v21, 5  ;;  %v1018_v44 = vshrl.u32 %v766_v39, 16  ;;  %v1590_v13 = vld [vmem:[%s7976_s25 + $0x6c] sm:$0xe] }
  0x5c   : > { %v982_v22 = vsel %vm8066_vm5, %v977_v9, %v981_v55  ;;  %v1001_v41 = vrot.slane %v1000_v30, 4  ;;  %v1021_v47 = vshll.u32 %v766_v39, 16  ;;  %v1746_v49 = vsel %vm8047_vm4, %v6350_v31, %v1745_v38  ;;  %v1588_v55 = vld [vmem:[%s7976_s25 + $0x64] sm:$0xf]  ;;  %v1591_v19 = vld [vmem:[%s7976_s25 + $0x70] sm:$0xf] }
  0x5d   : > { %7379 = vmatmul.mubr.bf16.gmra.mxu1 %v6324_v60  ;;  %7427 = vmatmul.mubr.bf16.gmra.mxu0 %v6380_v61  ;;  %v1011_v48 = vrot.slane %v1010_v36, 4  ;;  %v1747_v50 = vrot.slane %v1745_v38, 4  ;;  %v1027_v51 = vshll.u32 %v767_v40, 16  ;;  %v1031_v54 = vshrl.u32 %v767_v40, 16  ;;  %v1592_v25 = vld [vmem:[%s7976_s25 + $0x74] sm:$0x1] }
  0x5e   : > { %7459 = vmatpush3.bf16.msra.mxu1 %v8220_v28  ;;  %7507 = vmatpush3.bf16.msra.mxu0 %v8225_v29  ;;  %v992_v28 = vsel %vm8066_vm5, %v987_v23, %v991_v4  ;;  %v6381_v29 = vcombine.low %v1739_v15, %v1742_v27  ;;  %v1006_v45 = vsel %vm8066_vm5, %v1001_v41, %v1005_v20  ;;  %v1023_v53 = vrot.slane %v1021_v47, 5  ;;  %v772_v39 = vld [vmem:[%s7976_s25 + $0x78] sm:$0xf]  ;;  %v773_v40 = vld [vmem:[%s7976_s25 + $0x7c] sm:$0xf] }
  0x5f   : > { %7460 = vmatprep.subr.bf16.mxu1 %v7829_v52  ;;  %7508 = vmatprep.subr.bf16.mxu0 %v7830_v3  ;;  %v6325_v35 = vcombine.low %v982_v22, %v992_v28  ;;  %v1016_v58 = vsel %vm8066_vm5, %v1011_v48, %v1015_v37  ;;  %v1749_v59 = vsel %vm8047_vm4, %v1747_v50, %v1748_v42  ;;  %v1029_v60 = vrot.slane %v1027_v51, 5 }
  0x60   : > { %7430 = vmatprep.mubr.bf16.mxu0 %v6381_v29  ;;  %v1037_v61 = vshll.u32 %v768_v43, 16  ;;  %v6326_v0 = vcombine.low %v1006_v45, %v1016_v58  ;;  %v6382_v2 = vcombine.low %v1746_v49, %v1749_v59  ;;  %v1033_v4 = vrot.slane %v1031_v54, 4  ;;  %v774_v43 = vld [vmem:[%s7976_s25 + $0x80] sm:$0x1] }
  0x61   : > { %7382 = vmatprep.mubr.bf16.mxu1 %v6325_v35  ;;  %v6351_v9 = vrot.slane %v1587_v34, 9  ;;  %v1752_v10 = vrot.slane %v1588_v55, 5  ;;  %v1755_v12 = vrot.slane %v1589_v62, 5  ;;  %v1042_v16 = vshrl.u32 %v769_v63, 16  ;;  %v1593_v34 = vld [vmem:[%s7976_s25 + $0x78] sm:$0xe] }
  0x62   : > { %7461 = vmatpush3.bf16.msra.mxu1 %v7829_v52  ;;  %7509 = vmatpush3.bf16.msra.mxu0 %v7830_v3  ;;  %v1020_v52 = vrot.slane %v1018_v44, 4  ;;  %v1039_v8 = vrot.slane %v1037_v61, 5  ;;  %v1034_v15 = vor.u32 %v1033_v4, %v1029_v60  ;;  %v1045_v18 = vshll.u32 %v769_v63, 16  ;;  %v1594_v55 = vld [vmem:[%s7976_s25 + $0x7c] sm:$0xf] }
  0x63   : > { %7462 = vmatprep.subr.bf16.mxu1 %v7831_v26  ;;  %7510 = vmatprep.subr.bf16.mxu0 %v7832_v17  ;;  %v1753_v21 = vsel %vm8047_vm4, %v6351_v9, %v1752_v10  ;;  %v1754_v22 = vrot.slane %v1752_v10, 4  ;;  %v1051_v23 = vshll.u32 %v770_v5, 16  ;;  %v1055_v24 = vshrl.u32 %v770_v5, 16  ;;  %v1595_v62 = vld [vmem:[%s7976_s25 + $0x80] sm:$0x1] }
  0x64   : > { %v1024_v3 = vor.u32 %v1023_v53, %v1020_v52  ;;  %v1035_v27 = vrot.slane %v1034_v15, 4  ;;  %v1044_v20 = vrot.slane %v1042_v16, 4  ;;  %v1047_v1 = vrot.slane %v1045_v18, 5  ;;  %v775_v63 = vld [vmem:[%s7976_s25 + $0x84] sm:$0xf] }
  0x65   : > { %7383 = vmatmul.mubr.bf16.gmra.mxu1 %v6326_v0  ;;  %7431 = vmatmul.mubr.bf16.gmra.mxu0 %v6382_v2  ;;  %v1756_v11 = vsel %vm8047_vm4, %v1754_v22, %v1755_v12  ;;  %v1057_v28 = vrot.slane %v1055_v24, 4  ;;  %v1061_v29 = vshll.u32 %v771_v6, 16  ;;  %v1759_v38 = vrot.slane %v1591_v19, 5  ;;  %v776_v5 = vld [vmem:[%s7976_s25 + $0x88] sm:$0xf] }
  0x66   : > { %7463 = vmatpush3.bf16.msra.mxu1 %v7831_v26  ;;  %7511 = vmatpush3.bf16.msra.mxu0 %v7832_v17  ;;  %v1025_v14 = vrot.slane %v1024_v3, 4  ;;  %v1053_v17 = vrot.slane %v1051_v23, 5  ;;  %v1040_v30 = vsel %vm8066_vm5, %v1035_v27, %v1039_v8  ;;  %v6383_v31 = vcombine.low %v1753_v21, %v1756_v11  ;;  %v777_v6 = vld [vmem:[%s7976_s25 + $0x8c] sm:$0x1]  ;;  %v1597_v19 = vld [vmem:[%s7976_s25 + $0x88] sm:$0xf] }
  0x67   : > { %7464 = vmatprep.subr.bf16.mxu1 %v8274_v32  ;;  %7512 = vmatprep.subr.bf16.mxu0 %v8279_v33  ;;  %v1063_v37 = vrot.slane %v1061_v29, 5  ;;  %v1762_v42 = vrot.slane %v1592_v25, 5  ;;  %v1066_v44 = vshrl.u32 %v772_v39, 16  ;;  %v1069_v47 = vshll.u32 %v772_v39, 16  ;;  %v1598_v25 = vld [vmem:[%s7976_s25 + $0x8c] sm:$0x1] }
  0x68   : > { %v1030_v26 = vsel %vm8066_vm5, %v1025_v14, %v1029_v60  ;;  %v1058_v36 = vor.u32 %v1057_v28, %v1053_v17  ;;  %7434 = vmatprep.mubr.bf16.mxu0 %v6383_v31  ;;  %v1761_v50 = vrot.slane %v1759_v38, 4  ;;  %v1075_v51 = vshll.u32 %v773_v40, 16  ;;  %v778_v39 = vld [vmem:[%s7976_s25 + $0x90] sm:$0xf] }
  0x69   : > { %v6327_v35 = vcombine.low %v1030_v26, %v1040_v30  ;;  %v1068_v52 = vrot.slane %v1066_v44, 4  ;;  %v1071_v53 = vrot.slane %v1069_v47, 5  ;;  %v1079_v54 = vshrl.u32 %v773_v40, 16  ;;  %v779_v40 = vld [vmem:[%s7976_s25 + $0x94] sm:$0xf] }
  0x6a   : > { %7465 = vmatpush3.bf16.msra.mxu1 %v8274_v32  ;;  %7513 = vmatpush3.bf16.msra.mxu0 %v8279_v33  ;;  %v1048_v32 = vor.u32 %v1047_v1, %v1044_v20  ;;  %v6352_v33 = vrot.slane %v1590_v13, 9  ;;  %v1059_v48 = vrot.slane %v1058_v36, 4  ;;  %v1763_v59 = vsel %vm8047_vm4, %v1761_v50, %v1762_v42  ;;  %v1596_v13 = vld [vmem:[%s7976_s25 + $0x84] sm:$0xe] }
  0x6b   : > { %7546 = vmatprep.subr.bf16.mxu1 %v8293_v57  ;;  %7594 = vmatprep.subr.bf16.mxu0 %v8308_v7  ;;  %v1077_v60 = vrot.slane %v1075_v51, 5  ;;  %v1085_v61 = vshll.u32 %v774_v43, 16  ;;  %v1072_v3 = vor.u32 %v1071_v53, %v1068_v52  ;;  %v1081_v4 = vrot.slane %v1079_v54, 4  ;;  %v780_v43 = vld [vmem:[%s7976_s25 + $0x98] sm:$0x1] }
  0x6c   : > { %v1049_v41 = vrot.slane %v1048_v32, 4  ;;  %7386 = vmatprep.mubr.bf16.mxu1 %v6327_v35  ;;  %v1760_v49 = vsel %vm8047_vm4, %v6352_v33, %v1759_v38  ;;  %v1064_v58 = vsel %vm8066_vm5, %v1059_v48, %v1063_v37  ;;  %v6353_v9 = vrot.slane %v1593_v34, 9  ;;  %v1599_v34 = vld [vmem:[%s7976_s25 + $0x90] sm:$0xe] }
  0x6d   : > { %v6384_v2 = vcombine.low %v1760_v49, %v1763_v59  ;;  %v1087_v8 = vrot.slane %v1085_v61, 5  ;;  %v1766_v10 = vrot.slane %v1594_v55, 5  ;;  %v1769_v12 = vrot.slane %v1595_v62, 5  ;;  %v1600_v55 = vld [vmem:[%s7976_s25 + $0x94] sm:$0xf] }
  0x6e   : > { %v1054_v45 = vsel %vm8066_vm5, %v1049_v41, %v1053_v17  ;;  %v1073_v14 = vrot.slane %v1072_v3, 4  ;;  %v1082_v15 = vor.u32 %v1081_v4, %v1077_v60  ;;  %v1090_v16 = vshrl.u32 %v775_v63, 16  ;;  %v1601_v62 = vld [vmem:[%s7976_s25 + $0x98] sm:$0x1] }
  0x6f   : > { %v6328_v0 = vcombine.low %v1054_v45, %v1064_v58  ;;  %7435 = vmatmul.mubr.bf16.gmra.mxu0 %v6384_v2  ;;  %v1093_v18 = vshll.u32 %v775_v63, 16  ;;  %v1767_v21 = vsel %vm8047_vm4, %v6353_v9, %v1766_v10  ;;  %v1768_v22 = vrot.slane %v1766_v10, 4  ;;  %v781_v63 = vld [vmem:[%s7976_s25 + $0x9c] sm:$0xf] }
  0x70   : > { %v1099_v23 = vshll.u32 %v776_v5, 16  ;;  %v1103_v24 = vshrl.u32 %v776_v5, 16  ;;  %v1078_v26 = vsel %vm8066_vm5, %v1073_v14, %v1077_v60  ;;  %v1083_v27 = vrot.slane %v1082_v15, 4  ;;  %v782_v5 = vld [vmem:[%s7976_s25 + $0xa0] sm:$0xf] }
  0x71   : > { %7387 = vmatmul.mubr.bf16.gmra.mxu1 %v6328_v0  ;;  %v1092_v20 = vrot.slane %v1090_v16, 4  ;;  %v1095_v1 = vrot.slane %v1093_v18, 5  ;;  %v1770_v11 = vsel %vm8047_vm4, %v1768_v22, %v1769_v12  ;;  %v1109_v29 = vshll.u32 %v777_v6, 16  ;;  %v783_v6 = vld [vmem:[%s7976_s25 + $0xa4] sm:$0x1] }
  0x72   : > { %v1101_v17 = vrot.slane %v1099_v23, 5  ;;  %v1105_v28 = vrot.slane %v1103_v24, 4  ;;  %v1088_v30 = vsel %vm8066_vm5, %v1083_v27, %v1087_v8  ;;  %v6385_v31 = vcombine.low %v1767_v21, %v1770_v11 }
  0x73   : > { %v1096_v32 = vor.u32 %v1095_v1, %v1092_v20  ;;  %v6354_v33 = vrot.slane %v1596_v13, 9  ;;  %v6329_v35 = vcombine.low %v1078_v26, %v1088_v30  ;;  %v1111_v37 = vrot.slane %v1109_v29, 5  ;;  %v1602_v13 = vld [vmem:[%s7976_s25 + $0x9c] sm:$0xe] }
  0x74   : > { %v1106_v36 = vor.u32 %v1105_v28, %v1101_v17  ;;  %v1773_v38 = vrot.slane %v1597_v19, 5  ;;  %7438 = vmatprep.mubr.bf16.mxu0 %v6385_v31  ;;  %v1776_v42 = vrot.slane %v1598_v25, 5  ;;  %v1114_v44 = vshrl.u32 %v778_v39, 16  ;;  %v1603_v19 = vld [vmem:[%s7976_s25 + $0xa0] sm:$0xf] }
  0x75   : > { %v1097_v41 = vrot.slane %v1096_v32, 4  ;;  %v1117_v47 = vshll.u32 %v778_v39, 16  ;;  %7390 = vmatprep.mubr.bf16.mxu1 %v6329_v35  ;;  %v1123_v51 = vshll.u32 %v779_v40, 16  ;;  %v1127_v54 = vshrl.u32 %v779_v40, 16  ;;  %v1604_v25 = vld [vmem:[%s7976_s25 + $0xa4] sm:$0x1] }
  0x76   : > { %v1107_v48 = vrot.slane %v1106_v36, 4  ;;  %v1774_v49 = vsel %vm8047_vm4, %v6354_v33, %v1773_v38  ;;  %v1775_v50 = vrot.slane %v1773_v38, 4  ;;  %v1116_v52 = vrot.slane %v1114_v44, 4  ;;  %v784_v39 = vld [vmem:[%s7976_s25 + $0xa8] sm:$0xf] }
  0x77   : > { %v1102_v45 = vsel %vm8066_vm5, %v1097_v41, %v1101_v17  ;;  %v1119_v53 = vrot.slane %v1117_v47, 5  ;;  %v1125_v60 = vrot.slane %v1123_v51, 5  ;;  %v1133_v61 = vshll.u32 %v780_v43, 16  ;;  %v785_v40 = vld [vmem:[%s7976_s25 + $0xac] sm:$0xf] }
  0x78   : > { %v1112_v58 = vsel %vm8066_vm5, %v1107_v48, %v1111_v37  ;;  %v1777_v59 = vsel %vm8047_vm4, %v1775_v50, %v1776_v42  ;;  %v1129_v4 = vrot.slane %v1127_v54, 4  ;;  %v6355_v9 = vrot.slane %v1599_v34, 9  ;;  %v786_v43 = vld [vmem:[%s7976_s25 + $0xb0] sm:$0x1]  ;;  %v1605_v34 = vld [vmem:[%s7976_s25 + $0xa8] sm:$0xe] }
  0x79   : > { %v6330_v0 = vcombine.low %v1102_v45, %v1112_v58  ;;  %v6386_v2 = vcombine.low %v1774_v49, %v1777_v59  ;;  %v1120_v3 = vor.u32 %v1119_v53, %v1116_v52  ;;  %v1135_v8 = vrot.slane %v1133_v61, 5 }
  0x7a   : > { %v1780_v10 = vrot.slane %v1600_v55, 5  ;;  %v1783_v12 = vrot.slane %v1601_v62, 5  ;;  %v1130_v15 = vor.u32 %v1129_v4, %v1125_v60  ;;  %v1138_v16 = vshrl.u32 %v781_v63, 16  ;;  %v1606_v55 = vld [vmem:[%s7976_s25 + $0xac] sm:$0xf] }
  0x7b   : > { %7391 = vmatmul.mubr.bf16.gmra.mxu1 %v6330_v0  ;;  %7439 = vmatmul.mubr.bf16.gmra.mxu0 %v6386_v2  ;;  %v1121_v14 = vrot.slane %v1120_v3, 4  ;;  %v1141_v18 = vshll.u32 %v781_v63, 16  ;;  %v1147_v23 = vshll.u32 %v782_v5, 16  ;;  %v1151_v24 = vshrl.u32 %v782_v5, 16  ;;  %v1607_v62 = vld [vmem:[%s7976_s25 + $0xb0] sm:$0x1] }
  0x7c   : > { %v1781_v21 = vsel %vm8047_vm4, %v6355_v9, %v1780_v10  ;;  %v1782_v22 = vrot.slane %v1780_v10, 4  ;;  %v1131_v27 = vrot.slane %v1130_v15, 4  ;;  %v1140_v20 = vrot.slane %v1138_v16, 4  ;;  %v787_v63 = vld [vmem:[%s7976_s25 + $0xb4] sm:$0xf] }
  0x7d   : > { %v1126_v26 = vsel %vm8066_vm5, %v1121_v14, %v1125_v60  ;;  %v1143_v1 = vrot.slane %v1141_v18, 5  ;;  %v1149_v17 = vrot.slane %v1147_v23, 5  ;;  %v1153_v28 = vrot.slane %v1151_v24, 4  ;;  %v788_v5 = vld [vmem:[%s7976_s25 + $0xb8] sm:$0xf] }
  0x7e   : > { %v1784_v11 = vsel %vm8047_vm4, %v1782_v22, %v1783_v12  ;;  %v1157_v29 = vshll.u32 %v783_v6, 16  ;;  %v1136_v30 = vsel %vm8066_vm5, %v1131_v27, %v1135_v8  ;;  %v6356_v33 = vrot.slane %v1602_v13, 9  ;;  %v789_v6 = vld [vmem:[%s7976_s25 + $0xbc] sm:$0x1]  ;;  %v1608_v13 = vld [vmem:[%s7976_s25 + $0xb4] sm:$0xe] }
  0x7f   : > { %v6387_v31 = vcombine.low %v1781_v21, %v1784_v11  ;;  %v1144_v32 = vor.u32 %v1143_v1, %v1140_v20  ;;  %v6331_v35 = vcombine.low %v1126_v26, %v1136_v30  ;;  %v1154_v36 = vor.u32 %v1153_v28, %v1149_v17 }
  0x80   : > { %v1159_v37 = vrot.slane %v1157_v29, 5  ;;  %v1787_v38 = vrot.slane %v1603_v19, 5  ;;  %v1790_v42 = vrot.slane %v1604_v25, 5  ;;  %v1162_v44 = vshrl.u32 %v784_v39, 16  ;;  %v1609_v19 = vld [vmem:[%s7976_s25 + $0xb8] sm:$0xf] }
  0x81   : > { %7442 = vmatprep.mubr.bf16.mxu0 %v6387_v31  ;;  %v1145_v41 = vrot.slane %v1144_v32, 4  ;;  %v1165_v47 = vshll.u32 %v784_v39, 16  ;;  %7394 = vmatprep.mubr.bf16.mxu1 %v6331_v35  ;;  %v1155_v48 = vrot.slane %v1154_v36, 4  ;;  %v1171_v51 = vshll.u32 %v785_v40, 16  ;;  %v1610_v25 = vld [vmem:[%s7976_s25 + $0xbc] sm:$0x1] }
  0x82   : > { %v1788_v49 = vsel %vm8047_vm4, %v6356_v33, %v1787_v38  ;;  %v1789_v50 = vrot.slane %v1787_v38, 4  ;;  %v1164_v52 = vrot.slane %v1162_v44, 4  ;;  %v1175_v54 = vshrl.u32 %v785_v40, 16 }
  0x83   : > { %v1150_v45 = vsel %vm8066_vm5, %v1145_v41, %v1149_v17  ;;  %v1167_v53 = vrot.slane %v1165_v47, 5  ;;  %v1160_v58 = vsel %vm8066_vm5, %v1155_v48, %v1159_v37  ;;  %v1173_v60 = vrot.slane %v1171_v51, 5  ;;  %v6471_v41 = vld [vmem:[%s7976_s25 + $0xc] sm:$0xf]  ;;  %v6473_v48 = vld [vmem:[%s7976_s25 + $0x14] sm:$0x1] }
  0x84   : > { %v1791_v59 = vsel %vm8047_vm4, %v1789_v50, %v1790_v42  ;;  %v1181_v61 = vshll.u32 %v786_v43, 16  ;;  %v6332_v0 = vcombine.low %v1150_v45, %v1160_v58  ;;  %v1177_v4 = vrot.slane %v1175_v54, 4  ;;  %v6472_v42 = vld [vmem:[%s7976_s25 + $0x10] sm:$0xf] }
  0x85   : > { %v6388_v2 = vcombine.low %v1788_v49, %v1791_v59  ;;  %v1168_v3 = vor.u32 %v1167_v53, %v1164_v52  ;;  %v6357_v9 = vrot.slane %v1605_v34, 9  ;;  %v1794_v10 = vrot.slane %v1606_v55, 5  ;;  %v7835_v51 = vld [vmem:[%s7976_s25 + $0xc] sm:$0xff]   ;;  %v6474_v59 = vld [vmem:[%s7976_s25 + $0x18] sm:$0xf] }
  0x86   : > { %v1183_v8 = vrot.slane %v1181_v61, 5  ;;  %v1797_v12 = vrot.slane %v1607_v62, 5  ;;  %7395 = vmatmul.mubr.bf16.gmra.mxu1 %v6332_v0  ;;  %v1178_v15 = vor.u32 %v1177_v4, %v1173_v60  ;;  %v1186_v16 = vshrl.u32 %v787_v63, 16  ;;  %v6475_v0 = vld [vmem:[%s7976_s25 + $0x1c] sm:$0xf] }
  0x87   : > { %7443 = vmatmul.mubr.bf16.gmra.mxu0 %v6388_v2  ;;  %v1169_v14 = vrot.slane %v1168_v3, 4  ;;  %v1189_v18 = vshll.u32 %v787_v63, 16  ;;  %v1795_v21 = vsel %vm8047_vm4, %v6357_v9, %v1794_v10  ;;  %v1796_v22 = vrot.slane %v1794_v10, 4  ;;  %v6476_v2 = vld [vmem:[%s7976_s25 + $0x20] sm:$0x1] }
  0x88   : > { %v1195_v23 = vshll.u32 %v788_v5, 16  ;;  %v1199_v24 = vshrl.u32 %v788_v5, 16  ;;  %v1179_v27 = vrot.slane %v1178_v15, 4  ;;  %v1188_v20 = vrot.slane %v1186_v16, 4 }
  0x89   : > { %v1174_v26 = vsel %vm8066_vm5, %v1169_v14, %v1173_v60  ;;  %v1191_v1 = vrot.slane %v1189_v18, 5  ;;  %v1798_v11 = vsel %vm8047_vm4, %v1796_v22, %v1797_v12  ;;  %v1205_v29 = vshll.u32 %v789_v6, 16  ;;  %v7836_v18 = vld [vmem:[%s7976_s25 + $0x18] sm:$0xff]  }
  0x8a   : > { %v1197_v17 = vrot.slane %v1195_v23, 5  ;;  %v1201_v28 = vrot.slane %v1199_v24, 4  ;;  %v1184_v30 = vsel %vm8066_vm5, %v1179_v27, %v1183_v8  ;;  %v6389_v31 = vcombine.low %v1795_v21, %v1798_v11 }
  0x8b   : > { %v1192_v32 = vor.u32 %v1191_v1, %v1188_v20  ;;  %v6358_v33 = vrot.slane %v1608_v13, 9  ;;  %v6333_v35 = vcombine.low %v1174_v26, %v1184_v30  ;;  %v1207_v37 = vrot.slane %v1205_v29, 5  ;;  %v6478_v20 = vld [vmem:[%s7976_s25 + $0x28] sm:$0xf]  ;;  %v6479_v1 = vld [vmem:[%s7976_s25 + $0x2c] sm:$0x1] }
  0x8c   : > { %v1202_v36 = vor.u32 %v1201_v28, %v1197_v17  ;;  %v1801_v38 = vrot.slane %v1609_v19, 5  ;;  %7446 = vmatprep.mubr.bf16.mxu0 %v6389_v31  ;;  %v1804_v40 = vrot.slane %v1610_v25, 5  ;;  %v2692_v49 = vshrl.u32 %v6471_v41, 16  ;;  %v6477_v25 = vld [vmem:[%s7976_s25 + $0x24] sm:$0xf] }
  0x8d   : > { %v1193_v39 = vrot.slane %v1192_v32, 4  ;;  %7398 = vmatprep.mubr.bf16.mxu1 %v6333_v35  ;;  %v2695_v34 = vshll.u32 %v6471_v41, 16  ;;  %v2701_v45 = vshll.u32 %v6472_v42, 16  ;;  %v2705_v52 = vshrl.u32 %v6472_v42, 16  ;;  %v7839_v30 = vld [vmem:[%s7976_s25 + $0x24] sm:$0xff]  }
  0x8e   : > { %v1203_v43 = vrot.slane %v1202_v36, 4  ;;  %v1802_v44 = vsel %vm8047_vm4, %v6358_v33, %v1801_v38  ;;  %v1803_v47 = vrot.slane %v1801_v38, 4  ;;  %v2694_v55 = vrot.slane %v2692_v49, 4  ;;  %v7841_v38 = vld [vmem:[%s9762_s1 + $0x170] sm:$0xff]  }
  0x8f   : > { %v1198_v50 = vsel %vm8066_vm5, %v1193_v39, %v1197_v17  ;;  %v2711_v58 = vshll.u32 %v6473_v48, 16  ;;  %v2697_v62 = vrot.slane %v2695_v34, 5  ;;  %v2703_v63 = vrot.slane %v2701_v45, 5  ;;  %v6481_v49 = vld [vmem:[%s7976_s25 + $0x34] sm:$0xf]  ;;  %v7845_v45 = vld [vmem:[%s9762_s1 + $0x168] sm:$0xff]  }
  0x90   : > { %v1208_v53 = vsel %vm8066_vm5, %v1203_v43, %v1207_v37  ;;  %v1805_v54 = vsel %vm8047_vm4, %v1803_v47, %v1804_v40  ;;  %v2707_v3 = vrot.slane %v2705_v52, 4  ;;  %v2716_v5 = vshrl.u32 %v6474_v59, 16  ;;  %v6480_v43 = vld [vmem:[%s7976_s25 + $0x30] sm:$0xf] }
  0x91   : > { %v6334_v60 = vcombine.low %v1198_v50, %v1208_v53  ;;  %v6390_v61 = vcombine.low %v1802_v44, %v1805_v54  ;;  %v2713_v4 = vrot.slane %v2711_v58, 5  ;;  %v2719_v6 = vshll.u32 %v6474_v59, 16  ;;  %v7842_v44 = vld [vmem:[%s9762_s1 + $0x1b0] sm:$0xff]   ;;  %v6482_v50 = vld [vmem:[%s7976_s25 + $0x38] sm:$0x1] }
  0x92   : > { %v2698_v8 = vor.u32 %v2697_v62, %v2694_v55  ;;  %v2725_v9 = vshll.u32 %v6475_v0, 16  ;;  %v2729_v10 = vshrl.u32 %v6475_v0, 16  ;;  %v2735_v12 = vshll.u32 %v6476_v2, 16  ;;  %v7840_v59 = vld [vmem:[%s7976_s25 + $0x30] sm:$0xff]  }
  0x93   : > { %7399 = vmatmul.mubr.bf16.gmra.mxu1 %v6334_v60  ;;  %7447 = vmatmul.mubr.bf16.gmra.mxu0 %v6390_v61  ;;  %v2708_v13 = vor.u32 %v2707_v3, %v2703_v63  ;;  %v2718_v14 = vrot.slane %v2716_v5, 4  ;;  %v2721_v15 = vrot.slane %v2719_v6, 5  ;;  %v2740_v11 = vshrl.u32 %v6477_v25, 16  ;;  %v7843_v3 = vld [vmem:[%s7976_s25 + $0x3c] sm:$0xff]   ;;  %v7846_v6 = vld [vmem:[%s9762_s1 + $0x1a8] sm:$0xff]  }
  0x94   : > { %7466 = vmatprep.mubr.bf16.mxu1 %v7835_v51  ;;  %v2699_v16 = vrot.slane %v2698_v8, 4  ;;  %v2727_v19 = vrot.slane %v2725_v9, 5  ;;  %v2731_v21 = vrot.slane %v2729_v10, 4  ;;  %v2737_v24 = vrot.slane %v2735_v12, 5  ;;  %v6483_v10 = vld [vmem:[%s7976_s25 + $0x3c] sm:$0xf] }
  0x95   : > { %v2709_v22 = vrot.slane %v2708_v13, 4  ;;  %v2722_v23 = vor.u32 %v2721_v15, %v2718_v14  ;;  %v2743_v17 = vshll.u32 %v6477_v25, 16  ;;  %v2749_v31 = vshll.u32 %v6478_v20, 16  ;;  %v6484_v12 = vld [vmem:[%s7976_s25 + $0x40] sm:$0xf] }
  0x96   : > { %v2704_v26 = vsel %vm8066_vm5, %v2699_v16, %v2703_v63  ;;  %v2732_v27 = vor.u32 %v2731_v21, %v2727_v19  ;;  %v2753_v32 = vshrl.u32 %v6478_v20, 16  ;;  %v2742_v36 = vrot.slane %v2740_v11, 4  ;;  %v6485_v16 = vld [vmem:[%s7976_s25 + $0x44] sm:$0x1]  ;;  %v6487_v20 = vld [vmem:[%s7976_s25 + $0x4c] sm:$0xf] }
  0x97   : > { %v2714_v28 = vsel %vm8066_vm5, %v2709_v22, %v2713_v4  ;;  %v2723_v29 = vrot.slane %v2722_v23, 4  ;;  %v2745_v37 = vrot.slane %v2743_v17, 5  ;;  %v2751_v40 = vrot.slane %v2749_v31, 5  ;;  %v7844_v31 = vld [vmem:[%s7976_s25 + $0x48] sm:$0xff]  }
  0x98   : > { %v6535_v33 = vcombine.low %v2704_v26, %v2714_v28  ;;  %v2733_v35 = vrot.slane %v2732_v27, 4  ;;  %v2755_v41 = vrot.slane %v2753_v32, 4  ;;  %v2759_v42 = vshll.u32 %v6479_v1, 16  ;;  %v6486_v27 = vld [vmem:[%s7976_s25 + $0x48] sm:$0xf] }
  0x99   : > { %v2728_v39 = vsel %vm8066_vm5, %v2723_v29, %v2727_v19  ;;  %v2746_v48 = vor.u32 %v2745_v37, %v2742_v36  ;;  %v2764_v51 = vshrl.u32 %v6480_v43, 16  ;;  %v2767_v34 = vshll.u32 %v6480_v43, 16  ;;  %v6488_v29 = vld [vmem:[%s7976_s25 + $0x50] sm:$0x1]  ;;  %v7850_v36 = vld [vmem:[%s9762_s1 + $0x1a0] sm:$0xff]  }
  0x9a   : > { %7514 = vmatprep.mubr.bf16.mxu0 %v6535_v33  ;;  %v2738_v47 = vsel %vm8066_vm5, %v2733_v35, %v2737_v24  ;;  %v2756_v53 = vor.u32 %v2755_v41, %v2751_v40  ;;  %v2761_v54 = vrot.slane %v2759_v42, 5  ;;  %v2773_v55 = vshll.u32 %v6481_v49, 16  ;;  %v7853_v41 = vld [vmem:[%s9762_s1 + $0x158] sm:$0xff]  }
  0x9b   : > { %7467 = vmatmul.mubr.bf16.vlgmr.msra.gmra.mxu1 %v7836_v18  ;;  %v6536_v52 = vcombine.low %v2728_v39, %v2738_v47  ;;  %v2747_v58 = vrot.slane %v2746_v48, 4  ;;  %v2766_v60 = vrot.slane %v2764_v51, 4  ;;  %v2769_v61 = vrot.slane %v2767_v34, 5  ;;  %v7847_v51 = vld [vmem:[%s7976_s25 + $0x54] sm:$0xff]  }
  0x9c   : > { %7547 = vmatpush3.bf16.msra.mxu1 %v8293_v57  ;;  %7470 = vmatprep.mubr.bf16.mxu1 %v7839_v30  ;;  %v2777_v62 = vshrl.u32 %v6481_v49, 16  ;;  %v2757_v63 = vrot.slane %v2756_v53, 4  ;;  %v2775_v0 = vrot.slane %v2773_v55, 5  ;;  %v2783_v2 = vshll.u32 %v6482_v50, 16 }
  0x9d   : > { %7548 = vmatprep.subr.bf16.mxu1 %v7841_v38  ;;  %7515 = vmatmul.mubr.bf16.vlgmr.msra.gmra.mxu0 %v6536_v52  ;;  %v2752_v57 = vsel %vm8066_vm5, %v2747_v58, %v2751_v40  ;;  %v2770_v4 = vor.u32 %v2769_v61, %v2766_v60  ;;  %v2788_v18 = vshrl.u32 %v6483_v10, 16  ;;  %v2791_v19 = vshll.u32 %v6483_v10, 16  ;;  %v6489_v52 = vld [vmem:[%s7976_s25 + $0x54] sm:$0xf]  ;;  %v6490_v58 = vld [vmem:[%s7976_s25 + $0x58] sm:$0xf] }
  0x9e   : > { %7595 = vmatpush3.bf16.msra.mxu0 %v8308_v7  ;;  %v2779_v5 = vrot.slane %v2777_v62, 4  ;;  %v2762_v8 = vsel %vm8066_vm5, %v2757_v63, %v2761_v54  ;;  %v2785_v9 = vrot.slane %v2783_v2, 5  ;;  %v7849_v7 = vld [vmem:[%s9762_s1 + $0x160] sm:$0xff]   ;;  %v2797_v21 = vshll.u32 %v6484_v12, 16  ;;  %v7854_v61 = vld [vmem:[%s9762_s1 + $0x198] sm:$0xff]  }
  0x9f   : > { %7596 = vmatprep.subr.bf16.mxu0 %v7842_v44  ;;  %v6537_v13 = vcombine.low %v2752_v57, %v2762_v8  ;;  %v2771_v14 = vrot.slane %v2770_v4, 4  ;;  %v2801_v22 = vshrl.u32 %v6484_v12, 16  ;;  %v2807_v23 = vshll.u32 %v6485_v16, 16  ;;  %v7848_v12 = vld [vmem:[%s7976_s25 + $0x60] sm:$0xff]  }
  0xa0   : > { %7549 = vmatpush3.bf16.msra.mxu1 %v7841_v38  ;;  %v2780_v15 = vor.u32 %v2779_v5, %v2775_v0  ;;  %v2790_v26 = vrot.slane %v2788_v18, 4  ;;  %v2793_v1 = vrot.slane %v2791_v19, 5  ;;  %v2799_v11 = vrot.slane %v2797_v21, 5  ;;  %v6494_v18 = vld [vmem:[%s7976_s25 + $0x68] sm:$0x1]  ;;  %v7851_v21 = vld [vmem:[%s7976_s25 + $0x6c] sm:$0xff]  }
  0xa1   : > { %7550 = vmatprep.subr.bf16.mxu1 %v7845_v45  ;;  %7518 = vmatprep.mubr.bf16.mxu0 %v6537_v13  ;;  %v2776_v24 = vsel %vm8066_vm5, %v2771_v14, %v2775_v0  ;;  %v2803_v17 = vrot.slane %v2801_v22, 4  ;;  %v2809_v28 = vrot.slane %v2807_v23, 5  ;;  %v2812_v32 = vshrl.u32 %v6486_v27, 16  ;;  %v6493_v13 = vld [vmem:[%s7976_s25 + $0x64] sm:$0xf]  ;;  %v7858_v22 = vld [vmem:[%s9762_s1 + $0x190] sm:$0xff]  }
  0xa2   : > { %v2781_v25 = vrot.slane %v2780_v15, 4  ;;  %7597 = vmatpush3.bf16.msra.mxu0 %v7842_v44  ;;  %v2815_v33 = vshll.u32 %v6486_v27, 16  ;;  %v2821_v35 = vshll.u32 %v6487_v20, 16  ;;  %v2794_v38 = vor.u32 %v2793_v1, %v2790_v26 }
  0xa3   : > { %7471 = vmatmul.mubr.bf16.gmra.mxu1 %v7840_v59  ;;  %7598 = vmatprep.subr.bf16.mxu0 %v7846_v6  ;;  %v2804_v39 = vor.u32 %v2803_v17, %v2799_v11  ;;  %v2825_v40 = vshrl.u32 %v6487_v20, 16  ;;  %v2814_v42 = vrot.slane %v2812_v32, 4  ;;  %v2831_v47 = vshll.u32 %v6488_v29, 16  ;;  %v6491_v59 = vld [vmem:[%s7976_s25 + $0x5c] sm:$0x1]  ;;  %v7861_v17 = vld [vmem:[%s9762_s1 + $0x148] sm:$0xff]  }
  0xa4   : > { %7474 = vmatprep.mubr.bf16.mxu1 %v7843_v3  ;;  %v2786_v30 = vsel %vm8066_vm5, %v2781_v25, %v2785_v9  ;;  %7551 = vmatpush3.bf16.msra.mxu1 %v7845_v45  ;;  %v2817_v43 = vrot.slane %v2815_v33, 5  ;;  %v2823_v44 = vrot.slane %v2821_v35, 5  ;;  %v2795_v48 = vrot.slane %v2794_v38, 4  ;;  %v7857_v3 = vld [vmem:[%s9762_s1 + $0x150] sm:$0xff]  }
  0xa5   : > { %v6538_v37 = vcombine.low %v2776_v24, %v2786_v30  ;;  %7552 = vmatprep.subr.bf16.mxu1 %v7849_v7  ;;  %v2805_v49 = vrot.slane %v2804_v39, 4  ;;  %v2827_v50 = vrot.slane %v2825_v40, 4  ;;  %v2833_v45 = vrot.slane %v2831_v47, 5  ;;  %v6495_v39 = vld [vmem:[%s7976_s25 + $0x6c] sm:$0xf] }
  0xa6   : > { %v2818_v34 = vor.u32 %v2817_v43, %v2814_v42  ;;  %7599 = vmatpush3.bf16.msra.mxu0 %v7846_v6  ;;  %v2800_v53 = vsel %vm8066_vm5, %v2795_v48, %v2799_v11  ;;  %v2836_v60 = vshrl.u32 %v6489_v52, 16  ;;  %v2839_v0 = vshll.u32 %v6489_v52, 16  ;;  %v6496_v40 = vld [vmem:[%s7976_s25 + $0x70] sm:$0xf]  ;;  %v6497_v43 = vld [vmem:[%s7976_s25 + $0x74] sm:$0x1] }
  0xa7   : > { %7519 = vmatmul.mubr.bf16.gmra.mxu0 %v6538_v37  ;;  %v2810_v54 = vsel %vm8066_vm5, %v2805_v49, %v2809_v28  ;;  %v2828_v55 = vor.u32 %v2827_v50, %v2823_v44  ;;  %7600 = vmatprep.subr.bf16.mxu0 %v7850_v36  ;;  %v2845_v2 = vshll.u32 %v6490_v58, 16  ;;  %v2849_v5 = vshrl.u32 %v6490_v58, 16  ;;  %v7855_v58 = vld [vmem:[%s7976_s25 + $0x84] sm:$0xff]  }
  0xa8   : > { %7553 = vmatpush3.bf16.msra.mxu1 %v7849_v7  ;;  %v6539_v62 = vcombine.low %v2800_v53, %v2810_v54  ;;  %v2819_v63 = vrot.slane %v2818_v34, 4  ;;  %v2838_v4 = vrot.slane %v2836_v60, 4  ;;  %v2855_v6 = vshll.u32 %v6491_v59, 16  ;;  %v6492_v7 = vld [vmem:[%s7976_s25 + $0x60] sm:$0xf]  ;;  %v7852_v34 = vld [vmem:[%s7976_s25 + $0x78] sm:$0xff]  }
  0xa9   : > { %7554 = vmatprep.subr.bf16.mxu1 %v7853_v41  ;;  %v2829_v57 = vrot.slane %v2828_v55, 4  ;;  %v2841_v9 = vrot.slane %v2839_v0, 5  ;;  %v2847_v10 = vrot.slane %v2845_v2, 5  ;;  %v2851_v15 = vrot.slane %v2849_v5, 4  ;;  %v6498_v55 = vld [vmem:[%s7976_s25 + $0x78] sm:$0xf] }
  0xaa   : > { %7522 = vmatprep.mubr.bf16.mxu0 %v6539_v62  ;;  %v2824_v8 = vsel %vm8066_vm5, %v2819_v63, %v2823_v44  ;;  %7601 = vmatpush3.bf16.msra.mxu0 %v7850_v36  ;;  %v2857_v16 = vrot.slane %v2855_v6, 5  ;;  %v2860_v19 = vshrl.u32 %v6492_v7, 16  ;;  %v2863_v25 = vshll.u32 %v6492_v7, 16  ;;  %v7865_v36 = vld [vmem:[%s9762_s1 + $0x140] sm:$0xff]   ;;  %v6499_v63 = vld [vmem:[%s7976_s25 + $0x7c] sm:$0xf] }
  0xab   : > { %7475 = vmatmul.mubr.bf16.gmra.mxu1 %v7844_v31  ;;  %v2834_v14 = vsel %vm8066_vm5, %v2829_v57, %v2833_v45  ;;  %7602 = vmatprep.subr.bf16.mxu0 %v7854_v61  ;;  %v2842_v24 = vor.u32 %v2841_v9, %v2838_v4  ;;  %v2869_v26 = vshll.u32 %v6493_v13, 16  ;;  %v2852_v27 = vor.u32 %v2851_v15, %v2847_v10  ;;  %v7862_v31 = vld [vmem:[%s9762_s1 + $0x188] sm:$0xff]   ;;  %v7866_v59 = vld [vmem:[%s9762_s1 + $0x180] sm:$0xff]   ;;  %v8535_v2 = vld [vmem:[%s9762_s1 + $0x1f8] sm:$0xff]  }
  0xac   : > { %7478 = vmatprep.mubr.bf16.mxu1 %v7847_v51  ;;  %7555 = vmatpush3.bf16.msra.mxu1 %v7853_v41  ;;  %v6540_v23 = vcombine.low %v2824_v8, %v2834_v14  ;;  %v2862_v20 = vrot.slane %v2860_v19, 4  ;;  %v2873_v1 = vshrl.u32 %v6493_v13, 16  ;;  %v2879_v11 = vshll.u32 %v6494_v18, 16  ;;  %v6500_v0 = vld [vmem:[%s7976_s25 + $0x80] sm:$0x1]  ;;  %v8542_v19 = vld [vmem:[%s9762_s1 + $0x238] sm:$0xff]  }
  0xad   : > { %7556 = vmatprep.subr.bf16.mxu1 %v7857_v3  ;;  %v2843_v28 = vrot.slane %v2842_v24, 4  ;;  %v2865_v29 = vrot.slane %v2863_v25, 5  ;;  %v2871_v30 = vrot.slane %v2869_v26, 5  ;;  %v2853_v32 = vrot.slane %v2852_v27, 4  ;;  %v6501_v24 = vld [vmem:[%s7976_s25 + $0x84] sm:$0xf] }
  0xae   : > { %v2875_v33 = vrot.slane %v2873_v1, 4  ;;  %v2881_v35 = vrot.slane %v2879_v11, 5  ;;  %7603 = vmatpush3.bf16.msra.mxu0 %v7854_v61  ;;  %v2884_v44 = vshrl.u32 %v6495_v39, 16  ;;  %v2887_v47 = vshll.u32 %v6495_v39, 16  ;;  %v6502_v25 = vld [vmem:[%s7976_s25 + $0x88] sm:$0xf] }
  0xaf   : > { %7523 = vmatmul.mubr.bf16.gmra.mxu0 %v6540_v23  ;;  %v2848_v37 = vsel %vm8066_vm5, %v2843_v28, %v2847_v10  ;;  %v2866_v38 = vor.u32 %v2865_v29, %v2862_v20  ;;  %7604 = vmatprep.subr.bf16.mxu0 %v7858_v22  ;;  %v2858_v41 = vsel %vm8066_vm5, %v2853_v32, %v2857_v16  ;;  %v2893_v50 = vshll.u32 %v6496_v40, 16  ;;  %v6503_v20 = vld [vmem:[%s7976_s25 + $0x8c] sm:$0x1]  ;;  %v6504_v32 = vld [vmem:[%s7976_s25 + $0x90] sm:$0xf] }
  0xb0   : > { %7557 = vmatpush3.bf16.msra.mxu1 %v7857_v3  ;;  %v2876_v42 = vor.u32 %v2875_v33, %v2871_v30  ;;  %v6541_v48 = vcombine.low %v2848_v37, %v2858_v41  ;;  %v2897_v51 = vshrl.u32 %v6496_v40, 16  ;;  %v2886_v52 = vrot.slane %v2884_v44, 4  ;;  %v7859_v33 = vld [vmem:[%s7976_s25 + $0x9c] sm:$0xff]   ;;  %v6505_v39 = vld [vmem:[%s7976_s25 + $0x94] sm:$0xf] }
  0xb1   : > { %7558 = vmatprep.subr.bf16.mxu1 %v7861_v17  ;;  %v2867_v49 = vrot.slane %v2866_v38, 4  ;;  %v2889_v53 = vrot.slane %v2887_v47, 5  ;;  %v2903_v54 = vshll.u32 %v6497_v43, 16  ;;  %v2895_v61 = vrot.slane %v2893_v50, 5  ;;  %v6506_v43 = vld [vmem:[%s7976_s25 + $0x98] sm:$0x1] }
  0xb2   : > { %v2877_v45 = vrot.slane %v2876_v42, 4  ;;  %7605 = vmatpush3.bf16.msra.mxu0 %v7858_v22  ;;  %7526 = vmatprep.mubr.bf16.mxu0 %v6541_v48  ;;  %v2899_v62 = vrot.slane %v2897_v51, 4  ;;  %v2908_v5 = vshrl.u32 %v6498_v55, 16  ;;  %v2911_v9 = vshll.u32 %v6498_v55, 16 }
  0xb3   : > { %7479 = vmatmul.mubr.bf16.gmra.mxu1 %v7848_v12  ;;  %v2872_v60 = vsel %vm8066_vm5, %v2867_v49, %v2871_v30  ;;  %7606 = vmatprep.subr.bf16.mxu0 %v7862_v31  ;;  %v2890_v57 = vor.u32 %v2889_v53, %v2886_v52  ;;  %v2905_v4 = vrot.slane %v2903_v54, 5  ;;  %v2917_v10 = vshll.u32 %v6499_v63, 16 }
  0xb4   : > { %7482 = vmatprep.mubr.bf16.mxu1 %v7851_v21  ;;  %7559 = vmatpush3.bf16.msra.mxu1 %v7861_v17  ;;  %v2882_v3 = vsel %vm8066_vm5, %v2877_v45, %v2881_v35  ;;  %v2900_v8 = vor.u32 %v2899_v62, %v2895_v61  ;;  %v2910_v7 = vrot.slane %v2908_v5, 4  ;;  %v2921_v13 = vshrl.u32 %v6499_v63, 16  ;;  %v7856_v17 = vld [vmem:[%s7976_s25 + $0x90] sm:$0xff]  }
  0xb5   : > { %7560 = vmatprep.subr.bf16.mxu1 %v7865_v36  ;;  %v6542_v6 = vcombine.low %v2872_v60, %v2882_v3  ;;  %v2891_v12 = vrot.slane %v2890_v57, 4  ;;  %v2927_v14 = vshll.u32 %v6500_v0, 16  ;;  %v2913_v16 = vrot.slane %v2911_v9, 5  ;;  %v6507_v3 = vld [vmem:[%s7976_s25 + $0x9c] sm:$0xf] }
  0xb6   : > { %7607 = vmatpush3.bf16.msra.mxu0 %v7862_v31  ;;  %v2901_v15 = vrot.slane %v2900_v8, 4  ;;  %v2919_v18 = vrot.slane %v2917_v10, 5  ;;  %v2923_v22 = vrot.slane %v2921_v13, 4  ;;  %v2932_v1 = vshrl.u32 %v6501_v24, 16  ;;  %v6508_v57 = vld [vmem:[%s7976_s25 + $0xa0] sm:$0xf] }
  0xb7   : > { %7527 = vmatmul.mubr.bf16.gmra.mxu0 %v6542_v6  ;;  %v2896_v21 = vsel %vm8066_vm5, %v2891_v12, %v2895_v61  ;;  %v2929_v23 = vrot.slane %v2927_v14, 5  ;;  %7608 = vmatprep.subr.bf16.mxu0 %v7866_v59  ;;  %v2914_v27 = vor.u32 %v2913_v16, %v2910_v7  ;;  %v2935_v11 = vshll.u32 %v6501_v24, 16  ;;  %v6509_v8 = vld [vmem:[%s7976_s25 + $0xa4] sm:$0x1]  ;;  %v7863_v12 = vld [vmem:[%s7976_s25 + $0xb4] sm:$0xff]  }
  0xb8   : > { %7561 = vmatpush3.bf16.msra.mxu1 %v7865_v36  ;;  %v2906_v26 = vsel %vm8066_vm5, %v2901_v15, %v2905_v4  ;;  %v2924_v29 = vor.u32 %v2923_v22, %v2919_v18  ;;  %v2941_v30 = vshll.u32 %v6502_v25, 16  ;;  %v2945_v31 = vshrl.u32 %v6502_v25, 16  ;;  %v7860_v4 = vld [vmem:[%s7976_s25 + $0xa8] sm:$0xff]  }
  0xb9   : > { %7642 = vmatprep.subr.bf16.mxu1 %v8535_v2  ;;  %v6543_v28 = vcombine.low %v2896_v21, %v2906_v26  ;;  %v2915_v35 = vrot.slane %v2914_v27, 4  ;;  %v2934_v36 = vrot.slane %v2932_v1, 4  ;;  %v2937_v37 = vrot.slane %v2935_v11, 5  ;;  %v6511_v27 = vld [vmem:[%s7976_s25 + $0xac] sm:$0xf] }
  0xba   : > { %7609 = vmatpush3.bf16.msra.mxu0 %v7866_v59  ;;  %v2951_v38 = vshll.u32 %v6503_v20, 16  ;;  %v2925_v40 = vrot.slane %v2924_v29, 4  ;;  %v2943_v41 = vrot.slane %v2941_v30, 5  ;;  %v2947_v42 = vrot.slane %v2945_v31, 4  ;;  %v6512_v20 = vld [vmem:[%s7976_s25 + $0xb0] sm:$0x1] }
  0xbb   : > { %7483 = vmatmul.mubr.bf16.gmra.mxu1 %v7852_v34  ;;  %7690 = vmatprep.subr.bf16.mxu0 %v8542_v19  ;;  %v2956_v44 = vshrl.u32 %v6504_v32, 16  ;;  %v2920_v47 = vsel %vm8066_vm5, %v2915_v35, %v2919_v18  ;;  %v2938_v48 = vor.u32 %v2937_v37, %v2934_v36  ;;  %v2959_v50 = vshll.u32 %v6504_v32, 16 }
  0xbc   : > { %7486 = vmatprep.mubr.bf16.mxu1 %v7855_v58  ;;  %7530 = vmatprep.mubr.bf16.mxu0 %v6543_v28  ;;  %v2953_v49 = vrot.slane %v2951_v38, 5  ;;  %v2930_v51 = vsel %vm8066_vm5, %v2925_v40, %v2929_v23  ;;  %v2948_v34 = vor.u32 %v2947_v42, %v2943_v41  ;;  %v2965_v52 = vshll.u32 %v6505_v39, 16  ;;  %v6510_v23 = vld [vmem:[%s7976_s25 + $0xa8] sm:$0xf] }
  0xbd   : > { %v2958_v45 = vrot.slane %v2956_v44, 4  ;;  %v6544_v53 = vcombine.low %v2920_v47, %v2930_v51  ;;  %v2939_v54 = vrot.slane %v2938_v48, 4  ;;  %v2961_v55 = vrot.slane %v2959_v50, 5  ;;  %v6513_v44 = vld [vmem:[%s7976_s25 + $0xb4] sm:$0xf]  ;;  %v7864_v47 = vld [vmem:[%s7976_s25 + $0xc0] sm:$0xff]  }
  0xbe   : > { %v2969_v58 = vshrl.u32 %v6505_v39, 16  ;;  %v2949_v59 = vrot.slane %v2948_v34, 4  ;;  %v2967_v60 = vrot.slane %v2965_v52, 5  ;;  %v2975_v61 = vshll.u32 %v6506_v43, 16  ;;  %v6514_v51 = vld [vmem:[%s7976_s25 + $0xb8] sm:$0xf] }
  0xbf   : > { %7531 = vmatmul.mubr.bf16.gmra.mxu0 %v6544_v53  ;;  %v2944_v62 = vsel %vm8066_vm5, %v2939_v54, %v2943_v41  ;;  %v2962_v63 = vor.u32 %v2961_v55, %v2958_v45  ;;  %v2980_v9 = vshrl.u32 %v6507_v3, 16  ;;  %v2983_v10 = vshll.u32 %v6507_v3, 16  ;;  %v6515_v34 = vld [vmem:[%s7976_s25 + $0xbc] sm:$0x1] }
  0xc0   : > { %v2971_v0 = vrot.slane %v2969_v58, 4  ;;  %v2954_v5 = vsel %vm8066_vm5, %v2949_v59, %v2953_v49  ;;  %v2977_v6 = vrot.slane %v2975_v61, 5  ;;  %v2989_v15 = vshll.u32 %v6508_v57, 16 }
  0xc1   : > { %v6545_v7 = vcombine.low %v2944_v62, %v2954_v5  ;;  %v2963_v13 = vrot.slane %v2962_v63, 4  ;;  %v2982_v16 = vrot.slane %v2980_v9, 4  ;;  %v2985_v18 = vrot.slane %v2983_v10, 5 }
  0xc2   : > { %v2972_v14 = vor.u32 %v2971_v0, %v2967_v60  ;;  %v2993_v21 = vshrl.u32 %v6508_v57, 16  ;;  %v2999_v22 = vshll.u32 %v6509_v8, 16  ;;  %v2991_v26 = vrot.slane %v2989_v15, 5  ;;  %v6516_v57 = vld [vmem:[%s7976_s25 + $0xc0] sm:$0xf] }
  0xc3   : > { %7487 = vmatmul.mubr.bf16.gmra.mxu1 %v7856_v17  ;;  %7534 = vmatprep.mubr.bf16.mxu0 %v6545_v7  ;;  %v2968_v24 = vsel %vm8066_vm5, %v2963_v13, %v2967_v60  ;;  %v2986_v1 = vor.u32 %v2985_v18, %v2982_v16  ;;  %v3004_v28 = vshrl.u32 %v6510_v23, 16  ;;  %v3007_v30 = vshll.u32 %v6510_v23, 16  ;;  %v6518_v8 = vld [vmem:[%s7976_s25 + $0xc8] sm:$0x1] }
  0xc4   : > { %7490 = vmatprep.mubr.bf16.mxu1 %v7859_v33  ;;  %v2973_v25 = vrot.slane %v2972_v14, 4  ;;  %v2995_v11 = vrot.slane %v2993_v21, 4  ;;  %v3001_v17 = vrot.slane %v2999_v22, 5  ;;  %v3013_v31 = vshll.u32 %v6511_v27, 16 }
  0xc5   : > { %v3017_v32 = vshrl.u32 %v6511_v27, 16  ;;  %v2987_v35 = vrot.slane %v2986_v1, 4  ;;  %v3006_v37 = vrot.slane %v3004_v28, 4  ;;  %v3009_v38 = vrot.slane %v3007_v30, 5  ;;  %v6560_v1 = vld [vmem:[%s7976_s25 + $0x10] sm:$0xf] }
  0xc6   : > { %v2978_v29 = vsel %vm8066_vm5, %v2973_v25, %v2977_v6  ;;  %v2996_v36 = vor.u32 %v2995_v11, %v2991_v26  ;;  %v3015_v39 = vrot.slane %v3013_v31, 5  ;;  %v3023_v41 = vshll.u32 %v6512_v20, 16  ;;  %v6517_v6 = vld [vmem:[%s7976_s25 + $0xc4] sm:$0xf]  ;;  %v6559_v20 = vld [vmem:[%s7976_s25 + $0xc] sm:$0xe] }
  0xc7   : > { %v6546_v33 = vcombine.low %v2968_v24, %v2978_v29  ;;  %v3019_v40 = vrot.slane %v3017_v32, 4  ;;  %v2992_v42 = vsel %vm8066_vm5, %v2987_v35, %v2991_v26  ;;  %v3010_v48 = vor.u32 %v3009_v38, %v3006_v37  ;;  %v6561_v29 = vld [vmem:[%s7976_s25 + $0x14] sm:$0x1]  ;;  %v6563_v38 = vld [vmem:[%s7976_s25 + $0x1c] sm:$0xf] }
  0xc8   : > { %v2997_v43 = vrot.slane %v2996_v36, 4  ;;  %v3025_v50 = vrot.slane %v3023_v41, 5  ;;  %v3028_v45 = vshrl.u32 %v6513_v44, 16  ;;  %v3031_v53 = vshll.u32 %v6513_v44, 16  ;;  %v6562_v36 = vld [vmem:[%s7976_s25 + $0x18] sm:$0xe] }
  0xc9   : > { %7535 = vmatmul.mubr.bf16.gmra.mxu0 %v6546_v33  ;;  %v3020_v49 = vor.u32 %v3019_v40, %v3015_v39  ;;  %v3037_v54 = vshll.u32 %v6514_v51, 16  ;;  %v3041_v55 = vshrl.u32 %v6514_v51, 16  ;;  %v3011_v59 = vrot.slane %v3010_v48, 4 }
  0xca   : > { %v3002_v52 = vsel %vm8066_vm5, %v2997_v43, %v3001_v17  ;;  %v3030_v61 = vrot.slane %v3028_v45, 4  ;;  %v3033_v62 = vrot.slane %v3031_v53, 5  ;;  %v3047_v3 = vshll.u32 %v6515_v34, 16  ;;  %v6565_v34 = vld [vmem:[%s7976_s25 + $0x24] sm:$0xe] }
  0xcb   : > { %7491 = vmatmul.mubr.bf16.gmra.mxu1 %v7860_v4  ;;  %v6547_v58 = vcombine.low %v2992_v42, %v3002_v52  ;;  %v3021_v60 = vrot.slane %v3020_v49, 4  ;;  %v3039_v63 = vrot.slane %v3037_v54, 5  ;;  %v3043_v0 = vrot.slane %v3041_v55, 4  ;;  %v6566_v55 = vld [vmem:[%s7976_s25 + $0x28] sm:$0xf] }
  0xcc   : > { %7494 = vmatprep.mubr.bf16.mxu1 %v7863_v12  ;;  %v3016_v4 = vsel %vm8066_vm5, %v3011_v59, %v3015_v39  ;;  %v3052_v9 = vshrl.u32 %v6516_v57, 16  ;;  %v3055_v10 = vshll.u32 %v6516_v57, 16  ;;  %v3034_v7 = vor.u32 %v3033_v62, %v3030_v61  ;;  %v6564_v39 = vld [vmem:[%s7976_s25 + $0x20] sm:$0x1]  ;;  %v7873_v62 = vld [vmem:[%s9762_s1 + $0x1f0] sm:$0xff]  }
  0xcd   : > { %7538 = vmatprep.mubr.bf16.mxu0 %v6547_v58  ;;  %v3026_v5 = vsel %vm8066_vm5, %v3021_v60, %v3025_v50  ;;  %v3044_v13 = vor.u32 %v3043_v0, %v3039_v63  ;;  %v3049_v14 = vrot.slane %v3047_v3, 5  ;;  %v3061_v18 = vshll.u32 %v6517_v6, 16  ;;  %v6567_v58 = vld [vmem:[%s7976_s25 + $0x2c] sm:$0x1]  ;;  %v6568_v0 = vld [vmem:[%s7976_s25 + $0x30] sm:$0xe] }
  0xce   : > { %v6548_v12 = vcombine.low %v3016_v4, %v3026_v5  ;;  %v3054_v15 = vrot.slane %v3052_v9, 4  ;;  %v3057_v16 = vrot.slane %v3055_v10, 5  ;;  %v3065_v21 = vshrl.u32 %v6517_v6, 16  ;;  %v6569_v3 = vld [vmem:[%s7976_s25 + $0x34] sm:$0xf]  ;;  %v7868_v9 = vld [vmem:[%s7976_s25 + $0x24] sm:$0xff]  }
  0xcf   : > { %v3035_v22 = vrot.slane %v3034_v7, 4  ;;  %v3045_v23 = vrot.slane %v3044_v13, 4  ;;  %v3071_v24 = vshll.u32 %v6518_v8, 16  ;;  %v3063_v26 = vrot.slane %v3061_v18, 5  ;;  %v6570_v6 = vld [vmem:[%s7976_s25 + $0x38] sm:$0x1] }
  0xd0   : > { %v3058_v25 = vor.u32 %v3057_v16, %v3054_v15  ;;  %v3067_v27 = vrot.slane %v3065_v21, 4  ;;  %v6607_v30 = vrot.slane %v6559_v20, 9  ;;  %v3559_v35 = vrot.slane %v6560_v1, 5  ;;  %v7871_v13 = vld [vmem:[%s7976_s25 + $0x30] sm:$0xff]   ;;  %v6571_v21 = vld [vmem:[%s7976_s25 + $0x3c] sm:$0xe] }
  0xd1   : > { %7539 = vmatmul.mubr.bf16.gmra.mxu0 %v6548_v12  ;;  %v3040_v11 = vsel %vm8066_vm5, %v3035_v22, %v3039_v63  ;;  %v3050_v17 = vsel %vm8066_vm5, %v3045_v23, %v3049_v14  ;;  %v3073_v28 = vrot.slane %v3071_v24, 5  ;;  %v3562_v37 = vrot.slane %v6561_v29, 5  ;;  %v7874_v18 = vld [vmem:[%s9762_s1 + $0x230] sm:$0xff]   ;;  %v6572_v22 = vld [vmem:[%s7976_s25 + $0x40] sm:$0xf]  ;;  %v7877_v20 = vld [vmem:[%s9762_s1 + $0x1e8] sm:$0xff]  }
  0xd2   : > { %v6549_v31 = vcombine.low %v3040_v11, %v3050_v17  ;;  %v3059_v32 = vrot.slane %v3058_v25, 4  ;;  %v3068_v33 = vor.u32 %v3067_v27, %v3063_v26  ;;  %v6608_v40 = vrot.slane %v6562_v36, 9  ;;  %v6573_v23 = vld [vmem:[%s7976_s25 + $0x44] sm:$0x1]  ;;  %v6574_v27 = vld [vmem:[%s7976_s25 + $0x48] sm:$0xe] }
  0xd3   : > { %7495 = vmatmul.mubr.bf16.gmra.mxu1 %v7864_v47  ;;  %v3560_v43 = vsel %vm8047_vm4, %v6607_v30, %v3559_v35  ;;  %v3561_v44 = vrot.slane %v3559_v35, 4  ;;  %v7867_v47 = vld [vmem:[%s7976_s25 + $0x18] sm:$0xff]   ;;  %v3566_v48 = vrot.slane %v6563_v38, 5  ;;  %v3569_v49 = vrot.slane %v6564_v39, 5  ;;  %v6576_v29 = vld [vmem:[%s7976_s25 + $0x50] sm:$0x1] }
  0xd4   : > { %7542 = vmatprep.mubr.bf16.mxu0 %v6549_v31  ;;  %v3064_v41 = vsel %vm8066_vm5, %v3059_v32, %v3063_v26  ;;  %v3069_v42 = vrot.slane %v3068_v33, 4  ;;  %v6609_v59 = vrot.slane %v6565_v34, 9  ;;  %v3573_v60 = vrot.slane %v6566_v55, 5  ;;  %v7881_v31 = vld [vmem:[%s9762_s1 + $0x1e0] sm:$0xff]  }
  0xd5   : > { %v3563_v51 = vsel %vm8047_vm4, %v3561_v44, %v3562_v37  ;;  %v3567_v53 = vsel %vm8047_vm4, %v6608_v40, %v3566_v48  ;;  %v3568_v54 = vrot.slane %v3566_v48, 4  ;;  %v3576_v61 = vrot.slane %v6567_v58, 5  ;;  %v7872_v40 = vld [vmem:[%s7976_s25 + $0x3c] sm:$0xff]   ;;  %v6577_v44 = vld [vmem:[%s7976_s25 + $0x54] sm:$0xe] }
  0xd6   : > { %v3074_v50 = vsel %vm8066_vm5, %v3069_v42, %v3073_v28  ;;  %v6639_v52 = vcombine.low %v3560_v43, %v3563_v51  ;;  %v3574_v4 = vsel %vm8047_vm4, %v6609_v59, %v3573_v60  ;;  %v3575_v5 = vrot.slane %v3573_v60, 4  ;;  %v6575_v28 = vld [vmem:[%s7976_s25 + $0x4c] sm:$0xf]  ;;  %v6579_v48 = vld [vmem:[%s7976_s25 + $0x5c] sm:$0x1] }
  0xd7   : > { %v6550_v45 = vcombine.low %v3064_v41, %v3074_v50  ;;  %v3570_v63 = vsel %vm8047_vm4, %v3568_v54, %v3569_v49  ;;  %v6610_v8 = vrot.slane %v6568_v0, 9  ;;  %v3580_v10 = vrot.slane %v6569_v3, 5  ;;  %v7878_v43 = vld [vmem:[%s9762_s1 + $0x228] sm:$0xff]   ;;  %v6580_v54 = vld [vmem:[%s7976_s25 + $0x60] sm:$0xe]  ;;  %v7885_v3 = vld [vmem:[%s9762_s1 + $0x1d8] sm:$0xff]  }
  0xd8   : > { %7562 = vmatprep.mubr.bf16.mxu1 %v6639_v52  ;;  %v6640_v57 = vcombine.low %v3567_v53, %v3570_v63  ;;  %v3583_v12 = vrot.slane %v6570_v6, 5  ;;  %v3577_v7 = vsel %vm8047_vm4, %v3575_v5, %v3576_v61  ;;  %v6611_v24 = vrot.slane %v6571_v21, 9  ;;  %v6581_v55 = vld [vmem:[%s7976_s25 + $0x64] sm:$0xf]  ;;  %v6582_v58 = vld [vmem:[%s7976_s25 + $0x68] sm:$0x1] }
  0xd9   : > { %7543 = vmatmul.mubr.bf16.gmra.mxu0 %v6550_v45  ;;  %v6641_v14 = vcombine.low %v3574_v4, %v3577_v7  ;;  %v3581_v15 = vsel %vm8047_vm4, %v6610_v8, %v3580_v10  ;;  %v3582_v16 = vrot.slane %v3580_v10, 4  ;;  %v3587_v25 = vrot.slane %v6572_v22, 5  ;;  %v7882_v0 = vld [vmem:[%s9762_s1 + $0x220] sm:$0xff]   ;;  %v7889_v8 = vld [vmem:[%s9762_s1 + $0x1d0] sm:$0xff]   ;;  %v7886_v7 = vld [vmem:[%s9762_s1 + $0x218] sm:$0xff]  }
  0xda   : > { %7610 = vmatprep.mubr.bf16.mxu0 %v7867_v47  ;;  %v3590_v26 = vrot.slane %v6573_v23, 5  ;;  %v6612_v30 = vrot.slane %v6574_v27, 9  ;;  %v3594_v35 = vrot.slane %v6575_v28, 5  ;;  %v3597_v36 = vrot.slane %v6576_v29, 5  ;;  %v6578_v47 = vld [vmem:[%s7976_s25 + $0x58] sm:$0xf] }
  0xdb   : > { %7563 = vmatmul.mubr.bf16.vlgmr.msra.gmra.mxu1 %v6640_v57  ;;  %v3588_v11 = vsel %vm8047_vm4, %v6611_v24, %v3587_v25  ;;  %v3589_v17 = vrot.slane %v3587_v25, 4  ;;  %v6613_v49 = vrot.slane %v6577_v44, 9  ;;  %v3601_v52 = vrot.slane %v6578_v47, 5  ;;  %v7876_v21 = vld [vmem:[%s7976_s25 + $0x54] sm:$0xff]   ;;  %v7879_v25 = vld [vmem:[%s7976_s25 + $0x60] sm:$0xff]  }
  0xdc   : > { %7643 = vmatpush3.bf16.msra.mxu1 %v8535_v2  ;;  %7566 = vmatprep.mubr.bf16.mxu1 %v6641_v14  ;;  %v3584_v2 = vsel %vm8047_vm4, %v3582_v16, %v3583_v12  ;;  %v3596_v42 = vrot.slane %v3594_v35, 4  ;;  %v3595_v34 = vsel %vm8047_vm4, %v6612_v30, %v3594_v35  ;;  %v3604_v53 = vrot.slane %v6579_v48, 5  ;;  %v6583_v14 = vld [vmem:[%s7976_s25 + $0x6c] sm:$0xe]  ;;  %v6585_v22 = vld [vmem:[%s7976_s25 + $0x74] sm:$0x1] }
  0xdd   : > { %7644 = vmatprep.subr.bf16.mxu1 %v7873_v62  ;;  %v6642_v1 = vcombine.low %v3581_v15, %v3584_v2  ;;  %v3591_v37 = vsel %vm8047_vm4, %v3589_v17, %v3590_v26  ;;  %v3602_v61 = vsel %vm8047_vm4, %v6613_v49, %v3601_v52  ;;  %v3608_v63 = vrot.slane %v6581_v55, 5  ;;  %v6584_v15 = vld [vmem:[%s7976_s25 + $0x70] sm:$0xf]  ;;  %v6586_v26 = vld [vmem:[%s7976_s25 + $0x78] sm:$0xe]  ;;  %v7897_v49 = vld [vmem:[%s9762_s1 + $0x1c0] sm:$0xff]  }
  0xde   : > { %v6643_v41 = vcombine.low %v3588_v11, %v3591_v37  ;;  %v3598_v45 = vsel %vm8047_vm4, %v3596_v42, %v3597_v36  ;;  %v6614_v4 = vrot.slane %v6580_v54, 9  ;;  %v3611_v12 = vrot.slane %v6582_v58, 5  ;;  %v6587_v28 = vld [vmem:[%s7976_s25 + $0x7c] sm:$0xf]  ;;  %v6588_v29 = vld [vmem:[%s7976_s25 + $0x80] sm:$0x1] }
  0xdf   : > { %v6644_v57 = vcombine.low %v3595_v34, %v3598_v45  ;;  %v3610_v10 = vrot.slane %v3608_v63, 4  ;;  %v6615_v23 = vrot.slane %v6583_v14, 9  ;;  %v3615_v24 = vrot.slane %v6584_v15, 5  ;;  %v7890_v30 = vld [vmem:[%s9762_s1 + $0x210] sm:$0xff]   ;;  %v7894_v55 = vld [vmem:[%s9762_s1 + $0x208] sm:$0xff]   ;;  %v7898_v15 = vld [vmem:[%s9762_s1 + $0x200] sm:$0xff]  }
  0xe0   : > { %7645 = vmatpush3.bf16.msra.mxu1 %v7873_v62  ;;  %v3603_v62 = vrot.slane %v3601_v52, 4  ;;  %v3618_v2 = vrot.slane %v6585_v22, 5  ;;  %v3622_v35 = vrot.slane %v6587_v28, 5  ;;  %v3625_v44 = vrot.slane %v6588_v29, 5  ;;  %v6590_v52 = vld [vmem:[%s7976_s25 + $0x88] sm:$0xf] }
  0xe1   : > { %7611 = vmatmul.mubr.bf16.vlgmr.msra.gmra.mxu0 %v7868_v9  ;;  %7646 = vmatprep.subr.bf16.mxu1 %v7877_v20  ;;  %v3612_v11 = vsel %vm8047_vm4, %v3610_v10, %v3611_v12  ;;  %v3617_v17 = vrot.slane %v3615_v24, 4  ;;  %v3629_v58 = vrot.slane %v6590_v52, 5  ;;  %v6597_v28 = vld [vmem:[%s7976_s25 + $0xa4] sm:$0x1] }
  0xe2   : > { %7691 = vmatpush3.bf16.msra.mxu0 %v8542_v19  ;;  %7614 = vmatprep.mubr.bf16.mxu0 %v7871_v13  ;;  %v7875_v19 = vld [vmem:[%s7976_s25 + $0x48] sm:$0xff]   ;;  %v3605_v9 = vsel %vm8047_vm4, %v3603_v62, %v3604_v53  ;;  %v3624_v45 = vrot.slane %v3622_v35, 4 }
  0xe3   : > { %7692 = vmatprep.subr.bf16.mxu0 %v7874_v18  ;;  %7567 = vmatmul.mubr.bf16.gmra.mxu1 %v6642_v1  ;;  %v6645_v13 = vcombine.low %v3602_v61, %v3605_v9  ;;  %v3609_v1 = vsel %vm8047_vm4, %v6614_v4, %v3608_v63  ;;  %v6591_v53 = vld [vmem:[%s7976_s25 + $0x8c] sm:$0x1]  ;;  %v3631_v9 = vrot.slane %v3629_v58, 4 }
  0xe4   : > { %7570 = vmatprep.mubr.bf16.mxu1 %v6643_v41  ;;  %7647 = vmatpush3.bf16.msra.mxu1 %v7877_v20  ;;  %v3619_v41 = vsel %vm8047_vm4, %v3617_v17, %v3618_v2  ;;  %v6646_v42 = vcombine.low %v3609_v1, %v3612_v11  ;;  %v3632_v61 = vrot.slane %v6591_v53, 5  ;;  %v7880_v4 = vld [vmem:[%s7976_s25 + $0x6c] sm:$0xff]   ;;  %v3626_v14 = vsel %vm8047_vm4, %v3624_v45, %v3625_v44  ;;  %v6596_v1 = vld [vmem:[%s7976_s25 + $0xa0] sm:$0xf] }
  0xe5   : > { %7648 = vmatprep.subr.bf16.mxu1 %v7881_v31  ;;  %v3643_v29 = vrot.slane %v6596_v1, 5  ;;  %v6599_v44 = vld [vmem:[%s7976_s25 + $0xac] sm:$0xf] }
  0xe6   : > { %7693 = vmatpush3.bf16.msra.mxu0 %v7874_v18  ;;  %v3633_v22 = vsel %vm8047_vm4, %v3631_v9, %v3632_v61  ;;  %v3650_v53 = vrot.slane %v6599_v44, 5  ;;  %v7887_v9 = vld [vmem:[%s7976_s25 + $0x90] sm:$0xff]  }
  0xe7   : > { %7694 = vmatprep.subr.bf16.mxu0 %v7878_v43 }
  0xe8   : > { %7649 = vmatpush3.bf16.msra.mxu1 %v7881_v31  ;;  %v3616_v31 = vsel %vm8047_vm4, %v6615_v23, %v3615_v24 }
  0xe9   : > { %7615 = vmatmul.mubr.bf16.gmra.mxu0 %v7872_v40  ;;  %7650 = vmatprep.subr.bf16.mxu1 %v7885_v3  ;;  %v7893_v40 = vld [vmem:[%s9762_s1 + $0x1c8] sm:$0xff]   ;;  %v6647_v34 = vcombine.low %v3616_v31, %v3619_v41  ;;  %v3646_v41 = vrot.slane %v6597_v28, 5  ;;  %v6604_v28 = vld [vmem:[%s7976_s25 + $0xc0] sm:$0xe] }
  0xea   : > { %7618 = vmatprep.mubr.bf16.mxu0 %v7875_v19  ;;  %7695 = vmatpush3.bf16.msra.mxu0 %v7878_v43  ;;  %v6616_v43 = vrot.slane %v6586_v26, 9  ;;  %v6589_v19 = vld [vmem:[%s7976_s25 + $0x84] sm:$0xe]  ;;  %v6595_v26 = vld [vmem:[%s7976_s25 + $0x9c] sm:$0xe] }
  0xeb   : > { %7696 = vmatprep.subr.bf16.mxu0 %v7882_v0  ;;  %7571 = vmatmul.mubr.bf16.gmra.mxu1 %v6644_v57  ;;  %v6617_v54 = vrot.slane %v6589_v19, 9  ;;  %v6594_v57 = vld [vmem:[%s7976_s25 + $0x98] sm:$0x1]  ;;  %v6600_v19 = vld [vmem:[%s7976_s25 + $0xb0] sm:$0x1] }
  0xec   : > { %7574 = vmatprep.mubr.bf16.mxu1 %v6645_v13  ;;  %7651 = vmatpush3.bf16.msra.mxu1 %v7885_v3  ;;  %v6593_v3 = vld [vmem:[%s7976_s25 + $0x94] sm:$0xf]  ;;  %v3623_v13 = vsel %vm8047_vm4, %v6616_v43, %v3622_v35  ;;  %v3639_v24 = vrot.slane %v6594_v57, 5  ;;  %v3645_v43 = vrot.slane %v3643_v29, 4 }
  0xed   : > { %v8653_v32 = vpop.f32.mrf.mxu0  ;;  %v8655_v33 = vpop.f32.mrf.mxu1  ;;  %7652 = vmatprep.subr.bf16.mxu1 %v7889_v8  ;;  %v3636_v10 = vrot.slane %v6593_v3, 5  ;;  %v6648_v11 = vcombine.low %v3623_v13, %v3626_v14  ;;  %v6603_v13 = vld [vmem:[%s7976_s25 + $0xbc] sm:$0x1] }
  0xee   : > { %7697 = vmatpush3.bf16.msra.mxu0 %v7882_v0  ;;  %v6592_v0 = vld [vmem:[%s7976_s25 + $0x90] sm:$0xe]  ;;  %v3647_v57 = vsel %vm8047_vm4, %v3645_v43, %v3646_v41  ;;  %v6622_v43 = vrot.slane %v6604_v28, 9 }
  0xef   : > { %v8660_v38 = vpop.f32.mrf.mxu0  ;;  %v8662_v39 = vpop.f32.mrf.mxu1  ;;  %7698 = vmatprep.subr.bf16.mxu0 %v7886_v7  ;;  %v6618_v23 = vrot.slane %v6592_v0, 9  ;;  %v3638_v17 = vrot.slane %v3636_v10, 4 }
  0xf0   : > { %7653 = vmatpush3.bf16.msra.mxu1 %v7889_v8  ;;  %v7883_v8 = vld [vmem:[%s7976_s25 + $0x78] sm:$0xff]  }
  0xf1   : > { %v8672_v50 = vpop.f32.mrf.mxu0  ;;  %v8674_v51 = vpop.f32.mrf.mxu1  ;;  %7619 = vmatmul.mubr.bf16.gmra.mxu0 %v7876_v21  ;;  %7654 = vmatprep.subr.bf16.mxu1 %v7893_v40  ;;  %v3630_v21 = vsel %vm8047_vm4, %v6617_v54, %v3629_v58  ;;  %v3653_v54 = vrot.slane %v6600_v19, 5  ;;  %v3640_v0 = vsel %vm8047_vm4, %v3638_v17, %v3639_v24  ;;  %v3660_v24 = vrot.slane %v6603_v13, 5 }
  0xf2   : > { %7622 = vmatprep.mubr.bf16.mxu0 %v7879_v25  ;;  %7699 = vmatpush3.bf16.msra.mxu0 %v7886_v7 }
  0xf3   : > { %v8683_v59 = vpop.f32.mrf.mxu0  ;;  %v8685_v60 = vpop.f32.mrf.mxu1  ;;  %7700 = vmatprep.subr.bf16.mxu0 %v7890_v30  ;;  %7575 = vmatmul.mubr.bf16.gmra.mxu1 %v6646_v42  ;;  %v6598_v42 = vld [vmem:[%s7976_s25 + $0xa8] sm:$0xe] }
  0xf4   : > { %7578 = vmatprep.mubr.bf16.mxu1 %v6647_v34  ;;  %7655 = vmatpush3.bf16.msra.mxu1 %v7893_v40  ;;  %v6619_v40 = vrot.slane %v6595_v26, 9  ;;  %v6620_v34 = vrot.slane %v6598_v42, 9 }
  0xf5   : > { %v8695_v5 = vpop.f32.mrf.mxu0  ;;  %v8697_v6 = vpop.f32.mrf.mxu1  ;;  %7656 = vmatprep.subr.bf16.mxu1 %v7897_v49 }
  0xf6   : > { %7701 = vmatpush3.bf16.msra.mxu0 %v7890_v30  ;;  %v6649_v30 = vcombine.low %v3630_v21, %v3633_v22  ;;  %v3644_v3 = vsel %vm8047_vm4, %v6619_v40, %v3643_v29  ;;  %v6605_v29 = vld [vmem:[%s7976_s25 + $0xc4] sm:$0xf] }
  0xf7   : > { %v8709_v16 = vpop.f32.mrf.mxu0  ;;  %v8711_v18 = vpop.f32.mrf.mxu1  ;;  %7702 = vmatprep.subr.bf16.mxu0 %v7894_v55  ;;  %v6651_v1 = vcombine.low %v3644_v3, %v3647_v57  ;;  %v3664_v44 = vrot.slane %v6605_v29, 5 }
  0xf8   : > { %7657 = vmatpush3.bf16.msra.mxu1 %v7897_v49  ;;  %v3637_v49 = vsel %vm8047_vm4, %v6618_v23, %v3636_v10  ;;  %v6602_v10 = vld [vmem:[%s7976_s25 + $0xb8] sm:$0xf] }
  0xf9   : > { %v8717_v27 = vpop.f32.mrf.mxu0  ;;  %v8719_v20 = vpop.f32.mrf.mxu1  ;;  %7623 = vmatmul.mubr.bf16.gmra.mxu0 %v7880_v4  ;;  %v3652_v4 = vrot.slane %v3650_v53, 4  ;;  %v3657_v23 = vrot.slane %v6602_v10, 5  ;;  %v6650_v26 = vcombine.low %v3637_v49, %v3640_v0  ;;  %v7888_v49 = vld [vmem:[%s7976_s25 + $0x9c] sm:$0xff]   ;;  %v8840_v0 = vsel %vm8047_vm4, %v6622_v43, %v3664_v44 }
  0xfa   : > { %9769 = vst [vmem:[#allocation3_spill] sm:$0xff] %v8719_v20  ;;  %7626 = vmatprep.mubr.bf16.mxu0 %v7883_v8  ;;  %7703 = vmatpush3.bf16.msra.mxu0 %v7894_v55  ;;  %v7884_v55 = vld [vmem:[%s7976_s25 + $0x84] sm:$0xff]   ;;  %v6601_v8 = vld [vmem:[%s7976_s25 + $0xb4] sm:$0xe]  ;;  %v3666_v3 = vrot.slane %v3664_v44, 4 }
  0xfb   : > { %v8732_v36 = vpop.f32.mrf.mxu0  ;;  %v8734_v37 = vpop.f32.mrf.mxu1  ;;  %7704 = vmatprep.subr.bf16.mxu0 %v7898_v15  ;;  %7579 = vmatmul.mubr.bf16.gmra.mxu1 %v6648_v11  ;;  %v6621_v14 = vrot.slane %v6601_v8, 9  ;;  %v8819_v11 = vsel %vm8047_vm4, %v6620_v34, %v3650_v53  ;;  %v8823_v17 = vsel %vm8047_vm4, %v3652_v4, %v3653_v54  ;;  %v3659_v42 = vrot.slane %v3657_v23, 4  ;;  %v6735_v8 = vld [vmem:[%s7976_s25 + $0x18] sm:$0xf] }
  0xfc   : > { %9770 = vst [vmem:[#allocation4_spill] sm:$0xff] %v8734_v37  ;;  %7582 = vmatprep.mubr.bf16.mxu1 %v6649_v30  ;;  %v6745_v37 = vld [vmem:[%s7976_s25 + $0x40] sm:$0xf] }
  0xfd   : > { %v8742_v47 = vpop.f32.mrf.mxu0  ;;  %v8744_v48 = vpop.f32.mrf.mxu1  ;;  %v8830_v41 = vsel %vm8047_vm4, %v6621_v14, %v3657_v23  ;;  %v7891_v23 = vld [vmem:[%s7976_s25 + $0xa8] sm:$0xff]  }
  0xfe   : > { %9771 = vst [vmem:[#allocation5_spill] sm:$0xff] %v8744_v48  ;;  %7705 = vmatpush3.bf16.msra.mxu0 %v7898_v15  ;;  %v6606_v15 = vld [vmem:[%s7976_s25 + $0xc8] sm:$0x1] }
  0xff   : > { %v8754_v62 = vpop.f32.mrf.mxu0  ;;  %v8756_v63 = vpop.f32.mrf.mxu1  ;;  %v3667_v19 = vrot.slane %v6606_v15, 5 }
 0x100   : > { %9772 = vst [vmem:[#allocation6_spill] sm:$0xff] %v8756_v63 }
 0x101   : > { %v8763_v12 = vpop.f32.mrf.mxu0  ;;  %v8765_v7 = vpop.f32.mrf.mxu1  ;;  %7627 = vmatmul.mubr.bf16.gmra.mxu0 %v7884_v55  ;;  %v8836_v55 = vsel %vm8047_vm4, %v3659_v42, %v3660_v24  ;;  %v6737_v24 = vld [vmem:[%s7976_s25 + $0x20] sm:$0x1] }
 0x102   : > { %9773 = vst [vmem:[#allocation7_spill] sm:$0xff] %v8765_v7  ;;  %7630 = vmatprep.mubr.bf16.mxu0 %v7887_v9  ;;  %v6653_v4 = vcombine.low %v8830_v41, %v8836_v55  ;;  %v6736_v9 = vld [vmem:[%s7976_s25 + $0x1c] sm:$0xf]  ;;  %v4574_v15 = vshll.u32 %v6737_v24, 16  ;;  %v6738_v24 = vld [vmem:[%s7976_s25 + $0x24] sm:$0xf] }
 0x103   : > { %v8778_v25 = vpop.f32.mrf.mxu0  ;;  %v8780_v2 = vpop.f32.mrf.mxu1  ;;  %7583 = vmatmul.mubr.bf16.gmra.mxu1 %v6650_v26  ;;  %v4555_v26 = vshrl.u32 %v6735_v8, 16  ;;  %v4568_v29 = vshrl.u32 %v6736_v9, 16 }
 0x104   : > { %9774 = vst [vmem:[#allocation8_spill] sm:$0xff] %v8780_v2  ;;  %7586 = vmatprep.mubr.bf16.mxu1 %v6651_v1  ;;  %v6741_v2 = vld [vmem:[%s7976_s25 + $0x30] sm:$0xf] }
 0x105   : > { %v8785_v31 = vpop.f32.mrf.mxu0  ;;  %v8787_v35 = vpop.f32.mrf.mxu1  ;;  %v4557_v43 = vrot.slane %v4555_v26, 4  ;;  %v4570_v55 = vrot.slane %v4568_v29, 4  ;;  %v4579_v26 = vshrl.u32 %v6738_v24, 16 }
 0x106   : > { %9775 = vst [vmem:[#allocation9_spill] sm:$0xff] %v8787_v35 }
 0x107   : > { %v8792_v45 = vpop.f32.mrf.mxu0  ;;  %v8794_v52 = vpop.f32.mrf.mxu1 }
 0x108   : > { %9776 = vst [vmem:[#allocation10_spill] sm:$0xff] %v8794_v52 }
 0x109   : > { %v8798_v58 = vpop.f32.mrf.mxu0  ;;  %v8800_v61 = vpop.f32.mrf.mxu1  ;;  %7631 = vmatmul.mubr.bf16.gmra.mxu0 %v7888_v49 }
 0x10a   : > { %9777 = vst [vmem:[#allocation11_spill] sm:$0xff] %v8800_v61  ;;  %7634 = vmatprep.mubr.bf16.mxu0 %v7891_v23 }
 0x10b   : > { %v8813_v21 = vpop.f32.mrf.mxu0  ;;  %v8815_v22 = vpop.f32.mrf.mxu1 }
 0x10c   : > { %9778 = vst [vmem:[#allocation12_spill] sm:$0xff] %v8815_v22  ;;  %v4581_v22 = vrot.slane %v4579_v26, 4 }
 0x10d   : > { %v7372_v30 = vpop.f32.mrf.mxu1  ;;  %v7420_v40 = vpop.f32.mrf.mxu0 }
 0x10e   : > { %v1501_v34 = vadd.f32 %v7372_v30, %v8653_v32  ;;  %v6652_v32 = vcombine.low %v8819_v11, %v8823_v17  ;;  %v4558_v11 = vshll.u32 %v6735_v8, 16  ;;  %v4564_v17 = vshll.u32 %v6736_v9, 16  ;;  %v6823_v30 = vld [vmem:[%s7976_s25 + $0x18] sm:$0xe] }
 0x10f   : > { %v1372_v53 = vpop.f32.mrf.mxu1  ;;  %v1969_v54 = vpop.f32.mrf.mxu0 }
 0x110   : > { %v1499_v57 = vadd.f32 %v1372_v53, %v8660_v38  ;;  %v8849_v10 = vadd.f32 %v7420_v40, %v1501_v34  ;;  %v8856_v38 = vsel %vm8047_vm4, %v3666_v3, %v3667_v19  ;;  %v6824_v40 = vld [vmem:[%s7976_s25 + $0x1c] sm:$0xf]  ;;  %v4560_v44 = vrot.slane %v4558_v11, 5  ;;  %v6825_v34 = vld [vmem:[%s7976_s25 + $0x20] sm:$0x1]  ;;  %7587 = vmatmul.mubr.bf16.gmra.mxu1 %v6652_v32 }
 0x111   : > { %v7373_v13 = vpop.f32.mrf.mxu1  ;;  %v8851_v14 = vpop.f32.mrf.mxu0  ;;  %v4566_v19 = vrot.slane %v4564_v17, 5  ;;  %v6871_v53 = vrot.slane %v6823_v30, 9  ;;  %v4576_v3 = vrot.slane %v4574_v15, 5  ;;  %v5422_v8 = vrot.slane %v6824_v40, 5  ;;  %7590 = vmatprep.mubr.bf16.mxu1 %v6653_v4 }
 0x112   : > { %9779 = vst [vmem:[#allocation13_spill] sm:$0xff] %v8849_v10  ;;  %v8863_v41 = vadd.f32 %v1969_v54, %v1499_v57  ;;  %v5425_v9 = vrot.slane %v6825_v34, 5  ;;  %v4561_v57 = vor.u32 %v4560_v44, %v4557_v43  ;;  %v6740_v10 = vld [vmem:[%s7976_s25 + $0x2c] sm:$0x1]  ;;  %v4582_v11 = vshll.u32 %v6738_v24, 16 }
 0x113   : > { %v8865_v1 = vpop.f32.mrf.mxu1  ;;  %v8867_v42 = vpop.f32.mrf.mxu0  ;;  %v1502_v17 = vadd.f32 %v7373_v13, %v8672_v50  ;;  %v4571_v29 = vor.u32 %v4570_v55, %v4566_v19  ;;  %v8880_v15 = vsel %vm8047_vm4, %v6871_v53, %v5422_v8  ;;  %v5424_v30 = vrot.slane %v5422_v8, 4  ;;  %v6826_v34 = vld [vmem:[%s7976_s25 + $0x24] sm:$0xe]  ;;  %v6827_v50 = vld [vmem:[%s7976_s25 + $0x28] sm:$0xf] }
 0x114   : > { %9780 = vst [vmem:[#allocation14_spill] sm:$0xff] %v8863_v41  ;;  %v6739_v41 = vld [vmem:[%s7976_s25 + $0x28] sm:$0xf]  ;;  %v4562_v44 = vrot.slane %v4561_v57, 4  ;;  %v4584_v24 = vrot.slane %v4582_v11, 5  ;;  %v4598_v55 = vshll.u32 %v6740_v10, 16 }
 0x115   : > { %v8871_v28 = vpop.f32.mrf.mxu1  ;;  %v8873_v54 = vpop.f32.mrf.mxu0  ;;  %v4588_v40 = vshll.u32 %v6739_v41, 16  ;;  %v4592_v61 = vshrl.u32 %v6739_v41, 16  ;;  %v4572_v13 = vrot.slane %v4571_v29, 4  ;;  %v8890_v23 = vsel %vm8047_vm4, %v5424_v30, %v5425_v9  ;;  %v6828_v8 = vld [vmem:[%s7976_s25 + $0x2c] sm:$0x1]  ;;  %v7892_v57 = vld [vmem:[%s7976_s25 + $0xb4] sm:$0xff]  }
 0x116   : > { %v4567_v41 = vsel %vm8066_vm5, %v4562_v44, %v4566_v19  ;;  %v4585_v26 = vor.u32 %v4584_v24, %v4581_v22  ;;  %v7895_v11 = vld [vmem:[%s7976_s25 + $0xc0] sm:$0xff]   ;;  %v4600_v29 = vrot.slane %v4598_v55, 5  ;;  %v6872_v30 = vrot.slane %v6826_v34, 9  ;;  %v6742_v22 = vld [vmem:[%s7976_s25 + $0x34] sm:$0xf]  ;;  %7635 = vmatmul.mubr.bf16.gmra.mxu0 %v7892_v57 }
 0x117   : > { %v8883_v49 = vpop.f32.mrf.mxu1  ;;  %v8885_v43 = vpop.f32.mrf.mxu0  ;;  %v4590_v53 = vrot.slane %v4588_v40, 5  ;;  %v4594_v9 = vrot.slane %v4592_v61, 4  ;;  %v4577_v10 = vsel %vm8066_vm5, %v4572_v13, %v4576_v3  ;;  %v5429_v40 = vrot.slane %v6827_v50, 5  ;;  %v6743_v50 = vld [vmem:[%s7976_s25 + $0x38] sm:$0x1]  ;;  %7638 = vmatprep.mubr.bf16.mxu0 %v7895_v11 }
 0x118   : > { %v6799_v19 = vcombine.low %v4567_v41, %v4577_v10  ;;  %v4586_v44 = vrot.slane %v4585_v26, 4  ;;  %v5432_v32 = vrot.slane %v6828_v8, 5  ;;  %v8916_v24 = vadd.f32 %v8851_v14, %v1502_v17  ;;  %v6829_v14 = vld [vmem:[%s7976_s25 + $0x30] sm:$0xe]  ;;  %v6831_v57 = vld [vmem:[%s7976_s25 + $0x38] sm:$0x1] }
 0x119   : > { %v8893_v52 = vpop.f32.mrf.mxu1  ;;  %v8895_v35 = vpop.f32.mrf.mxu0  ;;  %v4595_v63 = vor.u32 %v4594_v9, %v4590_v53  ;;  %v8913_v61 = vsel %vm8047_vm4, %v6872_v30, %v5429_v40  ;;  %v5431_v3 = vrot.slane %v5429_v40, 4  ;;  %v1500_v34 = vadd.f32 %v8865_v1, %v8683_v59  ;;  %v6830_v30 = vld [vmem:[%s7976_s25 + $0x34] sm:$0xf] }
 0x11a   : > { %9781 = vst [vmem:[#allocation15_spill] sm:$0xff] %v8916_v24  ;;  %v4591_v8 = vsel %vm8066_vm5, %v4586_v44, %v4590_v53  ;;  %v4603_v26 = vshrl.u32 %v6741_v2, 16  ;;  %v4606_v9 = vshll.u32 %v6741_v2, 16  ;;  %v4612_v1 = vshll.u32 %v6742_v22, 16 }
 0x11b   : > { %v8906_v7 = vpop.f32.mrf.mxu1  ;;  %v8908_v4 = vpop.f32.mrf.mxu0  ;;  %v4596_v41 = vrot.slane %v4595_v63, 4  ;;  %v8930_v17 = vsel %vm8047_vm4, %v5431_v3, %v5432_v32  ;;  %v8933_v59 = vadd.f32 %v8867_v42, %v1500_v34  ;;  %v4616_v10 = vshrl.u32 %v6742_v22, 16  ;;  %v6744_v42 = vld [vmem:[%s7976_s25 + $0x3c] sm:$0xf] }
 0x11c   : > { %v4605_v32 = vrot.slane %v4603_v26, 4  ;;  %v4608_v11 = vrot.slane %v4606_v9, 5  ;;  %v9783_v44 = vcombine.low %v8840_v0, %v8856_v38  ;;  %v4614_v3 = vrot.slane %v4612_v1, 5 }
 0x11d   : > { %v8921_v13 = vpop.f32.mrf.mxu1  ;;  %v8923_v55 = vpop.f32.mrf.mxu0  ;;  %9782 = vst [vmem:[#allocation16_spill] sm:$0xff] %v8933_v59  ;;  %v4601_v2 = vsel %vm8066_vm5, %v4596_v41, %v4600_v29  ;;  %v4618_v34 = vrot.slane %v4616_v10, 4  ;;  %v4622_v59 = vshll.u32 %v6743_v50, 16  ;;  %v7896_v29 = vld [vmem:[%s7976_s25 + $0xcc] sm:$0xff]   ;;  %v6873_v26 = vrot.slane %v6829_v14, 9 }
 0x11e   : > { %7591 = vmatmul.mubr.bf16.gmra.mxu1 %v9783_v44  ;;  %v6800_v22 = vcombine.low %v4591_v8, %v4601_v2  ;;  %v4609_v41 = vor.u32 %v4608_v11, %v4605_v32  ;;  %v5436_v53 = vrot.slane %v6830_v30, 5  ;;  %v5439_v9 = vrot.slane %v6831_v57, 5  ;;  %v6832_v32 = vld [vmem:[%s7976_s25 + $0x3c] sm:$0xe]  ;;  %7639 = vmatmul.mubr.bf16.gmra.mxu0 %v7896_v29  ;;  %v6833_v44 = vld [vmem:[%s7976_s25 + $0x40] sm:$0xf] }
 0x11f   : > { %v8937_v40 = vpop.f32.mrf.mxu1  ;;  %v8939_v63 = vpop.f32.mrf.mxu0  ;;  %7658 = vmatprep.mubr.bf16.mxu1 %v6799_v19  ;;  %v4619_v20 = vor.u32 %v4618_v34, %v4614_v3  ;;  %v4624_v0 = vrot.slane %v4622_v59, 5  ;;  %v1505_v38 = vadd.f32 %v8871_v28, %v8695_v5  ;;  %v4627_v8 = vshrl.u32 %v6744_v42, 16  ;;  %v6746_v19 = vld [vmem:[%s7976_s25 + $0x44] sm:$0x1] }
 0x120   : > { %v4610_v50 = vrot.slane %v4609_v41, 4  ;;  %v8959_v1 = vsel %vm8047_vm4, %v6873_v26, %v5436_v53  ;;  %v5438_v10 = vrot.slane %v5436_v53, 4  ;;  %v4630_v14 = vshll.u32 %v6744_v42, 16 }
 0x121   : > { %v8949_v24 = vpop.f32.mrf.mxu1  ;;  %v8951_v48 = vpop.f32.mrf.mxu0  ;;  %v4620_v30 = vrot.slane %v4619_v20, 4  ;;  %v8963_v57 = vadd.f32 %v8873_v54, %v1505_v38  ;;  %v4629_v2 = vrot.slane %v4627_v8, 4  ;;  %v4636_v59 = vshll.u32 %v6745_v37, 16  ;;  %v6834_v54 = vld [vmem:[%s7976_s25 + $0x44] sm:$0x1] }
 0x122   : > { %v4615_v28 = vsel %vm8066_vm5, %v4610_v50, %v4614_v3  ;;  %v5440_v53 = vsel %vm8047_vm4, %v5438_v10, %v5439_v9  ;;  %v4632_v42 = vrot.slane %v4630_v14, 5  ;;  %v4640_v20 = vshrl.u32 %v6745_v37, 16  ;;  %v6747_v10 = vld [vmem:[%s7976_s25 + $0x48] sm:$0xf] }
 0x123   : > { %9784 = vst [vmem:[#allocation17_spill] sm:$0xff] %v8963_v57  ;;  %v8966_v11 = vpop.f32.mrf.mxu1  ;;  %v8968_v5 = vpop.f32.mrf.mxu0  ;;  %v9785_v34 = vcombine.low %v8880_v15, %v8890_v23  ;;  %v4625_v41 = vsel %vm8066_vm5, %v4620_v30, %v4624_v0  ;;  %v6905_v29 = vcombine.low %v8959_v1, %v5440_v53  ;;  %v4638_v26 = vrot.slane %v4636_v59, 5 }
 0x124   : > { %v4646_v38 = vshll.u32 %v6746_v19, 16  ;;  %v6801_v8 = vcombine.low %v4615_v28, %v4625_v41  ;;  %v4633_v3 = vor.u32 %v4632_v42, %v4629_v2  ;;  %v4642_v50 = vrot.slane %v4640_v20, 4  ;;  %v6748_v2 = vld [vmem:[%s7976_s25 + $0x4c] sm:$0xf]  ;;  %v6835_v20 = vld [vmem:[%s7976_s25 + $0x48] sm:$0xe] }
 0x125   : > { %7706 = vmatprep.mubr.bf16.mxu0 %v9785_v34  ;;  %v6874_v9 = vrot.slane %v6832_v32, 9  ;;  %v5443_v14 = vrot.slane %v6833_v44, 5  ;;  %v5446_v57 = vrot.slane %v6834_v54, 5  ;;  %v1503_v15 = vadd.f32 %v8883_v49, %v8709_v16  ;;  %v8985_v23 = vpop.f32.mrf.mxu1  ;;  %v8987_v0 = vpop.f32.mrf.mxu0  ;;  %v6749_v32 = vld [vmem:[%s7976_s25 + $0x50] sm:$0x1] }
 0x126   : > { %7659 = vmatmul.mubr.bf16.vlgmr.msra.gmra.mxu1 %v6800_v22  ;;  %v4648_v37 = vrot.slane %v4646_v38, 5  ;;  %v4634_v1 = vrot.slane %v4633_v3, 4  ;;  %v4643_v19 = vor.u32 %v4642_v50, %v4638_v26  ;;  %v1506_v30 = vadd.f32 %v8893_v52, %v8717_v27  ;;  %v6837_v38 = vld [vmem:[%s7976_s25 + $0x50] sm:$0x1] }
 0x127   : > { %7662 = vmatprep.mubr.bf16.mxu1 %v6801_v8  ;;  %v1504_v22 = vadd.f32 %v8906_v7, %v8732_v36  ;;  %v8996_v59 = vsel %vm8047_vm4, %v6874_v9, %v5443_v14  ;;  %v5445_v16 = vrot.slane %v5443_v14, 4  ;;  %v8999_v49 = vadd.f32 %v8885_v43, %v1503_v15  ;;  %v9002_v53 = vpop.f32.mrf.mxu1  ;;  %v9004_v42 = vpop.f32.mrf.mxu0  ;;  %v6836_v43 = vld [vmem:[%s7976_s25 + $0x4c] sm:$0xf]  ;;  %v6750_v9 = vld [vmem:[%s7976_s25 + $0x54] sm:$0xf] }
 0x128   : > { %v4651_v28 = vshrl.u32 %v6747_v10, 16  ;;  %v4639_v27 = vsel %vm8066_vm5, %v4634_v1, %v4638_v26  ;;  %v4644_v36 = vrot.slane %v4643_v19, 4  ;;  %v9009_v7 = vadd.f32 %v8895_v35, %v1506_v30  ;;  %v6751_v19 = vld [vmem:[%s7976_s25 + $0x58] sm:$0xf] }
 0x129   : > { %v9012_v52 = vadd.f32 %v8908_v4, %v1504_v22  ;;  %v5447_v44 = vsel %vm8047_vm4, %v5445_v16, %v5446_v57  ;;  %v4654_v34 = vshll.u32 %v6747_v10, 16  ;;  %v4660_v41 = vshll.u32 %v6748_v2, 16  ;;  %v9019_v8 = vpop.f32.mrf.mxu1  ;;  %v9021_v26 = vpop.f32.mrf.mxu0 }
 0x12a   : > { %v4653_v54 = vrot.slane %v4651_v28, 4  ;;  %v9786_v35 = vcombine.low %v8913_v61, %v8930_v17  ;;  %v4649_v4 = vsel %vm8066_vm5, %v4644_v36, %v4648_v37  ;;  %v6906_v3 = vcombine.low %v8996_v59, %v5447_v44  ;;  %v6838_v44 = vld [vmem:[%s7976_s25 + $0x54] sm:$0xe] }
 0x12b   : > { %v4664_v50 = vshrl.u32 %v6748_v2, 16  ;;  %v4670_v57 = vshll.u32 %v6749_v32, 16  ;;  %v6802_v10 = vcombine.low %v4639_v27, %v4649_v4  ;;  %v4656_v14 = vrot.slane %v4654_v34, 5  ;;  %v9035_v32 = vpop.f32.mrf.mxu0 }
 0x12c   : > { %7707 = vmatmul.mubr.bf16.vlgmr.msra.gmra.mxu0 %v9786_v35  ;;  %v4662_v15 = vrot.slane %v4660_v41, 5  ;;  %v6875_v1 = vrot.slane %v6835_v20, 9  ;;  %v5450_v61 = vrot.slane %v6836_v43, 5  ;;  %v5453_v17 = vrot.slane %v6837_v38, 5  ;;  %v6752_v20 = vld [vmem:[%s7976_s25 + $0x5c] sm:$0x1] }
 0x12d   : > { %7710 = vmatprep.mubr.bf16.mxu0 %v6905_v29  ;;  %v4666_v30 = vrot.slane %v4664_v50, 4  ;;  %v4672_v22 = vrot.slane %v4670_v57, 5  ;;  %v4657_v16 = vor.u32 %v4656_v14, %v4653_v54  ;;  %v1509_v37 = vadd.f32 %v8921_v13, %v8742_v47  ;;  %v9033_v29 = vpop.f32.mrf.mxu1  ;;  %v6839_v41 = vld [vmem:[%s7976_s25 + $0x58] sm:$0xf]  ;;  %v6840_v57 = vld [vmem:[%s7976_s25 + $0x5c] sm:$0x1] }
 0x12e   : > { %7663 = vmatmul.mubr.bf16.gmra.mxu1 %v6802_v10  ;;  %v4675_v2 = vshrl.u32 %v6750_v9, 16  ;;  %v4678_v59 = vshll.u32 %v6750_v9, 16  ;;  %v5451_v27 = vsel %vm8047_vm4, %v6875_v1, %v5450_v61  ;;  %v5452_v36 = vrot.slane %v5450_v61, 4 }
 0x12f   : > { %v4667_v28 = vor.u32 %v4666_v30, %v4662_v15  ;;  %v4684_v43 = vshll.u32 %v6751_v19, 16  ;;  %v4658_v54 = vrot.slane %v4657_v16, 4  ;;  %v9042_v34 = vadd.f32 %v8923_v55, %v1509_v37  ;;  %v9052_v55 = vpop.f32.mrf.mxu0 }
 0x130   : > { %v4677_v47 = vrot.slane %v4675_v2, 4  ;;  %v4680_v13 = vrot.slane %v4678_v59, 5  ;;  %v5454_v35 = vsel %vm8047_vm4, %v5452_v36, %v5453_v17  ;;  %v4688_v50 = vshrl.u32 %v6751_v19, 16  ;;  %v6753_v2 = vld [vmem:[%s7976_s25 + $0x60] sm:$0xf] }
 0x131   : > { %v4668_v38 = vrot.slane %v4667_v28, 4  ;;  %v4686_v4 = vrot.slane %v4684_v43, 5  ;;  %v4663_v9 = vsel %vm8066_vm5, %v4658_v54, %v4662_v15  ;;  %v6907_v10 = vcombine.low %v5451_v27, %v5454_v35  ;;  %v9050_v30 = vpop.f32.mrf.mxu1  ;;  %v9059_v36 = vpop.f32.mrf.mxu0 }
 0x132   : > { %v4681_v14 = vor.u32 %v4680_v13, %v4677_v47  ;;  %v4694_v1 = vshll.u32 %v6752_v20, 16  ;;  %v4690_v16 = vrot.slane %v4688_v50, 4  ;;  %v6876_v37 = vrot.slane %v6838_v44, 9  ;;  %v6754_v13 = vld [vmem:[%s7976_s25 + $0x64] sm:$0xf] }
 0x133   : > { %v4673_v61 = vsel %vm8066_vm5, %v4668_v38, %v4672_v22  ;;  %v5457_v17 = vrot.slane %v6839_v41, 5  ;;  %v5460_v28 = vrot.slane %v6840_v57, 5  ;;  %v9057_v27 = vpop.f32.mrf.mxu1  ;;  %v1507_v43 = vadd.f32 %v8937_v40, %v8754_v62  ;;  %v6755_v41 = vld [vmem:[%s7976_s25 + $0x68] sm:$0x1]  ;;  %v9075_v50 = vpop.f32.mrf.mxu0 }
 0x134   : > { %7711 = vmatmul.mubr.bf16.gmra.mxu0 %v6906_v3  ;;  %v6803_v19 = vcombine.low %v4663_v9, %v4673_v61  ;;  %v4682_v15 = vrot.slane %v4681_v14, 4  ;;  %v4696_v59 = vrot.slane %v4694_v1, 5  ;;  %v4691_v20 = vor.u32 %v4690_v16, %v4686_v4  ;;  %v6843_v14 = vld [vmem:[%s7976_s25 + $0x68] sm:$0x1] }
 0x135   : > { %7714 = vmatprep.mubr.bf16.mxu0 %v6907_v10  ;;  %v5458_v3 = vsel %vm8047_vm4, %v6876_v37, %v5457_v17  ;;  %v5459_v22 = vrot.slane %v5457_v17, 4  ;;  %v1510_v54 = vadd.f32 %v8949_v24, %v8763_v12  ;;  %v1508_v47 = vadd.f32 %v8966_v11, %v8778_v25  ;;  %v9073_v35 = vpop.f32.mrf.mxu1  ;;  %v6841_v12 = vld [vmem:[%s7976_s25 + $0x60] sm:$0xe]  ;;  %v6842_v24 = vld [vmem:[%s7976_s25 + $0x64] sm:$0xf] }
 0x136   : > { %7666 = vmatprep.mubr.bf16.mxu1 %v6803_v19  ;;  %v4687_v44 = vsel %vm8066_vm5, %v4682_v15, %v4686_v4  ;;  %v4699_v38 = vshrl.u32 %v6753_v2, 16  ;;  %v4692_v57 = vrot.slane %v4691_v20, 4  ;;  %v9080_v40 = vadd.f32 %v8939_v63, %v1507_v43  ;;  %v6756_v15 = vld [vmem:[%s7976_s25 + $0x6c] sm:$0xf] }
 0x137   : > { %v5461_v62 = vsel %vm8047_vm4, %v5459_v22, %v5460_v28  ;;  %v4702_v4 = vshll.u32 %v6753_v2, 16  ;;  %v9085_v11 = vadd.f32 %v8951_v48, %v1510_v54  ;;  %v9088_v9 = vadd.f32 %v8968_v5, %v1508_v47  ;;  %v9094_v48 = vpop.f32.mrf.mxu1  ;;  %v9096_v28 = vpop.f32.mrf.mxu0  ;;  %v6757_v22 = vld [vmem:[%s7976_s25 + $0x70] sm:$0xf] }
 0x138   : > { %v6908_v25 = vcombine.low %v5458_v3, %v5461_v62  ;;  %v4701_v10 = vrot.slane %v4699_v38, 4  ;;  %v4697_v1 = vsel %vm8066_vm5, %v4692_v57, %v4696_v59  ;;  %v4708_v63 = vshll.u32 %v6754_v13, 16 }
 0x139   : > { %9787 = vst [vmem:[#allocation18_spill] sm:$0xff] %v9088_v9  ;;  %v4704_v61 = vrot.slane %v4702_v4, 5  ;;  %v4712_v16 = vshrl.u32 %v6754_v13, 16  ;;  %v6804_v37 = vcombine.low %v4687_v44, %v4697_v1  ;;  %v4718_v17 = vshll.u32 %v6755_v41, 16  ;;  %v6758_v13 = vld [vmem:[%s7976_s25 + $0x74] sm:$0x1] }
 0x13a   : > { %v6877_v2 = vrot.slane %v6841_v12, 9  ;;  %v5464_v19 = vrot.slane %v6842_v24, 5  ;;  %v4710_v20 = vrot.slane %v4708_v63, 5  ;;  %v5467_v59 = vrot.slane %v6843_v14, 5  ;;  %v6844_v4 = vld [vmem:[%s7976_s25 + $0x6c] sm:$0xe] }
 0x13b   : > { %v4705_v5 = vor.u32 %v4704_v61, %v4701_v10  ;;  %v4714_v3 = vrot.slane %v4712_v16, 4  ;;  %7667 = vmatmul.mubr.bf16.gmra.mxu1 %v6804_v37  ;;  %v4720_v43 = vrot.slane %v4718_v17, 5  ;;  %v1513_v47 = vadd.f32 %v8985_v23, %v8785_v31  ;;  %v6845_v14 = vld [vmem:[%s7976_s25 + $0x70] sm:$0xf]  ;;  %v6846_v1 = vld [vmem:[%s7976_s25 + $0x74] sm:$0x1]  ;;  %v9112_v61 = vpop.f32.mrf.mxu1  ;;  %v9114_v63 = vpop.f32.mrf.mxu0 }
 0x13c   : > { %7715 = vmatmul.mubr.bf16.gmra.mxu0 %v6908_v25  ;;  %v5465_v44 = vsel %vm8047_vm4, %v6877_v2, %v5464_v19  ;;  %v5466_v54 = vrot.slane %v5464_v19, 4  ;;  %v4723_v57 = vshrl.u32 %v6756_v15, 16  ;;  %v4726_v62 = vshll.u32 %v6756_v15, 16 }
 0x13d   : > { %v4706_v41 = vrot.slane %v4705_v5, 4  ;;  %v4715_v38 = vor.u32 %v4714_v3, %v4710_v20  ;;  %v9108_v24 = vadd.f32 %v8987_v0, %v1513_v47  ;;  %v4732_v25 = vshll.u32 %v6757_v22, 16  ;;  %v9118_v15 = vpop.f32.mrf.mxu1  ;;  %v9120_v5 = vpop.f32.mrf.mxu0 }
 0x13e   : > { %v5468_v12 = vsel %vm8047_vm4, %v5466_v54, %v5467_v59  ;;  %v4736_v10 = vshrl.u32 %v6757_v22, 16  ;;  %v4725_v37 = vrot.slane %v4723_v57, 4  ;;  %v4728_v17 = vrot.slane %v4726_v62, 5 }
 0x13f   : > { %9788 = vst [vmem:[#allocation19_spill] sm:$0xff] %v9108_v24  ;;  %v4711_v31 = vsel %vm8066_vm5, %v4706_v41, %v4710_v20  ;;  %v4716_v23 = vrot.slane %v4715_v38, 4  ;;  %v6909_v16 = vcombine.low %v5465_v44, %v5468_v12  ;;  %v4734_v2 = vrot.slane %v4732_v25, 5  ;;  %v6759_v20 = vld [vmem:[%s7976_s25 + $0x78] sm:$0xf]  ;;  %v9125_v57 = vpop.f32.mrf.mxu1 }
 0x140   : > { %v4738_v19 = vrot.slane %v4736_v10, 4  ;;  %v4742_v0 = vshll.u32 %v6758_v13, 16  ;;  %v6878_v59 = vrot.slane %v6844_v4, 9  ;;  %v5471_v22 = vrot.slane %v6845_v14, 5  ;;  %v9127_v13 = vpop.f32.mrf.mxu0  ;;  %v6760_v25 = vld [vmem:[%s7976_s25 + $0x7c] sm:$0xf] }
 0x141   : > { %v4721_v3 = vsel %vm8066_vm5, %v4716_v23, %v4720_v43  ;;  %7718 = vmatprep.mubr.bf16.mxu0 %v6909_v16  ;;  %v5474_v54 = vrot.slane %v6846_v1, 5  ;;  %v4729_v47 = vor.u32 %v4728_v17, %v4725_v37  ;;  %v1511_v4 = vadd.f32 %v9002_v53, %v8792_v45  ;;  %v6847_v53 = vld [vmem:[%s7976_s25 + $0x78] sm:$0xe] }
 0x142   : > { %v6805_v44 = vcombine.low %v4711_v31, %v4721_v3  ;;  %v4739_v41 = vor.u32 %v4738_v19, %v4734_v2  ;;  %v4744_v38 = vrot.slane %v4742_v0, 5  ;;  %v5472_v62 = vsel %vm8047_vm4, %v6878_v59, %v5471_v22  ;;  %v6761_v31 = vld [vmem:[%s7976_s25 + $0x80] sm:$0x1]  ;;  %v9159_v3 = vpop.f32.mrf.mxu0 }
 0x143   : > { %v5473_v43 = vrot.slane %v5471_v22, 4  ;;  %v1514_v12 = vadd.f32 %v9019_v8, %v8798_v58  ;;  %v4730_v10 = vrot.slane %v4729_v47, 4  ;;  %v1512_v1 = vadd.f32 %v9033_v29, %v8813_v21  ;;  %v6848_v8 = vld [vmem:[%s7976_s25 + $0x7c] sm:$0xf]  ;;  %v6849_v0 = vld [vmem:[%s7976_s25 + $0x80] sm:$0x1] }
 0x144   : > { %7670 = vmatprep.mubr.bf16.mxu1 %v6805_v44  ;;  %v4740_v14 = vrot.slane %v4739_v41, 4  ;;  %v4747_v23 = vshrl.u32 %v6759_v20, 16  ;;  %v9142_v37 = vadd.f32 %v9004_v42, %v1511_v4  ;;  %v4750_v58 = vshll.u32 %v6759_v20, 16  ;;  %v9157_v42 = vpop.f32.mrf.mxu1  ;;  %v6762_v41 = vld [vmem:[%s7976_s25 + $0x84] sm:$0xf] }
 0x145   : > { %v5475_v16 = vsel %vm8047_vm4, %v5473_v43, %v5474_v54  ;;  %v9145_v45 = vadd.f32 %v9021_v26, %v1514_v12  ;;  %v4735_v17 = vsel %vm8066_vm5, %v4730_v10, %v4734_v2  ;;  %v9154_v19 = vadd.f32 %v9035_v32, %v1512_v1  ;;  %v6763_v4 = vld [vmem:[%s7976_s25 + $0x88] sm:$0xf]  ;;  %v6764_v1 = vld [vmem:[%s7976_s25 + $0x8c] sm:$0x1] }
 0x146   : > { %9789 = vst [vmem:[#allocation20_spill] sm:$0xff] %v9142_v37  ;;  %v4745_v21 = vsel %vm8066_vm5, %v4740_v14, %v4744_v38  ;;  %v6910_v29 = vcombine.low %v5472_v62, %v5475_v16  ;;  %v4749_v59 = vrot.slane %v4747_v23, 4  ;;  %v4752_v22 = vrot.slane %v4750_v58, 5 }
 0x147   : > { %9790 = vst [vmem:[#allocation21_spill] sm:$0xff] %v9145_v45  ;;  %9791 = vst [vmem:[#allocation22_spill] sm:$0xff] %v9154_v19  ;;  %v6806_v26 = vcombine.low %v4735_v17, %v4745_v21  ;;  %v4756_v54 = vshll.u32 %v6760_v25, 16  ;;  %v4760_v2 = vshrl.u32 %v6760_v25, 16  ;;  %v4766_v20 = vshll.u32 %v6761_v31, 16  ;;  %v9168_v31 = vpop.f32.mrf.mxu1  ;;  %v9170_v23 = vpop.f32.mrf.mxu0 }
 0x148   : > { %7719 = vmatmul.mubr.bf16.gmra.mxu0 %v6910_v29  ;;  %v6879_v44 = vrot.slane %v6847_v53, 9  ;;  %v5478_v47 = vrot.slane %v6848_v8, 5  ;;  %v4753_v32 = vor.u32 %v4752_v22, %v4749_v59  ;;  %v5481_v62 = vrot.slane %v6849_v0, 5  ;;  %v6851_v0 = vld [vmem:[%s7976_s25 + $0x88] sm:$0xf] }
 0x149   : > { %7671 = vmatmul.mubr.bf16.gmra.mxu1 %v6806_v26  ;;  %v4758_v38 = vrot.slane %v4756_v54, 5  ;;  %v1517_v43 = vadd.f32 %v9050_v30, %v8655_v33  ;;  %v4762_v12 = vrot.slane %v4760_v2, 4  ;;  %v4768_v10 = vrot.slane %v4766_v20, 5  ;;  %v6850_v30 = vld [vmem:[%s7976_s25 + $0x84] sm:$0xe]  ;;  %v9180_v59 = vpop.f32.mrf.mxu1  ;;  %v9182_v22 = vpop.f32.mrf.mxu0 }
 0x14a   : > { %v5479_v25 = vsel %vm8047_vm4, %v6879_v44, %v5478_v47  ;;  %v5480_v14 = vrot.slane %v5478_v47, 4  ;;  %v4754_v16 = vrot.slane %v4753_v32, 4  ;;  %v4771_v53 = vshrl.u32 %v6762_v41, 16  ;;  %v6852_v26 = vld [vmem:[%s7976_s25 + $0x8c] sm:$0x1] }
 0x14b   : > { %v9173_v58 = vadd.f32 %v9052_v55, %v1517_v43  ;;  %v4774_v33 = vshll.u32 %v6762_v41, 16  ;;  %v4763_v8 = vor.u32 %v4762_v12, %v4758_v38  ;;  %v4780_v21 = vshll.u32 %v6763_v4, 16  ;;  %v9188_v43 = vpop.f32.mrf.mxu0 }
 0x14c   : > { %v5482_v17 = vsel %vm8047_vm4, %v5480_v14, %v5481_v62  ;;  %v4784_v29 = vshrl.u32 %v6763_v4, 16  ;;  %v4759_v54 = vsel %vm8066_vm5, %v4754_v16, %v4758_v38  ;;  %v4773_v2 = vrot.slane %v4771_v53, 4  ;;  %v9186_v62 = vpop.f32.mrf.mxu1 }
 0x14d   : > { %9792 = vst [vmem:[#allocation23_spill] sm:$0xff] %v9173_v58  ;;  %v6911_v55 = vcombine.low %v5479_v25, %v5482_v17  ;;  %v4776_v20 = vrot.slane %v4774_v33, 5  ;;  %v4764_v44 = vrot.slane %v4763_v8, 4  ;;  %v4782_v47 = vrot.slane %v4780_v21, 5 }
 0x14e   : > { %v4786_v41 = vrot.slane %v4784_v29, 4  ;;  %v4790_v32 = vshll.u32 %v6764_v1, 16  ;;  %v6880_v12 = vrot.slane %v6850_v30, 9  ;;  %v5485_v14 = vrot.slane %v6851_v0, 5  ;;  %v6765_v1 = vld [vmem:[%s7976_s25 + $0x90] sm:$0xf] }
 0x14f   : > { %7722 = vmatprep.mubr.bf16.mxu0 %v6911_v55  ;;  %v4777_v4 = vor.u32 %v4776_v20, %v4773_v2  ;;  %v5488_v58 = vrot.slane %v6852_v26, 5  ;;  %v4769_v38 = vsel %vm8066_vm5, %v4764_v44, %v4768_v10  ;;  %v1515_v53 = vadd.f32 %v9057_v27, %v8662_v39  ;;  %v6766_v39 = vld [vmem:[%s7976_s25 + $0x94] sm:$0xf]  ;;  %v6767_v27 = vld [vmem:[%s7976_s25 + $0x98] sm:$0x1]  ;;  %v9206_v26 = vpop.f32.mrf.mxu1 }
 0x150   : > { %v4787_v25 = vor.u32 %v4786_v41, %v4782_v47  ;;  %v4792_v16 = vrot.slane %v4790_v32, 5  ;;  %v6807_v33 = vcombine.low %v4759_v54, %v4769_v38  ;;  %v5486_v17 = vsel %vm8047_vm4, %v6880_v12, %v5485_v14  ;;  %v9208_v54 = vpop.f32.mrf.mxu0  ;;  %v6855_v32 = vld [vmem:[%s7976_s25 + $0x98] sm:$0x1] }
 0x151   : > { %v4778_v8 = vrot.slane %v4777_v4, 4  ;;  %v5487_v30 = vrot.slane %v5485_v14, 4  ;;  %v9198_v29 = vadd.f32 %v9059_v36, %v1515_v53  ;;  %v1518_v10 = vadd.f32 %v9073_v35, %v8674_v51  ;;  %v6853_v51 = vld [vmem:[%s7976_s25 + $0x90] sm:$0xe]  ;;  %v6854_v35 = vld [vmem:[%s7976_s25 + $0x94] sm:$0xf] }
 0x152   : > { %v4788_v21 = vrot.slane %v4787_v25, 4  ;;  %v1516_v0 = vadd.f32 %v9094_v48, %v8685_v60  ;;  %7674 = vmatprep.mubr.bf16.mxu1 %v6807_v33  ;;  %v4795_v2 = vshrl.u32 %v6765_v1, 16  ;;  %v4798_v20 = vshll.u32 %v6765_v1, 16 }
 0x153   : > { %9793 = vst [vmem:[#allocation24_spill] sm:$0xff] %v9198_v29  ;;  %v4783_v55 = vsel %vm8066_vm5, %v4778_v8, %v4782_v47  ;;  %v5489_v36 = vsel %vm8047_vm4, %v5487_v30, %v5488_v58  ;;  %v9219_v44 = vadd.f32 %v9075_v50, %v1518_v10  ;;  %v4804_v12 = vshll.u32 %v6766_v39, 16  ;;  %v9226_v1 = vpop.f32.mrf.mxu1  ;;  %v9228_v50 = vpop.f32.mrf.mxu0  ;;  %v6769_v30 = vld [vmem:[%s7976_s25 + $0xa0] sm:$0xf] }
 0x154   : > { %v4793_v60 = vsel %vm8066_vm5, %v4788_v21, %v4792_v16  ;;  %v6912_v48 = vcombine.low %v5486_v17, %v5489_v36  ;;  %v9222_v41 = vadd.f32 %v9096_v28, %v1516_v0  ;;  %v4797_v4 = vrot.slane %v4795_v2, 4  ;;  %v6768_v16 = vld [vmem:[%s7976_s25 + $0x9c] sm:$0xf] }
 0x155   : > { %9794 = vst [vmem:[#allocation25_spill] sm:$0xff] %v9219_v44  ;;  %v6808_v47 = vcombine.low %v4783_v55, %v4793_v60  ;;  %v4800_v58 = vrot.slane %v4798_v20, 5  ;;  %v4808_v14 = vshrl.u32 %v6766_v39, 16  ;;  %v4814_v38 = vshll.u32 %v6767_v27, 16  ;;  %v6770_v27 = vld [vmem:[%s7976_s25 + $0xa4] sm:$0x1]  ;;  %v9236_v55 = vpop.f32.mrf.mxu1  ;;  %v9238_v36 = vpop.f32.mrf.mxu0 }
 0x156   : > { %9795 = vst [vmem:[#allocation26_spill] sm:$0xff] %v9222_v41  ;;  %7723 = vmatmul.mubr.bf16.gmra.mxu0 %v6912_v48  ;;  %v6881_v25 = vrot.slane %v6853_v51, 9  ;;  %v5492_v53 = vrot.slane %v6854_v35, 5  ;;  %v4806_v33 = vrot.slane %v4804_v12, 5  ;;  %v5495_v8 = vrot.slane %v6855_v32, 5 }
 0x157   : > { %7675 = vmatmul.mubr.bf16.gmra.mxu1 %v6808_v47  ;;  %v4801_v28 = vor.u32 %v4800_v58, %v4797_v4  ;;  %v1521_v17 = vadd.f32 %v9112_v61, %v8697_v6  ;;  %v4810_v21 = vrot.slane %v4808_v14, 4  ;;  %v4816_v10 = vrot.slane %v4814_v38, 5  ;;  %v6856_v61 = vld [vmem:[%s7976_s25 + $0x9c] sm:$0xe]  ;;  %v6857_v47 = vld [vmem:[%s7976_s25 + $0xa0] sm:$0xf]  ;;  %v9248_v58 = vpop.f32.mrf.mxu1  ;;  %v9250_v12 = vpop.f32.mrf.mxu0 }
 0x158   : > { %v5493_v0 = vsel %vm8047_vm4, %v6881_v25, %v5492_v53  ;;  %v5494_v39 = vrot.slane %v5492_v53, 4  ;;  %v4819_v51 = vshrl.u32 %v6768_v16, 16  ;;  %v4822_v6 = vshll.u32 %v6768_v16, 16  ;;  %v6858_v4 = vld [vmem:[%s7976_s25 + $0xa4] sm:$0x1] }
 0x159   : > { %v4802_v2 = vrot.slane %v4801_v28, 4  ;;  %v9241_v20 = vadd.f32 %v9114_v63, %v1521_v17  ;;  %v4811_v35 = vor.u32 %v4810_v21, %v4806_v33  ;;  %v4828_v48 = vshll.u32 %v6769_v30, 16  ;;  %v9256_v41 = vpop.f32.mrf.mxu0 }
 0x15a   : > { %v5496_v60 = vsel %vm8047_vm4, %v5494_v39, %v5495_v8  ;;  %v4832_v32 = vshrl.u32 %v6769_v30, 16  ;;  %v4821_v38 = vrot.slane %v4819_v51, 4  ;;  %v4824_v25 = vrot.slane %v4822_v6, 5  ;;  %v9254_v8 = vpop.f32.mrf.mxu1 }
 0x15b   : > { %9796 = vst [vmem:[#allocation27_spill] sm:$0xff] %v9241_v20  ;;  %v4807_v14 = vsel %vm8066_vm5, %v4802_v2, %v4806_v33  ;;  %v6913_v63 = vcombine.low %v5493_v0, %v5496_v60  ;;  %v4812_v53 = vrot.slane %v4811_v35, 4  ;;  %v4830_v16 = vrot.slane %v4828_v48, 5 }
 0x15c   : > { %v4834_v28 = vrot.slane %v4832_v32, 4  ;;  %v4838_v17 = vshll.u32 %v6770_v27, 16  ;;  %v4825_v30 = vor.u32 %v4824_v25, %v4821_v38  ;;  %v6882_v21 = vrot.slane %v6856_v61, 9  ;;  %v6771_v27 = vld [vmem:[%s7976_s25 + $0xa8] sm:$0xf]  ;;  %v9263_v6 = vpop.f32.mrf.mxu1 }
 0x15d   : > { %7726 = vmatprep.mubr.bf16.mxu0 %v6913_v63  ;;  %v5499_v39 = vrot.slane %v6857_v47, 5  ;;  %v5502_v20 = vrot.slane %v6858_v4, 5  ;;  %v4817_v33 = vsel %vm8066_vm5, %v4812_v53, %v4816_v10  ;;  %v1519_v51 = vadd.f32 %v9118_v15, %v8711_v18  ;;  %v9798_v10 = vld [vmem:[#allocation3_spill] sm:$0xff]  ;;  %v9799_v63 = vld [vmem:[#allocation4_spill] sm:$0xff] }
 0x15e   : > { %v4835_v0 = vor.u32 %v4834_v28, %v4830_v16  ;;  %v4840_v2 = vrot.slane %v4838_v17, 5  ;;  %v6809_v35 = vcombine.low %v4807_v14, %v4817_v33  ;;  %v4826_v61 = vrot.slane %v4825_v30, 4  ;;  %v6772_v15 = vld [vmem:[%s7976_s25 + $0xac] sm:$0xf]  ;;  %v6773_v14 = vld [vmem:[%s7976_s25 + $0xb0] sm:$0x1]  ;;  %v9276_v38 = vpop.f32.mrf.mxu1 }
 0x15f   : > { %v5500_v60 = vsel %vm8047_vm4, %v6882_v21, %v5499_v39  ;;  %v5501_v48 = vrot.slane %v5499_v39, 4  ;;  %v9268_v47 = vadd.f32 %v9120_v5, %v1519_v51  ;;  %v1522_v4 = vadd.f32 %v9125_v57, %v9798_v10  ;;  %v6859_v17 = vld [vmem:[%s7976_s25 + $0xa8] sm:$0xe]  ;;  %v6860_v30 = vld [vmem:[%s7976_s25 + $0xac] sm:$0xf]  ;;  %v9284_v57 = vpop.f32.mrf.mxu0 }
 0x160   : > { %v4836_v32 = vrot.slane %v4835_v0, 4  ;;  %v1520_v18 = vadd.f32 %v9157_v42, %v9799_v63  ;;  %7678 = vmatprep.mubr.bf16.mxu1 %v6809_v35  ;;  %v4831_v25 = vsel %vm8066_vm5, %v4826_v61, %v4830_v16  ;;  %v4843_v5 = vshrl.u32 %v6771_v27, 16  ;;  %v6861_v16 = vld [vmem:[%s7976_s25 + $0xb0] sm:$0x1]  ;;  %v9295_v0 = vpop.f32.mrf.mxu1 }
 0x161   : > { %9797 = vst [vmem:[#allocation28_spill] sm:$0xff] %v9268_v47  ;;  %v5503_v53 = vsel %vm8047_vm4, %v5501_v48, %v5502_v20  ;;  %v4846_v28 = vshll.u32 %v6771_v27, 16  ;;  %v9289_v39 = vadd.f32 %v9127_v13, %v1522_v4  ;;  %v4852_v35 = vshll.u32 %v6772_v15, 16  ;;  %v9297_v61 = vpop.f32.mrf.mxu0 }
 0x162   : > { %v4841_v42 = vsel %vm8066_vm5, %v4836_v32, %v4840_v2  ;;  %v6914_v21 = vcombine.low %v5500_v60, %v5503_v53  ;;  %v9292_v33 = vadd.f32 %v9159_v3, %v1520_v18  ;;  %v4845_v51 = vrot.slane %v4843_v5, 4  ;;  %v6774_v32 = vld [vmem:[%s7976_s25 + $0xb4] sm:$0xf]  ;;  %v9300_v10 = vpop.f32.mrf.mxu1  ;;  %v6775_v53 = vld [vmem:[%s7976_s25 + $0xb8] sm:$0xf] }
 0x163   : > { %9800 = vst [vmem:[#allocation3_spill] sm:$0xff] %v9289_v39  ;;  %v6810_v20 = vcombine.low %v4831_v25, %v4841_v42  ;;  %v4848_v27 = vrot.slane %v4846_v28, 5  ;;  %v4856_v2 = vshrl.u32 %v6772_v15, 16  ;;  %v4862_v48 = vshll.u32 %v6773_v14, 16  ;;  %v9802_v18 = vld [vmem:[#allocation5_spill] sm:$0xff]  ;;  %v9305_v5 = vpop.f32.mrf.mxu0 }
 0x164   : > { %9801 = vst [vmem:[#allocation4_spill] sm:$0xff] %v9292_v33  ;;  %7727 = vmatmul.mubr.bf16.gmra.mxu0 %v6914_v21  ;;  %v6883_v60 = vrot.slane %v6859_v17, 9  ;;  %v5506_v13 = vrot.slane %v6860_v30, 5  ;;  %v4854_v4 = vrot.slane %v4852_v35, 5  ;;  %v5509_v63 = vrot.slane %v6861_v16, 5  ;;  %v9310_v42 = vpop.f32.mrf.mxu1 }
 0x165   : > { %7679 = vmatmul.mubr.bf16.gmra.mxu1 %v6810_v20  ;;  %v4849_v3 = vor.u32 %v4848_v27, %v4845_v51  ;;  %v1525_v25 = vadd.f32 %v9168_v31, %v9802_v18  ;;  %v4858_v28 = vrot.slane %v4856_v2, 4  ;;  %v4864_v15 = vrot.slane %v4862_v48, 5  ;;  %v6776_v30 = vld [vmem:[%s7976_s25 + $0xbc] sm:$0x1]  ;;  %v6862_v51 = vld [vmem:[%s7976_s25 + $0xb4] sm:$0xe]  ;;  %v9316_v27 = vpop.f32.mrf.mxu0 }
 0x166   : > { %v5507_v14 = vsel %vm8047_vm4, %v6883_v60, %v5506_v13  ;;  %v5508_v17 = vrot.slane %v5506_v13, 4  ;;  %v4867_v20 = vshrl.u32 %v6774_v32, 16  ;;  %v4870_v31 = vshll.u32 %v6774_v32, 16  ;;  %v6863_v60 = vld [vmem:[%s7976_s25 + $0xb8] sm:$0xf]  ;;  %v9322_v33 = vpop.f32.mrf.mxu1 }
 0x167   : > { %v4850_v21 = vrot.slane %v4849_v3, 4  ;;  %v9313_v16 = vadd.f32 %v9170_v23, %v1525_v25  ;;  %v4859_v35 = vor.u32 %v4858_v28, %v4854_v4  ;;  %v4876_v48 = vshll.u32 %v6775_v53, 16  ;;  %v6864_v13 = vld [vmem:[%s7976_s25 + $0xbc] sm:$0x1]  ;;  %v9328_v19 = vpop.f32.mrf.mxu0 }
 0x168   : > { %v5510_v2 = vsel %vm8047_vm4, %v5508_v17, %v5509_v63  ;;  %v4880_v18 = vshrl.u32 %v6775_v53, 16  ;;  %v4869_v25 = vrot.slane %v4867_v20, 4  ;;  %v4886_v28 = vshll.u32 %v6776_v30, 16  ;;  %v9326_v44 = vpop.f32.mrf.mxu1  ;;  %v9804_v20 = vld [vmem:[#allocation6_spill] sm:$0xff]  ;;  %v6777_v30 = vld [vmem:[%s7976_s25 + $0xc0] sm:$0xf] }
 0x169   : > { %9803 = vst [vmem:[#allocation5_spill] sm:$0xff] %v9313_v16  ;;  %v4855_v3 = vsel %vm8066_vm5, %v4850_v21, %v4854_v4  ;;  %v6915_v23 = vcombine.low %v5507_v14, %v5510_v2  ;;  %v4872_v16 = vrot.slane %v4870_v31, 5  ;;  %v4860_v32 = vrot.slane %v4859_v35, 4 }
 0x16a   : > { %v4878_v39 = vrot.slane %v4876_v48, 5  ;;  %v4882_v47 = vrot.slane %v4880_v18, 4  ;;  %v6884_v53 = vrot.slane %v6862_v51, 9  ;;  %v5513_v17 = vrot.slane %v6863_v60, 5  ;;  %v9335_v35 = vpop.f32.mrf.mxu1  ;;  %v9339_v18 = vpop.f32.mrf.mxu0  ;;  %v9806_v60 = vld [vmem:[#allocation7_spill] sm:$0xff] }
 0x16b   : > { %7730 = vmatprep.mubr.bf16.mxu0 %v6915_v23  ;;  %v4873_v63 = vor.u32 %v4872_v16, %v4869_v25  ;;  %v5516_v29 = vrot.slane %v6864_v13, 5  ;;  %v4865_v4 = vsel %vm8066_vm5, %v4860_v32, %v4864_v15  ;;  %v4888_v21 = vrot.slane %v4886_v28, 5  ;;  %v9807_v13 = vld [vmem:[#allocation8_spill] sm:$0xff] }
 0x16c   : > { %v4883_v14 = vor.u32 %v4882_v47, %v4878_v39  ;;  %v1523_v31 = vadd.f32 %v9180_v59, %v9804_v20  ;;  %v6811_v2 = vcombine.low %v4855_v3, %v4865_v4  ;;  %v5514_v51 = vsel %vm8047_vm4, %v6884_v53, %v5513_v17  ;;  %v6778_v3 = vld [vmem:[%s7976_s25 + $0xc4] sm:$0xf]  ;;  %v6779_v25 = vld [vmem:[%s7976_s25 + $0xc8] sm:$0x1]  ;;  %v9350_v32 = vpop.f32.mrf.mxu1 }
 0x16d   : > { %v4874_v16 = vrot.slane %v4873_v63, 4  ;;  %v5515_v48 = vrot.slane %v5513_v17, 4  ;;  %v1526_v59 = vadd.f32 %v9186_v62, %v9806_v60  ;;  %v1524_v23 = vadd.f32 %v9206_v26, %v9807_v13  ;;  %v6865_v17 = vld [vmem:[%s7976_s25 + $0xc0] sm:$0xe]  ;;  %v6866_v4 = vld [vmem:[%s7976_s25 + $0xc4] sm:$0xf]  ;;  %v9358_v62 = vpop.f32.mrf.mxu0 }
 0x16e   : > { %v4884_v15 = vrot.slane %v4883_v14, 4  ;;  %v9342_v47 = vadd.f32 %v9182_v22, %v1523_v31  ;;  %7682 = vmatprep.mubr.bf16.mxu1 %v6811_v2  ;;  %v4891_v22 = vshrl.u32 %v6777_v30, 16  ;;  %v4894_v53 = vshll.u32 %v6777_v30, 16  ;;  %v9369_v2 = vpop.f32.mrf.mxu1 }
 0x16f   : > { %v4879_v28 = vsel %vm8066_vm5, %v4874_v16, %v4878_v39  ;;  %v5517_v63 = vsel %vm8047_vm4, %v5515_v48, %v5516_v29  ;;  %v9363_v20 = vadd.f32 %v9188_v43, %v1526_v59  ;;  %v9366_v31 = vadd.f32 %v9208_v54, %v1524_v23  ;;  %v6867_v39 = vld [vmem:[%s7976_s25 + $0xc8] sm:$0x1]  ;;  %v9371_v60 = vpop.f32.mrf.mxu0  ;;  %v6780_v59 = vld [vmem:[%s7976_s25 + $0xcc] sm:$0xf] }
 0x170   : > { %9805 = vst [vmem:[#allocation6_spill] sm:$0xff] %v9342_v47  ;;  %v4889_v26 = vsel %vm8066_vm5, %v4884_v15, %v4888_v21  ;;  %v6916_v14 = vcombine.low %v5514_v51, %v5517_v63  ;;  %v4893_v30 = vrot.slane %v4891_v22, 4  ;;  %v4896_v16 = vrot.slane %v4894_v53, 5  ;;  %v9374_v13 = vpop.f32.mrf.mxu1  ;;  %v9811_v63 = vld [vmem:[#allocation9_spill] sm:$0xff] }
 0x171   : > { %9808 = vst [vmem:[#allocation7_spill] sm:$0xff] %v9363_v20  ;;  %9809 = vst [vmem:[#allocation8_spill] sm:$0xff] %v9366_v31  ;;  %v6812_v29 = vcombine.low %v4879_v28, %v4889_v26  ;;  %v4900_v48 = vshll.u32 %v6778_v3, 16  ;;  %v4904_v21 = vshrl.u32 %v6778_v3, 16  ;;  %v4910_v51 = vshll.u32 %v6779_v25, 16 }
 0x172   : > { %7731 = vmatmul.mubr.bf16.gmra.mxu0 %v6916_v14  ;;  %v6885_v15 = vrot.slane %v6865_v17, 9  ;;  %v5520_v43 = vrot.slane %v6866_v4, 5  ;;  %9810 = vst [vmem:[#allocation29_spill] sm:$0xff] %v9374_v13  ;;  %v4897_v54 = vor.u32 %v4896_v16, %v4893_v30  ;;  %v5523_v28 = vrot.slane %v6867_v39, 5  ;;  %v6781_v53 = vld [vmem:[%s7976_s25 + $0xd0] sm:$0xf]  ;;  %v9382_v4 = vpop.f32.mrf.mxu0 }
 0x173   : > { %7683 = vmatmul.mubr.bf16.gmra.mxu1 %v6812_v29  ;;  %v4902_v23 = vrot.slane %v4900_v48, 5  ;;  %v1529_v22 = vadd.f32 %v9226_v1, %v9811_v63  ;;  %v4906_v26 = vrot.slane %v4904_v21, 4  ;;  %v4912_v14 = vrot.slane %v4910_v51, 5  ;;  %v6782_v17 = vld [vmem:[%s7976_s25 + $0xd4] sm:$0x1]  ;;  %v9384_v29 = vpop.f32.mrf.mxu1 }
 0x174   : > { %v5521_v3 = vsel %vm8047_vm4, %v6885_v15, %v5520_v43  ;;  %v5522_v25 = vrot.slane %v5520_v43, 4  ;;  %9812 = vst [vmem:[#allocation9_spill] sm:$0xff] %v9384_v29  ;;  %v4898_v30 = vrot.slane %v4897_v54, 4  ;;  %v4915_v16 = vshrl.u32 %v6780_v59, 16  ;;  %v6868_v48 = vld [vmem:[%s7976_s25 + $0xcc] sm:$0xe]  ;;  %v9394_v20 = vpop.f32.mrf.mxu0 }
 0x175   : > { %v9387_v39 = vadd.f32 %v9228_v50, %v1529_v22  ;;  %v4918_v1 = vshll.u32 %v6780_v59, 16  ;;  %v4907_v21 = vor.u32 %v4906_v26, %v4902_v23  ;;  %v4924_v63 = vshll.u32 %v6781_v53, 16  ;;  %v6869_v15 = vld [vmem:[%s7976_s25 + $0xd0] sm:$0xf]  ;;  %v6870_v43 = vld [vmem:[%s7976_s25 + $0xd4] sm:$0x1]  ;;  %v9396_v47 = vpop.f32.mrf.mxu1 }
 0x176   : > { %v5524_v51 = vsel %vm8047_vm4, %v5522_v25, %v5523_v28  ;;  %v4928_v31 = vshrl.u32 %v6781_v53, 16  ;;  %9814 = vst [vmem:[#allocation31_spill] sm:$0xff] %v9396_v47  ;;  %v4903_v54 = vsel %vm8066_vm5, %v4898_v30, %v4902_v23  ;;  %v4917_v22 = vrot.slane %v4915_v16, 4  ;;  %v9400_v24 = vpop.f32.mrf.mxu0 }
 0x177   : > { %9813 = vst [vmem:[#allocation30_spill] sm:$0xff] %v9387_v39  ;;  %v6917_v50 = vcombine.low %v5521_v3, %v5524_v51  ;;  %v4920_v39 = vrot.slane %v4918_v1, 5  ;;  %v4908_v59 = vrot.slane %v4907_v21, 4  ;;  %v4926_v45 = vrot.slane %v4924_v63, 5  ;;  %v2468_v28 = vpop.f32.mrf.mxu1  ;;  %v9815_v3 = vld [vmem:[#allocation10_spill] sm:$0xff]  ;;  %v9816_v63 = vld [vmem:[#allocation11_spill] sm:$0xff] }
 0x178   : > { %v4930_v26 = vrot.slane %v4928_v31, 4  ;;  %v4934_v37 = vshll.u32 %v6782_v17, 16  ;;  %v6886_v25 = vrot.slane %v6868_v48, 9  ;;  %v5527_v29 = vrot.slane %v6869_v15, 5  ;;  %v3273_v16 = vpop.f32.mrf.mxu0  ;;  %v9817_v15 = vld [vmem:[#allocation12_spill] sm:$0xff] }
 0x179   : > { %7734 = vmatprep.mubr.bf16.mxu0 %v6917_v50  ;;  %v4921_v53 = vor.u32 %v4920_v39, %v4917_v22  ;;  %v5530_v9 = vrot.slane %v6870_v43, 5  ;;  %v4913_v47 = vsel %vm8066_vm5, %v4908_v59, %v4912_v14  ;;  %v1527_v30 = vadd.f32 %v9236_v55, %v9815_v3  ;;  %v7481_v1 = vpop.f32.mrf.mxu1 }
 0x17a   : > { %v4931_v13 = vor.u32 %v4930_v26, %v4926_v45  ;;  %v4936_v23 = vrot.slane %v4934_v37, 5  ;;  %v6813_v31 = vcombine.low %v4903_v54, %v4913_v47  ;;  %v5528_v21 = vsel %vm8047_vm4, %v6886_v25, %v5527_v29  ;;  %v9818_v54 = vld [vmem:[#allocation13_spill] sm:$0xff]  ;;  %v9821_v26 = vld [vmem:[#allocation16_spill] sm:$0xff] }
 0x17b   : > { %v4922_v17 = vrot.slane %v4921_v53, 4  ;;  %v5529_v51 = vrot.slane %v5527_v29, 4  ;;  %v9409_v48 = vadd.f32 %v9238_v36, %v1527_v30  ;;  %v1530_v14 = vadd.f32 %v9248_v58, %v9816_v63  ;;  %v2471_v43 = vpop.f32.mrf.mxu1  ;;  %v9819_v29 = vld [vmem:[#allocation14_spill] sm:$0xff]  ;;  %v9822_v53 = vld [vmem:[#allocation17_spill] sm:$0xff]  ;;  %v9826_v30 = vld [vmem:[#allocation19_spill] sm:$0xff] }
 0x17c   : > { %v4932_v39 = vrot.slane %v4931_v13, 4  ;;  %v1528_v37 = vadd.f32 %v9254_v8, %v9817_v15  ;;  %7686 = vmatprep.mubr.bf16.mxu1 %v6813_v31  ;;  %v2549_v13 = vadd.f32 %v9263_v6, %v9818_v54  ;;  %v2547_v36 = vadd.f32 %v9276_v38, %v9819_v29  ;;  %v9820_v38 = vld [vmem:[#allocation15_spill] sm:$0xff] }
 0x17d   : > { %v4927_v55 = vsel %vm8066_vm5, %v4922_v17, %v4926_v45  ;;  %v5531_v47 = vsel %vm8047_vm4, %v5529_v51, %v5530_v9  ;;  %v9426_v8 = vadd.f32 %v9250_v12, %v1530_v14  ;;  %v7528_v45 = vpop.f32.mrf.mxu0  ;;  %v7484_v59 = vpop.f32.mrf.mxu1  ;;  %v2550_v56 = vadd.f32 %v9295_v0, %v9820_v38  ;;  %v9828_v17 = vld [vmem:[#allocation20_spill] sm:$0xff]  ;;  %v9829_v51 = vld [vmem:[#allocation21_spill] sm:$0xff]  ;;  %v9831_v15 = vld [vmem:[#allocation23_spill] sm:$0xff] }
 0x17e   : > { %v4937_v58 = vsel %vm8066_vm5, %v4932_v39, %v4936_v23  ;;  %v6918_v50 = vcombine.low %v5528_v21, %v5531_v47  ;;  %v9429_v22 = vadd.f32 %v9256_v41, %v1528_v37  ;;  %v9432_v9 = vadd.f32 %v9284_v57, %v2549_v13 }
 0x17f   : > { %v6814_v46 = vcombine.low %v4927_v55, %v4937_v58  ;;  %v9435_v6 = vadd.f32 %v9297_v61, %v2547_v36  ;;  %v2548_v12 = vadd.f32 %v9300_v10, %v9821_v26  ;;  %v2553_v41 = vadd.f32 %v9310_v42, %v9822_v53  ;;  %v3286_v23 = vpop.f32.mrf.mxu0  ;;  %v2484_v3 = vpop.f32.mrf.mxu1  ;;  %v9833_v36 = vld [vmem:[#allocation25_spill] sm:$0xff]  ;;  %v9834_v58 = vld [vmem:[#allocation26_spill] sm:$0xff] }
 0x180   : > { %7735 = vmatmul.mubr.bf16.gmra.mxu0 %v6918_v50  ;;  %v2551_v25 = vadd.f32 %v9322_v33, %v8999_v49  ;;  %v2554_v57 = vadd.f32 %v9326_v44, %v9009_v7  ;;  %v9448_v61 = vadd.f32 %v9305_v5, %v2550_v56  ;;  %v2552_v0 = vadd.f32 %v9335_v35, %v9012_v52 }
 0x181   : > { %7687 = vmatmul.mubr.bf16.gmra.mxu1 %v6814_v46  ;;  %v2557_v10 = vadd.f32 %v9350_v32, %v9042_v34  ;;  %v2555_v42 = vadd.f32 %v9369_v2, %v9080_v40  ;;  %v9457_v49 = vadd.f32 %v9316_v27, %v2548_v12  ;;  %v9460_v7 = vadd.f32 %v9328_v19, %v2553_v41  ;;  %v7529_v5 = vpop.f32.mrf.mxu0  ;;  %v7485_v52 = vpop.f32.mrf.mxu1  ;;  %v9823_v19 = vld [vmem:[#allocation29_spill] sm:$0xff]  ;;  %v9824_v32 = vld [vmem:[#allocation18_spill] sm:$0xff]  ;;  %v9837_v41 = vld [vmem:[#allocation3_spill] sm:$0xff] }
 0x182   : > { %v9463_v44 = vadd.f32 %v9339_v18, %v2551_v25  ;;  %v9466_v33 = vadd.f32 %v9358_v62, %v2554_v57  ;;  %v9469_v35 = vadd.f32 %v9371_v60, %v2552_v0  ;;  %v2558_v27 = vadd.f32 %v9823_v19, %v9085_v11  ;;  %v9825_v18 = vld [vmem:[#allocation9_spill] sm:$0xff]  ;;  %v9827_v62 = vld [vmem:[#allocation31_spill] sm:$0xff]  ;;  %v9832_v11 = vld [vmem:[#allocation24_spill] sm:$0xff] }
 0x183   : > { %v9472_v34 = vadd.f32 %v9382_v4, %v2557_v10  ;;  %v9475_v40 = vadd.f32 %v9394_v20, %v2555_v42  ;;  %v2556_v2 = vadd.f32 %v9825_v18, %v9824_v32  ;;  %v2561_v31 = vadd.f32 %v9827_v62, %v9826_v30  ;;  %v3289_v39 = vpop.f32.mrf.mxu0  ;;  %v2487_v63 = vpop.f32.mrf.mxu1  ;;  %v9830_v20 = vld [vmem:[#allocation22_spill] sm:$0xff]  ;;  %v9838_v0 = vld [vmem:[#allocation4_spill] sm:$0xff]  ;;  %v9839_v19 = vld [vmem:[#allocation5_spill] sm:$0xff] }
 0x184   : > { %v2559_v21 = vadd.f32 %v2468_v28, %v9828_v17  ;;  %v2562_v60 = vadd.f32 %v7481_v1, %v9829_v51  ;;  %v9486_v4 = vadd.f32 %v9400_v24, %v2558_v27  ;;  %v2560_v14 = vadd.f32 %v2471_v43, %v9830_v20  ;;  %v9835_v43 = vld [vmem:[#allocation27_spill] sm:$0xff]  ;;  %v9842_v20 = vld [vmem:[#allocation8_spill] sm:$0xff] }
 0x185   : > { %v2565_v37 = vadd.f32 %v7484_v59, %v9831_v15  ;;  %v2563_v55 = vadd.f32 %v2484_v3, %v9832_v11  ;;  %v9491_v47 = vadd.f32 %v3273_v16, %v2556_v2  ;;  %v9493_v54 = vadd.f32 %v7528_v45, %v2561_v31  ;;  %v7488_v1 = vpop.f32.mrf.mxu1  ;;  %v7532_v59 = vpop.f32.mrf.mxu0  ;;  %v9836_v16 = vld [vmem:[#allocation28_spill] sm:$0xff]  ;;  %v9840_v2 = vld [vmem:[#allocation6_spill] sm:$0xff] }
 0x186   : > { %v9495_v13 = vadd.f32 %v3286_v23, %v2559_v21  ;;  %v9497_v28 = vadd.f32 %v7529_v5, %v2562_v60  ;;  %v9499_v29 = vadd.f32 %v3289_v39, %v2560_v14  ;;  %v2566_v24 = vadd.f32 %v7485_v52, %v9833_v36  ;;  %v9841_v21 = vld [vmem:[#allocation7_spill] sm:$0xff] }
 0x187   : > { %v2564_v50 = vadd.f32 %v2487_v63, %v9834_v58  ;;  %v2569_v46 = vadd.f32 %v7488_v1, %v9835_v43  ;;  %v2500_v38 = vpop.f32.mrf.mxu1  ;;  %v9504_v56 = vadd.f32 %v7532_v59, %v2565_v37  ;;  %v3302_v26 = vpop.f32.mrf.mxu0 }
 0x188   : > { %v2567_v45 = vadd.f32 %v2500_v38, %v9836_v16  ;;  %v9507_v53 = vadd.f32 %v3302_v26, %v2563_v55  ;;  %v9843_v55 = vld [vmem:[#allocation30_spill] sm:$0xff] }
 0x189   : > { %v7489_v12 = vpop.f32.mrf.mxu1  ;;  %v7533_v57 = vpop.f32.mrf.mxu0 }
 0x18a   : > { %v2570_v25 = vadd.f32 %v7489_v12, %v9837_v41  ;;  %v9510_v3 = vadd.f32 %v7533_v57, %v2566_v24 }
 0x18b   : > { %v2503_v23 = vpop.f32.mrf.mxu1  ;;  %v3305_v42 = vpop.f32.mrf.mxu0 }
 0x18c   : > { %v2568_v10 = vadd.f32 %v2503_v23, %v9838_v0  ;;  %v9513_v52 = vadd.f32 %v3305_v42, %v2564_v50 }
 0x18d   : > { %v7492_v5 = vpop.f32.mrf.mxu1  ;;  %v7536_v18 = vpop.f32.mrf.mxu0 }
 0x18e   : > { %v2573_v27 = vadd.f32 %v7492_v5, %v9839_v19  ;;  %v9517_v62 = vadd.f32 %v7536_v18, %v2569_v46 }
 0x18f   : > { %v2516_v32 = vpop.f32.mrf.mxu1  ;;  %v3318_v17 = vpop.f32.mrf.mxu0 }
 0x190   : > { %v2571_v30 = vadd.f32 %v2516_v32, %v9840_v2  ;;  %v9520_v60 = vadd.f32 %v3318_v17, %v2567_v45 }
 0x191   : > { %v7493_v31 = vpop.f32.mrf.mxu1  ;;  %v7537_v63 = vpop.f32.mrf.mxu0 }
 0x192   : > { %v2574_v51 = vadd.f32 %v7493_v31, %v9841_v21  ;;  %v9523_v15 = vadd.f32 %v7537_v63, %v2570_v25 }
 0x193   : > { %v2519_v39 = vpop.f32.mrf.mxu1  ;;  %v3321_v11 = vpop.f32.mrf.mxu0 }
 0x194   : > { %v2572_v14 = vadd.f32 %v2519_v39, %v9842_v20  ;;  %v9526_v36 = vadd.f32 %v3321_v11, %v2568_v10 }
 0x195   : > { %v7496_v37 = vpop.f32.mrf.mxu1  ;;  %v7540_v58 = vpop.f32.mrf.mxu0 }
 0x196   : > { %v2577_v1 = vadd.f32 %v7496_v37, %v9843_v55  ;;  %v9529_v43 = vadd.f32 %v7540_v58, %v2573_v27 }
 0x197   : > { %v2532_v24 = vpop.f32.mrf.mxu1  ;;  %v3334_v59 = vpop.f32.mrf.mxu0 }
 0x198   : > { %v2575_v50 = vadd.f32 %v2532_v24, %v9409_v48  ;;  %v9532_v16 = vadd.f32 %v3334_v59, %v2571_v30 }
 0x199   : > { %v7497_v46 = vpop.f32.mrf.mxu1  ;;  %v7541_v26 = vpop.f32.mrf.mxu0 }
 0x19a   : > { %v2578_v38 = vadd.f32 %v7497_v46, %v9426_v8  ;;  %v9535_v41 = vadd.f32 %v7541_v26, %v2574_v51 }
 0x19b   : > { %v2535_v45 = vpop.f32.mrf.mxu1  ;;  %v3337_v25 = vpop.f32.mrf.mxu0 }
 0x19c   : > { %v2576_v12 = vadd.f32 %v2535_v45, %v9429_v22  ;;  %v9537_v57 = vadd.f32 %v3337_v25, %v2572_v14 }
 0x19d   : > { %v7544_v23 = vpop.f32.mrf.mxu0  ;;  %v7564_v42 = vpop.f32.mrf.mxu1 }
 0x19e   : > { %v9539_v0 = vadd.f32 %v7544_v23, %v2577_v1  ;;  %v3961_v8 = vadd.f32 %v7564_v42, %v9432_v9 }
 0x19f   : > { %v3350_v48 = vpop.f32.mrf.mxu0  ;;  %v3832_v27 = vpop.f32.mrf.mxu1 }
 0x1a0   : > { %v9541_v10 = vadd.f32 %v3350_v48, %v2575_v50  ;;  %v3959_v22 = vadd.f32 %v3832_v27, %v9435_v6 }
 0x1a1   : > { %v7545_v5 = vpop.f32.mrf.mxu0  ;;  %v9549_v2 = vpop.f32.mrf.mxu1 }
 0x1a2   : > { %v9544_v19 = vadd.f32 %v7545_v5, %v2578_v38 }
 0x1a3   : > { %v3353_v32 = vpop.f32.mrf.mxu0  ;;  %v9553_v17 = vpop.f32.mrf.mxu1 }
 0x1a4   : > { %v9547_v18 = vadd.f32 %v3353_v32, %v2576_v12 }
 0x1a5   : > { %v7612_v30 = vpop.f32.mrf.mxu0  ;;  %v7568_v39 = vpop.f32.mrf.mxu1 }
 0x1a6   : > { %v9551_v31 = vadd.f32 %v7612_v30, %v3961_v8  ;;  %v3965_v63 = vadd.f32 %v7568_v39, %v9460_v7 }
 0x1a7   : > { %v4283_v21 = vpop.f32.mrf.mxu0  ;;  %v3848_v20 = vpop.f32.mrf.mxu1 }
 0x1a8   : > { %v9555_v51 = vadd.f32 %v4283_v21, %v3959_v22  ;;  %v3963_v6 = vadd.f32 %v3848_v20, %v9463_v44 }
 0x1a9   : > { %v9557_v9 = vpop.f32.mrf.mxu0  ;;  %v9563_v37 = vpop.f32.mrf.mxu1 }
 0x1ab   : > { %v9560_v14 = vpop.f32.mrf.mxu0  ;;  %v9567_v1 = vpop.f32.mrf.mxu1 }
 0x1ad   : > { %v7616_v11 = vpop.f32.mrf.mxu0  ;;  %v7572_v50 = vpop.f32.mrf.mxu1 }
 0x1ae   : > { %v9565_v55 = vadd.f32 %v7616_v11, %v3965_v63  ;;  %v3969_v7 = vadd.f32 %v7572_v50, %v9472_v34 }
 0x1af   : > { %v4299_v24 = vpop.f32.mrf.mxu0  ;;  %v3864_v59 = vpop.f32.mrf.mxu1 }
 0x1b0   : > { %v9569_v58 = vadd.f32 %v4299_v24, %v3963_v6  ;;  %v3967_v44 = vadd.f32 %v3864_v59, %v9475_v40 }
 0x1b1   : > { %v9571_v46 = vpop.f32.mrf.mxu0  ;;  %v9577_v45 = vpop.f32.mrf.mxu1 }
 0x1b3   : > { %v9574_v38 = vpop.f32.mrf.mxu0  ;;  %v9581_v25 = vpop.f32.mrf.mxu1 }
 0x1b5   : > { %v7620_v26 = vpop.f32.mrf.mxu0  ;;  %v7576_v42 = vpop.f32.mrf.mxu1 }
 0x1b6   : > { %v9579_v12 = vadd.f32 %v7620_v26, %v3969_v7  ;;  %v3973_v34 = vadd.f32 %v7576_v42, %v9493_v54 }
 0x1b7   : > { %v4315_v23 = vpop.f32.mrf.mxu0  ;;  %v3880_v8 = vpop.f32.mrf.mxu1 }
 0x1b8   : > { %v9583_v48 = vadd.f32 %v4315_v23, %v3967_v44  ;;  %v3971_v40 = vadd.f32 %v3880_v8, %v9495_v13 }
 0x1b9   : > { %v9585_v5 = vpop.f32.mrf.mxu0  ;;  %v7577_v32 = vpop.f32.mrf.mxu1 }
 0x1ba   : > { %v3974_v30 = vadd.f32 %v7577_v32, %v9497_v28 }
 0x1bb   : > { %v9588_v27 = vpop.f32.mrf.mxu0  ;;  %v3883_v39 = vpop.f32.mrf.mxu1 }
 0x1bc   : > { %v3972_v20 = vadd.f32 %v3883_v39, %v9499_v29 }
 0x1bd   : > { %v7624_v22 = vpop.f32.mrf.mxu0  ;;  %v7580_v11 = vpop.f32.mrf.mxu1 }
 0x1be   : > { %v9592_v21 = vadd.f32 %v7624_v22, %v3973_v34  ;;  %v3977_v54 = vadd.f32 %v7580_v11, %v9504_v56 }
 0x1bf   : > { %v4331_v63 = vpop.f32.mrf.mxu0  ;;  %v3896_v7 = vpop.f32.mrf.mxu1 }
 0x1c0   : > { %v9595_v6 = vadd.f32 %v4331_v63, %v3971_v40  ;;  %v3975_v59 = vadd.f32 %v3896_v7, %v9507_v53 }
 0x1c1   : > { %v7625_v24 = vpop.f32.mrf.mxu0  ;;  %v7581_v28 = vpop.f32.mrf.mxu1 }
 0x1c2   : > { %v9598_v50 = vadd.f32 %v7625_v24, %v3974_v30  ;;  %v3978_v23 = vadd.f32 %v7581_v28, %v9510_v3 }
 0x1c3   : > { %v4334_v13 = vpop.f32.mrf.mxu0  ;;  %v3899_v29 = vpop.f32.mrf.mxu1 }
 0x1c4   : > { %v9601_v44 = vadd.f32 %v4334_v13, %v3972_v20  ;;  %v3976_v8 = vadd.f32 %v3899_v29, %v9513_v52 }
 0x1c5   : > { %v7628_v26 = vpop.f32.mrf.mxu0  ;;  %v7584_v56 = vpop.f32.mrf.mxu1 }
 0x1c6   : > { %v9604_v42 = vadd.f32 %v7628_v26, %v3977_v54  ;;  %v3981_v22 = vadd.f32 %v7584_v56, %v9517_v62 }
 0x1c7   : > { %v4347_v34 = vpop.f32.mrf.mxu0  ;;  %v3912_v53 = vpop.f32.mrf.mxu1 }
 0x1c8   : > { %v9607_v40 = vadd.f32 %v4347_v34, %v3975_v59  ;;  %v3979_v63 = vadd.f32 %v3912_v53, %v9520_v60 }
 0x1c9   : > { %v7629_v32 = vpop.f32.mrf.mxu0  ;;  %v7585_v3 = vpop.f32.mrf.mxu1 }
 0x1ca   : > { %v9610_v30 = vadd.f32 %v7629_v32, %v3978_v23  ;;  %v3982_v24 = vadd.f32 %v7585_v3, %v9523_v15 }
 0x1cb   : > { %v4350_v39 = vpop.f32.mrf.mxu0  ;;  %v3915_v52 = vpop.f32.mrf.mxu1 }
 0x1cc   : > { %v9613_v20 = vadd.f32 %v4350_v39, %v3976_v8  ;;  %v3980_v13 = vadd.f32 %v3915_v52, %v9526_v36 }
 0x1cd   : > { %v7632_v11 = vpop.f32.mrf.mxu0 }
 0x1ce   : > { %v9616_v54 = vadd.f32 %v7632_v11, %v3981_v22 }
 0x1cf   : > { %v4363_v7 = vpop.f32.mrf.mxu0 }
 0x1d0   : > { %v9619_v59 = vadd.f32 %v4363_v7, %v3979_v63  ;;  %v7588_v62 = vpop.f32.mrf.mxu1 }
 0x1d1   : > { %v7633_v28 = vpop.f32.mrf.mxu0  ;;  %v3985_v26 = vadd.f32 %v7588_v62, %v9529_v43 }
 0x1d2   : > { %v9622_v23 = vadd.f32 %v7633_v28, %v3982_v24  ;;  %v3928_v60 = vpop.f32.mrf.mxu1 }
 0x1d3   : > { %v4366_v29 = vpop.f32.mrf.mxu0  ;;  %v3983_v34 = vadd.f32 %v3928_v60, %v9532_v16 }
 0x1d4   : > { %v9625_v8 = vadd.f32 %v4366_v29, %v3980_v13  ;;  %v7589_v15 = vpop.f32.mrf.mxu1 }
 0x1d5   : > { %v3986_v32 = vadd.f32 %v7589_v15, %v9535_v41 }
 0x1d6   : > { %v7636_v56 = vpop.f32.mrf.mxu0  ;;  %v3931_v36 = vpop.f32.mrf.mxu1 }
 0x1d7   : > { %v9628_v22 = vadd.f32 %v7636_v56, %v3985_v26  ;;  %v3984_v39 = vadd.f32 %v3931_v36, %v9537_v57 }
 0x1d8   : > { %v4379_v53 = vpop.f32.mrf.mxu0 }
 0x1d9   : > { %v9631_v63 = vadd.f32 %v4379_v53, %v3983_v34 }
 0x1da   : > { %v7637_v3 = vpop.f32.mrf.mxu0 }
 0x1db   : > { %v9634_v24 = vadd.f32 %v7637_v3, %v3986_v32 }
 0x1dc   : > { %v4382_v52 = vpop.f32.mrf.mxu0 }
 0x1dd   : > { %v9637_v13 = vadd.f32 %v4382_v52, %v3984_v39 }
 0x1de   : > { %v7592_v43 = vpop.f32.mrf.mxu1  ;;  %v7640_v62 = vpop.f32.mrf.mxu0 }
 0x1df   : > { %v3989_v11 = vadd.f32 %v7592_v43, %v9539_v0  ;;  %v3962_v0 = vadd.f32 %v9549_v2, %v9448_v61 }
 0x1e0   : > { %v3944_v16 = vpop.f32.mrf.mxu1  ;;  %v4395_v60 = vpop.f32.mrf.mxu0 }
 0x1e1   : > { %v3987_v7 = vadd.f32 %v3944_v16, %v9541_v10  ;;  %v9640_v26 = vadd.f32 %v7640_v62, %v3989_v11  ;;  %v3960_v10 = vadd.f32 %v9553_v17, %v9457_v49  ;;  %v4413_v39 = vadd.f32 %v9557_v9, %v3962_v0  ;;  %v9660_v49 = vld [vmem:[%s9763_s2] ss:$0 sm:$0xff] }
 0x1e2   : > { %v7593_v41 = vpop.f32.mrf.mxu1  ;;  %v7641_v56 = vpop.f32.mrf.mxu0  ;;  %v3966_v9 = vadd.f32 %v9563_v37, %v9466_v33 }
 0x1e3   : > { %v3990_v28 = vadd.f32 %v7593_v41, %v9544_v19  ;;  %v9645_v34 = vadd.f32 %v4395_v60, %v3987_v7  ;;  %v4411_v3 = vadd.f32 %v9560_v14, %v3960_v10  ;;  %v3964_v41 = vadd.f32 %v9567_v1, %v9469_v35 }
 0x1e4   : > { %v3947_v57 = vpop.f32.mrf.mxu1  ;;  %v4398_v53 = vpop.f32.mrf.mxu0 }
 0x1e5   : > { %v3988_v29 = vadd.f32 %v3947_v57, %v9547_v18  ;;  %v9649_v32 = vadd.f32 %v7641_v56, %v3990_v28  ;;  %v4415_v35 = vadd.f32 %v9574_v38, %v3964_v41  ;;  %v3970_v41 = vadd.f32 %v9577_v45, %v9486_v4 }
 0x1e6   : > { %v7660_v15 = vpop.f32.mrf.mxu1 }
 0x1e7   : > { %v5230_v19 = vadd.f32 %v7660_v15, %v9551_v31  ;;  %v9653_v43 = vadd.f32 %v4398_v53, %v3988_v29  ;;  %v4417_v15 = vadd.f32 %v9571_v46, %v3966_v9  ;;  %v4421_v4 = vadd.f32 %v9585_v5, %v3970_v41 }
 0x1e8   : > { %v5101_v36 = vpop.f32.mrf.mxu1 }
 0x1e9   : > { %v5228_v18 = vadd.f32 %v5101_v36, %v9555_v51 }
 0x1ea   : > { %v7661_v61 = vpop.f32.mrf.mxu1 }
 0x1eb   : > { %v5231_v17 = vadd.f32 %v7661_v61, %v4413_v39 }
 0x1ec   : > { %v7708_v2 = vpop.f32.mrf.mxu0  ;;  %v5104_v31 = vpop.f32.mrf.mxu1 }
 0x1ed   : > { %v5824_v11 = vadd.f32 %v7708_v2, %v5230_v19  ;;  %v5229_v7 = vadd.f32 %v5104_v31, %v4411_v3 }
 0x1ee   : > { %v5695_v16 = vpop.f32.mrf.mxu0  ;;  %v7664_v51 = vpop.f32.mrf.mxu1 }
 0x1ef   : > { %v5822_v52 = vadd.f32 %v5695_v16, %v5228_v18  ;;  %v5930_v14 = vadd.f32 %v9660_v49, %v5824_v11  ;;  %v5234_v57 = vadd.f32 %v7664_v51, %v9565_v55 }
 0x1f0   : > { %v7709_v62 = vpop.f32.mrf.mxu0  ;;  %v5117_v60 = vpop.f32.mrf.mxu1 }
 0x1f1   : > { %v5825_v28 = vadd.f32 %v7709_v62, %v5231_v17  ;;  %v5928_v29 = vadd.f32 %v9660_v49, %v5822_v52  ;;  %v5232_v56 = vadd.f32 %v5117_v60, %v9569_v58  ;;  %v5962_v1 = vmax.f32 %v5930_v14, 0.0 }
 0x1f2   : > { %v5698_v0 = vpop.f32.mrf.mxu0  ;;  %v7665_v10 = vpop.f32.mrf.mxu1 }
 0x1f3   : > { %v5931_v33 = vadd.f32 %v9660_v49, %v5825_v28  ;;  %v5823_v37 = vadd.f32 %v5698_v0, %v5229_v7  ;;  %v5235_v39 = vadd.f32 %v7665_v10, %v4417_v15  ;;  %v5960_v61 = vmax.f32 %v5928_v29, 0.0 }
 0x1f4   : > { %v7712_v19 = vpop.f32.mrf.mxu0  ;;  %v5120_v18 = vpop.f32.mrf.mxu1  ;;  %v3968_v29 = vadd.f32 %v9581_v25, %v9491_v47 }
 0x1f5   : > { %v5963_v36 = vmax.f32 %v5931_v33, 0.0  ;;  %v5929_v55 = vadd.f32 %v9660_v49, %v5823_v37  ;;  %v5828_v53 = vadd.f32 %v7712_v19, %v5234_v57  ;;  %v5233_v3 = vadd.f32 %v5120_v18, %v4415_v35 }
 0x1f6   : > { %v5711_v58 = vpop.f32.mrf.mxu0 }
 0x1f7   : > { %v7003_v46 = vpack.c.bf16 %v5963_v36, %v5962_v1  ;;  %v5961_v2 = vmax.f32 %v5929_v55, 0.0  ;;  %v5826_v38 = vadd.f32 %v5711_v58, %v5232_v56  ;;  %v5934_v31 = vadd.f32 %v9660_v49, %v5828_v53 }
 0x1f8   : > { %v7713_v11 = vpop.f32.mrf.mxu0  ;;  %v4419_v55 = vadd.f32 %v9588_v27, %v3968_v29 }
 0x1f9   : > { %7075 = vst [vmem:[%s9678_s12 + $0x8] sm:$0xff] %v7003_v46   ;;  %v6998_v17 = vpack.c.bf16 %v5961_v2, %v5960_v61  ;;  %v5829_v16 = vadd.f32 %v7713_v11, %v5235_v39  ;;  %v5932_v52 = vadd.f32 %v9660_v49, %v5826_v38  ;;  %v5966_v62 = vmax.f32 %v5934_v31, 0.0 }
 0x1fa   : > { %v5714_v9 = vpop.f32.mrf.mxu0 }
 0x1fb   : > { %6999 = vst [vmem:[%s9678_s12] sm:$0xff] %v6998_v17   ;;  %v5935_v7 = vadd.f32 %v9660_v49, %v5829_v16  ;;  %v5827_v51 = vadd.f32 %v5714_v9, %v5233_v3  ;;  %v7668_v60 = vpop.f32.mrf.mxu1  ;;  %v5964_v33 = vmax.f32 %v5932_v52, 0.0 }
 0x1fc   : > { %v7716_v14 = vpop.f32.mrf.mxu0  ;;  %v5238_v0 = vadd.f32 %v7668_v60, %v9579_v12 }
 0x1fd   : > { %v5967_v28 = vmax.f32 %v5935_v7, 0.0  ;;  %v5933_v57 = vadd.f32 %v9660_v49, %v5827_v51  ;;  %v5133_v10 = vpop.f32.mrf.mxu1 }
 0x1fe   : > { %v5727_v15 = vpop.f32.mrf.mxu0  ;;  %v5832_v45 = vadd.f32 %v7716_v14, %v5238_v0  ;;  %v5236_v35 = vadd.f32 %v5133_v10, %v9583_v48 }
 0x1ff   : > { %v7013_v37 = vpack.c.bf16 %v5967_v28, %v5966_v62  ;;  %v5965_v56 = vmax.f32 %v5933_v57, 0.0  ;;  %v7669_v19 = vpop.f32.mrf.mxu1 }
 0x200   : > { %v7717_v36 = vpop.f32.mrf.mxu0  ;;  %v5830_v47 = vadd.f32 %v5727_v15, %v5236_v35  ;;  %v5239_v25 = vadd.f32 %v7669_v19, %v4421_v4  ;;  %v5938_v53 = vadd.f32 %v9660_v49, %v5832_v45 }
 0x201   : > { %7077 = vst [vmem:[%s9678_s12 + $0x18] sm:$0xff] %v7013_v37   ;;  %v7008_v1 = vpack.c.bf16 %v5965_v56, %v5964_v33  ;;  %v5136_v12 = vpop.f32.mrf.mxu1 }
 0x202   : > { %v5833_v39 = vadd.f32 %v7717_v36, %v5239_v25  ;;  %v5237_v18 = vadd.f32 %v5136_v12, %v4419_v55  ;;  %v5730_v61 = vpop.f32.mrf.mxu0  ;;  %v5936_v5 = vadd.f32 %v9660_v49, %v5830_v47  ;;  %v5970_v46 = vmax.f32 %v5938_v53, 0.0 }
 0x203   : > { %7076 = vst [vmem:[%s9678_s12 + $0x10] sm:$0xff] %v7008_v1  }
 0x204   : > { %v5939_v48 = vadd.f32 %v9660_v49, %v5833_v39  ;;  %v5831_v58 = vadd.f32 %v5730_v61, %v5237_v18  ;;  %v5968_v3 = vmax.f32 %v5936_v5, 0.0 }
 0x206   : > { %v5971_v2 = vmax.f32 %v5939_v48, 0.0  ;;  %v5937_v27 = vadd.f32 %v9660_v49, %v5831_v58 }
 0x208   : > { %v7720_v38 = vpop.f32.mrf.mxu0  ;;  %v7023_v11 = vpack.c.bf16 %v5971_v2, %v5970_v46  ;;  %v5969_v17 = vmax.f32 %v5937_v27, 0.0 }
 0x209   : > { %v7672_v31 = vpop.f32.mrf.mxu1 }
 0x20a   : > { %v5242_v16 = vadd.f32 %v7672_v31, %v9592_v21  ;;  %v5743_v9 = vpop.f32.mrf.mxu0  ;;  %7079 = vst [vmem:[%s9678_s12 + $0x28] sm:$0xff] %v7023_v11   ;;  %v7018_v52 = vpack.c.bf16 %v5969_v17, %v5968_v3 }
 0x20b   : > { %v5149_v7 = vpop.f32.mrf.mxu1 }
 0x20c   : > { %v5836_v51 = vadd.f32 %v7720_v38, %v5242_v16  ;;  %v5240_v41 = vadd.f32 %v5149_v7, %v9595_v6  ;;  %7078 = vst [vmem:[%s9678_s12 + $0x20] sm:$0xff] %v7018_v52   ;;  %v7721_v62 = vpop.f32.mrf.mxu0 }
 0x20d   : > { %v7673_v14 = vpop.f32.mrf.mxu1 }
 0x20e   : > { %v5834_v28 = vadd.f32 %v5743_v9, %v5240_v41  ;;  %v5243_v57 = vadd.f32 %v7673_v14, %v9598_v50  ;;  %v5942_v29 = vadd.f32 %v9660_v49, %v5836_v51  ;;  %v5746_v15 = vpop.f32.mrf.mxu0 }
 0x20f   : > { %v5152_v60 = vpop.f32.mrf.mxu1 }
 0x210   : > { %v5837_v0 = vadd.f32 %v7721_v62, %v5243_v57  ;;  %v5241_v21 = vadd.f32 %v5152_v60, %v9601_v44  ;;  %v5940_v33 = vadd.f32 %v9660_v49, %v5834_v28  ;;  %v5974_v56 = vmax.f32 %v5942_v29, 0.0 }
 0x212   : > { %v5943_v37 = vadd.f32 %v9660_v49, %v5837_v0  ;;  %v5835_v6 = vadd.f32 %v5746_v15, %v5241_v21  ;;  %v5972_v45 = vmax.f32 %v5940_v33, 0.0 }
 0x214   : > { %v5975_v10 = vmax.f32 %v5943_v37, 0.0  ;;  %v5941_v4 = vadd.f32 %v9660_v49, %v5835_v6 }
 0x216   : > { %v7033_v50 = vpack.c.bf16 %v5975_v10, %v5974_v56  ;;  %v5973_v35 = vmax.f32 %v5941_v4, 0.0  ;;  %v7724_v1 = vpop.f32.mrf.mxu0 }
 0x217   : > { %v7676_v19 = vpop.f32.mrf.mxu1 }
 0x218   : > { %7081 = vst [vmem:[%s9678_s12 + $0x38] sm:$0xff] %v7033_v50   ;;  %v7028_v36 = vpack.c.bf16 %v5973_v35, %v5972_v45  ;;  %v5246_v44 = vadd.f32 %v7676_v19, %v9604_v42  ;;  %v5759_v55 = vpop.f32.mrf.mxu0 }
 0x219   : > { %v5165_v47 = vpop.f32.mrf.mxu1 }
 0x21a   : > { %7080 = vst [vmem:[%s9678_s12 + $0x30] sm:$0xff] %v7028_v36   ;;  %v5840_v25 = vadd.f32 %v7724_v1, %v5246_v44  ;;  %v5244_v12 = vadd.f32 %v5165_v47, %v9607_v40  ;;  %v7725_v39 = vpop.f32.mrf.mxu0 }
 0x21b   : > { %v7677_v53 = vpop.f32.mrf.mxu1 }
 0x21c   : > { %v5838_v18 = vadd.f32 %v5759_v55, %v5244_v12  ;;  %v5247_v61 = vadd.f32 %v7677_v53, %v9610_v30  ;;  %v5946_v48 = vadd.f32 %v9660_v49, %v5840_v25  ;;  %v5762_v2 = vpop.f32.mrf.mxu0 }
 0x21d   : > { %v5168_v5 = vpop.f32.mrf.mxu1 }
 0x21e   : > { %v5841_v58 = vadd.f32 %v7725_v39, %v5247_v61  ;;  %v5245_v46 = vadd.f32 %v5168_v5, %v9613_v20  ;;  %v5944_v42 = vadd.f32 %v9660_v49, %v5838_v18  ;;  %v5978_v40 = vmax.f32 %v5946_v48, 0.0 }
 0x220   : > { %v5947_v27 = vadd.f32 %v9660_v49, %v5841_v58  ;;  %v5839_v38 = vadd.f32 %v5762_v2, %v5245_v46  ;;  %v5976_v17 = vmax.f32 %v5944_v42, 0.0 }
 0x222   : > { %v5979_v3 = vmax.f32 %v5947_v27, 0.0  ;;  %v5945_v11 = vadd.f32 %v9660_v49, %v5839_v38 }
 0x224   : > { %v7043_v30 = vpack.c.bf16 %v5979_v3, %v5978_v40  ;;  %v5977_v31 = vmax.f32 %v5945_v11, 0.0  ;;  %v7728_v16 = vpop.f32.mrf.mxu0 }
 0x225   : > { %v7680_v9 = vpop.f32.mrf.mxu1 }
 0x226   : > { %7083 = vst [vmem:[%s9678_s12 + $0x48] sm:$0xff] %v7043_v30   ;;  %v7038_v52 = vpack.c.bf16 %v5977_v31, %v5976_v17  ;;  %v5250_v20 = vadd.f32 %v7680_v9, %v9616_v54  ;;  %v5775_v7 = vpop.f32.mrf.mxu0 }
 0x227   : > { %v5181_v51 = vpop.f32.mrf.mxu1 }
 0x228   : > { %7082 = vst [vmem:[%s9678_s12 + $0x40] sm:$0xff] %v7038_v52   ;;  %v5844_v41 = vadd.f32 %v7728_v16, %v5250_v20  ;;  %v5248_v14 = vadd.f32 %v5181_v51, %v9619_v59  ;;  %v7729_v28 = vpop.f32.mrf.mxu0 }
 0x229   : > { %v7681_v62 = vpop.f32.mrf.mxu1 }
 0x22a   : > { %v5842_v57 = vadd.f32 %v5775_v7, %v5248_v14  ;;  %v5251_v60 = vadd.f32 %v7681_v62, %v9622_v23  ;;  %v5950_v0 = vadd.f32 %v9660_v49, %v5844_v41  ;;  %v5778_v33 = vpop.f32.mrf.mxu0 }
 0x22b   : > { %v5184_v29 = vpop.f32.mrf.mxu1 }
 0x22c   : > { %v5845_v21 = vadd.f32 %v7729_v28, %v5251_v60  ;;  %v5249_v15 = vadd.f32 %v5184_v29, %v9625_v8  ;;  %v5948_v54 = vadd.f32 %v9660_v49, %v5842_v57  ;;  %v5982_v59 = vmax.f32 %v5950_v0, 0.0 }
 0x22e   : > { %v5951_v37 = vadd.f32 %v9660_v49, %v5845_v21  ;;  %v5843_v6 = vadd.f32 %v5778_v33, %v5249_v15  ;;  %v5980_v4 = vmax.f32 %v5948_v54, 0.0 }
 0x230   : > { %v5983_v56 = vmax.f32 %v5951_v37, 0.0  ;;  %v5949_v10 = vadd.f32 %v9660_v49, %v5843_v6 }
 0x232   : > { %v7053_v23 = vpack.c.bf16 %v5983_v56, %v5982_v59  ;;  %v5981_v45 = vmax.f32 %v5949_v10, 0.0  ;;  %v7732_v50 = vpop.f32.mrf.mxu0 }
 0x233   : > { %v7684_v35 = vpop.f32.mrf.mxu1 }
 0x234   : > { %7085 = vst [vmem:[%s9678_s12 + $0x58] sm:$0xff] %v7053_v23   ;;  %v7048_v1 = vpack.c.bf16 %v5981_v45, %v5980_v4  ;;  %v5254_v8 = vadd.f32 %v7684_v35, %v9628_v22  ;;  %v5791_v19 = vpop.f32.mrf.mxu0 }
 0x235   : > { %v5197_v36 = vpop.f32.mrf.mxu1 }
 0x236   : > { %7084 = vst [vmem:[%s9678_s12 + $0x50] sm:$0xff] %v7048_v1   ;;  %v5848_v44 = vadd.f32 %v7732_v50, %v5254_v8  ;;  %v5252_v55 = vadd.f32 %v5197_v36, %v9631_v63  ;;  %v7733_v25 = vpop.f32.mrf.mxu0 }
 0x237   : > { %v7685_v47 = vpop.f32.mrf.mxu1 }
 0x238   : > { %v5846_v12 = vadd.f32 %v5791_v19, %v5252_v55  ;;  %v5255_v53 = vadd.f32 %v7685_v47, %v9634_v24  ;;  %v5954_v18 = vadd.f32 %v9660_v49, %v5848_v44  ;;  %v5794_v48 = vpop.f32.mrf.mxu0 }
 0x239   : > { %v5200_v39 = vpop.f32.mrf.mxu1 }
 0x23a   : > { %v5849_v61 = vadd.f32 %v7733_v25, %v5255_v53  ;;  %v5253_v5 = vadd.f32 %v5200_v39, %v9637_v13  ;;  %v5952_v22 = vadd.f32 %v9660_v49, %v5846_v12  ;;  %v5986_v63 = vmax.f32 %v5954_v18, 0.0 }
 0x23c   : > { %v5955_v58 = vadd.f32 %v9660_v49, %v5849_v61  ;;  %v5847_v46 = vadd.f32 %v5794_v48, %v5253_v5  ;;  %v5984_v27 = vmax.f32 %v5952_v22, 0.0 }
 0x23e   : > { %v5987_v2 = vmax.f32 %v5955_v58, 0.0  ;;  %v5953_v42 = vadd.f32 %v9660_v49, %v5847_v46 }
 0x240   : > { %v7063_v24 = vpack.c.bf16 %v5987_v2, %v5986_v63  ;;  %v5985_v38 = vmax.f32 %v5953_v42, 0.0  ;;  %v7736_v40 = vpop.f32.mrf.mxu0 }
 0x241   : > { %v7688_v3 = vpop.f32.mrf.mxu1 }
 0x242   : > { %7087 = vst [vmem:[%s9678_s12 + $0x68] sm:$0xff] %v7063_v24   ;;  %v7058_v11 = vpack.c.bf16 %v5985_v38, %v5984_v27  ;;  %v5258_v13 = vadd.f32 %v7688_v3, %v9640_v26  ;;  %v5807_v17 = vpop.f32.mrf.mxu0 }
 0x243   : > { %v5213_v30 = vpop.f32.mrf.mxu1 }
 0x244   : > { %7086 = vst [vmem:[%s9678_s12 + $0x60] sm:$0xff] %v7058_v11   ;;  %v5852_v31 = vadd.f32 %v7736_v40, %v5258_v13  ;;  %v5256_v16 = vadd.f32 %v5213_v30, %v9645_v34  ;;  %v7737_v52 = vpop.f32.mrf.mxu0 }
 0x245   : > { %v7689_v9 = vpop.f32.mrf.mxu1 }
 0x246   : > { %v5850_v20 = vadd.f32 %v5807_v17, %v5256_v16  ;;  %v5259_v7 = vadd.f32 %v7689_v9, %v9649_v32  ;;  %v5958_v41 = vadd.f32 %v9660_v49, %v5852_v31  ;;  %v5810_v26 = vpop.f32.mrf.mxu0 }
 0x247   : > { %v5216_v51 = vpop.f32.mrf.mxu1 }
 0x248   : > { %v5853_v14 = vadd.f32 %v7737_v52, %v5259_v7  ;;  %v5257_v62 = vadd.f32 %v5216_v51, %v9653_v43  ;;  %v5956_v28 = vadd.f32 %v9660_v49, %v5850_v20  ;;  %v5990_v34 = vmax.f32 %v5958_v41, 0.0 }
 0x24a   : > { %v5959_v57 = vadd.f32 %v9660_v49, %v5853_v14  ;;  %v5851_v60 = vadd.f32 %v5810_v26, %v5257_v62  ;;  %v5988_v21 = vmax.f32 %v5956_v28, 0.0 }
 0x24c   : > { %v5991_v29 = vmax.f32 %v5959_v57, 0.0  ;;  %v5957_v0 = vadd.f32 %v9660_v49, %v5851_v60 }
 0x24e   : > { %v7073_v15 = vpack.c.bf16 %v5991_v29, %v5990_v34  ;;  %v5989_v32 = vmax.f32 %v5957_v0, 0.0 }
 0x250   : > { %7089 = vst [vmem:[%s9678_s12 + $0x78] sm:$0xff] %v7073_v15   ;;  %v7068_v33 = vpack.c.bf16 %v5989_v32, %v5988_v21 }
 0x252   : > { %7088 = vst [vmem:[%s9678_s12 + $0x70] sm:$0xff] %v7068_v33  }
 0x253 PF: > { %s13_s14 = sadd.s32 1, %s7921_s14   ;;  %s9844_s12 = smov %s7917_s13 }
 0x254   : > { %p10_p5 = scmp.ge.s32.totalorder %s13_s14, 4   ;;  %s9845_s13 = smov %s9847_s15 }
 0x256   :  { %12 = sbr.rel (!%p10_p5) target bundleno = 2 (0x2), region = 86 }

</bundles_post_ra>
